<compile_context>
chip_gen: v5e
topology: v5e:2x2
jax: 0.10.0
libtpu: 0.0.40
codegen_flags: <defaults>
</compile_context>

<pallas_src>
import functools
import math

import jax
import jax.numpy as jnp
from jax.experimental import pallas as pl
from jax.experimental.pallas import tpu as pltpu

IN_FEATURES = 8
HIDDEN = 513        # model hidden width (PyTorch spec)
HIDDEN_PAD = 640    # zero-padded to a multiple of 128 for clean (8,128) tiles


# ---------------------------------------------------------------------------
# Kernel
# ---------------------------------------------------------------------------
def _mlp_kernel(x_ref, w1_ref, b1_ref, w2_ref, b2_ref,
                w3_ref, b3_ref, wo_ref, bo_ref, o_ref):
    f32, bf16 = jnp.float32, jnp.bfloat16

    # hidden1 + ReLU   (dropout1 is identity at inference)
    h = jnp.dot(x_ref[...], w1_ref[...], preferred_element_type=f32) + b1_ref[...]
    h = jnp.maximum(h, 0.0)

    # hidden2 + ReLU   (dropout2 is identity at inference)
    h = jnp.dot(h.astype(bf16), w2_ref[...], preferred_element_type=f32) + b2_ref[...]
    h = jnp.maximum(h, 0.0)

    # hidden3 + ReLU   (dropout3 is identity at inference)
    h = jnp.dot(h.astype(bf16), w3_ref[...], preferred_element_type=f32) + b3_ref[...]
    h = jnp.maximum(h, 0.0)

    # output Linear(513 -> 1): an N=1 matmul lights up 1/256 of the MXU, so do
    # the multiply + lane-reduce on the VPU/XLU instead (f32; padding is zero
    # in wo so the result is exact).
    logits = jnp.sum(h * wo_ref[...], axis=-1, keepdims=True) + bo_ref[...]

    # Numerically stable sigmoid: z = exp(-|l|) in (0, 1], so 1 + z in (1, 2]
    # and the approximate EUP reciprocal never sees inf.
    z = jnp.exp(-jnp.abs(logits))
    inv = pl.reciprocal(1.0 + z, approx=True)
    o_ref[...] = jnp.where(logits >= 0.0, inv, z * inv)


# ---------------------------------------------------------------------------
# Parameter packing (one-time, hoisted out of the per-call path)
# ---------------------------------------------------------------------------
def _round_up(n, m):
    return ((n + m - 1) // m) * m


def _pad2d(a, rows, cols):
    return jnp.pad(a, ((0, rows - a.shape[0]), (0, cols - a.shape[1])))


def pack_params(params):
    """Pack PyTorch nn.Linear-shaped params once at load time.

    (out, in) -> (in, out), zero-padded 513 -> 640 (padded columns get zero
    weight & bias and ReLU(0)=0, so results are exact), weights cast to bf16
    (half the HBM weight traffic, bf16-native MXU).  Biases stay f32 since
    they are added after the f32 accumulation.
    """
    f32, bf16 = jnp.float32, jnp.bfloat16
    return {
        "w1t": _pad2d(params["w1"].T, IN_FEATURES, HIDDEN_PAD).astype(bf16),  # (8, 640)
        "w2t": _pad2d(params["w2"].T, HIDDEN_PAD, HIDDEN_PAD).astype(bf16),   # (640, 640)
        "w3t": _pad2d(params["w3"].T, HIDDEN_PAD, HIDDEN_PAD).astype(bf16),   # (640, 640)
        "wo":  _pad2d(params["wo"], 1, HIDDEN_PAD).astype(f32),               # (1, 640)
        "b1":  _pad2d(params["b1"].reshape(1, -1), 1, HIDDEN_PAD).astype(f32),
        "b2":  _pad2d(params["b2"].reshape(1, -1), 1, HIDDEN_PAD).astype(f32),
        "b3":  _pad2d(params["b3"].reshape(1, -1), 1, HIDDEN_PAD).astype(f32),
        "bo":  params["bo"].reshape(1, 1).astype(f32),                        # (1, 1)
    }


# ---------------------------------------------------------------------------
# Forward wrapper
# ---------------------------------------------------------------------------
def _choose_tm(batch, tile_m):
    """Pick the batch tile size (rows per grid step).

    - always a multiple of 8 (sublane constraint),
    - balanced: per-tile padding <= 7 rows (not up to tm-1),
    - >= 2 tiles (even count when cheap) so v7x's 2 TensorCores both run.
    """
    tile_m = max(8, _round_up(int(tile_m), 8))
    n_tiles = max(1, math.ceil(batch / tile_m))
    if n_tiles == 1 and batch > 8:
        n_tiles = 2
    if n_tiles > 1 and n_tiles % 2 == 1 and batch > 8 * (n_tiles + 1):
        n_tiles += 1
    return _round_up(math.ceil(batch / n_tiles), 8)


@functools.partial(jax.jit, static_argnames=("tile_m",))
def salary_predictor_forward(x, packed, *, tile_m=1024):
    """x: (B, 8) float32.  packed: output of pack_params()."""
    B = x.shape[0]
    tm = _choose_tm(B, tile_m)
    num_tiles = math.ceil(B / tm)
    b_pad = num_tiles * tm

    # bf16 x halves the x-tile DMA bytes; matmul accumulation stays f32.
    x_p = jnp.pad(x, ((0, b_pad - B), (0, 0))).astype(jnp.bfloat16)

    tiled = lambda i: (i, 0)    # x / out: one batch tile per grid step
    const = lambda i: (0, 0)    # weights / biases: same block every step

    def const_spec(shape):
        # Constant block index -> VMEM-resident, DMA'd once; single buffer
        # (default double-buffering would waste ~0.8 MiB per 640x640 weight).
        return pl.BlockSpec(shape, const, pipeline_mode=pl.Buffered(1))

    # VMEM budget: bf16 weights ~1.6 MB single-buffered, (TM,640) f32
    # activation temporaries ~2.6 MB at TM=1024 — far under the scoped limit
    # on all generations (including v7x's 64 MiB physical VMEM).
    out = pl.pallas_call(
        _mlp_kernel,
        out_shape=jax.ShapeDtypeStruct((b_pad, 1), jnp.float32),
        grid_spec=pltpu.PrefetchScalarGridSpec(
            num_scalar_prefetch=0,
            grid=(num_tiles,),
            in_specs=[
                pl.BlockSpec((tm, IN_FEATURES), tiled),
                const_spec((IN_FEATURES, HIDDEN_PAD)),
                const_spec((1, HIDDEN_PAD)),
                const_spec((HIDDEN_PAD, HIDDEN_PAD)),
                const_spec((1, HIDDEN_PAD)),
                const_spec((HIDDEN_PAD, HIDDEN_PAD)),
                const_spec((1, HIDDEN_PAD)),
                const_spec((1, HIDDEN_PAD)),
                const_spec((1, 1)),
            ],
            # (TM, 1) output is only 4 B/row of writeback; lane-sparse stores
            # are hidden under the MXU here (measure-first micro-opt skipped).
            out_specs=pl.BlockSpec((tm, 1), tiled),
        ),
        compiler_params=pltpu.CompilerParams(
            dimension_semantics=("parallel",)),   # batch tiles shard over v7x's 2 TCs
    )(x_p, packed["w1t"], packed["b1"], packed["w2t"], packed["b2"],
      packed["w3t"], packed["b3"], packed["wo"], packed["bo"])

    return out[:B]


# ---------------------------------------------------------------------------
# Synthetic params + references
# ---------------------------------------------------------------------------
def init_params(key):
    """Deterministic synthetic parameters with PyTorch nn.Linear shapes."""
    ks = jax.random.split(key, 8)

    def u(k, shape, fan_in):
        bound = 1.0 / jnp.sqrt(fan_in)
        return jax.random.uniform(k, shape, jnp.float32, -bound, bound)

    return {
        "w1": u(ks[0], (HIDDEN, IN_FEATURES), float(IN_FEATURES)),
        "b1": u(ks[1], (HIDDEN,), float(IN_FEATURES)),
        "w2": u(ks[2], (HIDDEN, HIDDEN), float(HIDDEN)),
        "b2": u(ks[3], (HIDDEN,), float(HIDDEN)),
        "w3": u(ks[4], (HIDDEN, HIDDEN), float(HIDDEN)),
        "b3": u(ks[5], (HIDDEN,), float(HIDDEN)),
        "wo": u(ks[6], (1, HIDDEN), float(HIDDEN)),
        "bo": u(ks[7], (1,), float(HIDDEN)),
    }


def _ref_forward_f32(x, params):
    """Pure-f32 reference matching the PyTorch forward pass exactly."""
    h = jnp.maximum(x @ params["w1"].T + params["b1"], 0.0)
    h = jnp.maximum(h @ params["w2"].T + params["b2"], 0.0)
    h = jnp.maximum(h @ params["w3"].T + params["b3"], 0.0)
    return jax.nn.sigmoid(h @ params["wo"].T + params["bo"])


def _ref_forward_mixed(x, params):
    """Reference mirroring the kernel's precision (bf16 matmuls, f32 accum)."""
    bf = lambda a: a.astype(jnp.bfloat16)
    f32 = jnp.float32
    h = jnp.maximum(jnp.dot(bf(x), bf(params["w1"].T),
                            preferred_element_type=f32) + params["b1"], 0.0)
    h = jnp.maximum(jnp.dot(bf(h), bf(params["w2"].T),
                            preferred_element_type=f32) + params["b2"], 0.0)
    h = jnp.maximum(jnp.dot(bf(h), bf(params["w3"].T),
                            preferred_element_type=f32) + params["b3"], 0.0)
    logits = jnp.sum(h * params["wo"], axis=-1, keepdims=True) + params["bo"].reshape(1, 1)
    return jax.nn.sigmoid(logits)


if __name__ == "__main__":
    key = jax.random.PRNGKey(0)
    k_x, k_p = jax.random.split(key)

    B = 16  # small batch; tile selection yields 2 tiles of 8 rows
    x = jax.random.normal(k_x, (B, IN_FEATURES), jnp.float32)
    params = init_params(k_p)

    packed = pack_params(params)          # one-time packing, outside the forward
    packed = jax.block_until_ready(packed)

    out = salary_predictor_forward(x, packed)
    out = jax.block_until_ready(out)
    assert out.shape == (B, 1)

    ref_mixed = _ref_forward_mixed(x, params)   # same bf16/f32 mix as kernel
    ref_f32 = _ref_forward_f32(x, params)       # exact PyTorch-equivalent f32

    assert jnp.allclose(out, ref_mixed, atol=2e-3, rtol=2e-3), \
        float(jnp.max(jnp.abs(out - ref_mixed)))
    assert jnp.allclose(out, ref_f32, atol=5e-2, rtol=5e-2), \
        float(jnp.max(jnp.abs(out - ref_f32)))

    print("KERNEL_OK")
</pallas_src>

<mosaic_0001>
module attributes {stable_mosaic.version = 11 : i64} {
  func.func @_mlp_kernel(%arg0: i32, %arg1: memref<8x8xbf16, #tpu.memory_space<vmem>>, %arg2: memref<8x640xbf16, #tpu.memory_space<vmem>>, %arg3: memref<1x640xf32, #tpu.memory_space<vmem>>, %arg4: memref<640x640xbf16, #tpu.memory_space<vmem>>, %arg5: memref<1x640xf32, #tpu.memory_space<vmem>>, %arg6: memref<640x640xbf16, #tpu.memory_space<vmem>>, %arg7: memref<1x640xf32, #tpu.memory_space<vmem>>, %arg8: memref<1x640xf32, #tpu.memory_space<vmem>>, %arg9: memref<1x1xf32, #tpu.memory_space<vmem>>, %arg10: memref<8x1xf32, #tpu.memory_space<vmem>>) attributes {dimension_semantics = [#tpu.dimension_semantics<parallel>], iteration_bounds = array<i64: 2>, scalar_prefetch = 0 : i64, scratch_operands = 0 : i64, tpu.core_type = #tpu.core_type<tc>, window_params = [{transform_indices = @transform_0, window_bounds = array<i64: 8, 8>}, {pipeline_mode = #tpu.pipeline_mode<synchronous>, transform_indices = @transform_1, window_bounds = array<i64: 8, 640>}, {pipeline_mode = #tpu.pipeline_mode<synchronous>, transform_indices = @transform_2, window_bounds = array<i64: 1, 640>}, {pipeline_mode = #tpu.pipeline_mode<synchronous>, transform_indices = @transform_3, window_bounds = array<i64: 640, 640>}, {pipeline_mode = #tpu.pipeline_mode<synchronous>, transform_indices = @transform_4, window_bounds = array<i64: 1, 640>}, {pipeline_mode = #tpu.pipeline_mode<synchronous>, transform_indices = @transform_5, window_bounds = array<i64: 640, 640>}, {pipeline_mode = #tpu.pipeline_mode<synchronous>, transform_indices = @transform_6, window_bounds = array<i64: 1, 640>}, {pipeline_mode = #tpu.pipeline_mode<synchronous>, transform_indices = @transform_7, window_bounds = array<i64: 1, 640>}, {pipeline_mode = #tpu.pipeline_mode<synchronous>, transform_indices = @transform_8, window_bounds = array<i64: 1, 1>}, {transform_indices = @transform_9, window_bounds = array<i64: 8, 1>}]} {
    %c0 = arith.constant 0 : index
    %c0_0 = arith.constant 0 : index
    %0 = vector.load %arg1[%c0, %c0_0] : memref<8x8xbf16, #tpu.memory_space<vmem>>, vector<8x8xbf16>
    %c0_1 = arith.constant 0 : index
    %c0_2 = arith.constant 0 : index
    %1 = vector.load %arg2[%c0_1, %c0_2] : memref<8x640xbf16, #tpu.memory_space<vmem>>, vector<8x640xbf16>
    %cst = arith.constant dense<0.000000e+00> : vector<8x640xf32>
    %2 = tpu.matmul %0, %1, %cst {dimension_numbers = #tpu.dot_dimension_numbers<[1], [0], [0], [1], [0, 0, 1, 1], [], []>} : vector<8x8xbf16>, vector<8x640xbf16>, vector<8x640xf32> -> vector<8x640xf32>
    %c0_3 = arith.constant 0 : index
    %c0_4 = arith.constant 0 : index
    %3 = vector.load %arg3[%c0_3, %c0_4] : memref<1x640xf32, #tpu.memory_space<vmem>>, vector<1x640xf32>
    %4 = vector.broadcast %3 : vector<1x640xf32> to vector<8x640xf32>
    %5 = arith.addf %2, %4 : vector<8x640xf32>
    %cst_5 = arith.constant 0.000000e+00 : f32
    %6 = vector.broadcast %cst_5 : f32 to vector<8x640xf32>
    %7 = arith.maximumf %5, %6 : vector<8x640xf32>
    %8 = arith.truncf %7 : vector<8x640xf32> to vector<8x640xbf16>
    %c0_6 = arith.constant 0 : index
    %c0_7 = arith.constant 0 : index
    %9 = vector.load %arg4[%c0_6, %c0_7] : memref<640x640xbf16, #tpu.memory_space<vmem>>, vector<640x640xbf16>
    %cst_8 = arith.constant dense<0.000000e+00> : vector<8x640xf32>
    %10 = tpu.matmul %8, %9, %cst_8 {dimension_numbers = #tpu.dot_dimension_numbers<[1], [0], [0], [1], [0, 0, 1, 1], [], []>} : vector<8x640xbf16>, vector<640x640xbf16>, vector<8x640xf32> -> vector<8x640xf32>
    %c0_9 = arith.constant 0 : index
    %c0_10 = arith.constant 0 : index
    %11 = vector.load %arg5[%c0_9, %c0_10] : memref<1x640xf32, #tpu.memory_space<vmem>>, vector<1x640xf32>
    %12 = vector.broadcast %11 : vector<1x640xf32> to vector<8x640xf32>
    %13 = arith.addf %10, %12 : vector<8x640xf32>
    %cst_11 = arith.constant 0.000000e+00 : f32
    %14 = vector.broadcast %cst_11 : f32 to vector<8x640xf32>
    %15 = arith.maximumf %13, %14 : vector<8x640xf32>
    %16 = arith.truncf %15 : vector<8x640xf32> to vector<8x640xbf16>
    %c0_12 = arith.constant 0 : index
    %c0_13 = arith.constant 0 : index
    %17 = vector.load %arg6[%c0_12, %c0_13] : memref<640x640xbf16, #tpu.memory_space<vmem>>, vector<640x640xbf16>
    %cst_14 = arith.constant dense<0.000000e+00> : vector<8x640xf32>
    %18 = tpu.matmul %16, %17, %cst_14 {dimension_numbers = #tpu.dot_dimension_numbers<[1], [0], [0], [1], [0, 0, 1, 1], [], []>} : vector<8x640xbf16>, vector<640x640xbf16>, vector<8x640xf32> -> vector<8x640xf32>
    %c0_15 = arith.constant 0 : index
    %c0_16 = arith.constant 0 : index
    %19 = vector.load %arg7[%c0_15, %c0_16] : memref<1x640xf32, #tpu.memory_space<vmem>>, vector<1x640xf32>
    %20 = vector.broadcast %19 : vector<1x640xf32> to vector<8x640xf32>
    %21 = arith.addf %18, %20 : vector<8x640xf32>
    %cst_17 = arith.constant 0.000000e+00 : f32
    %22 = vector.broadcast %cst_17 : f32 to vector<8x640xf32>
    %23 = arith.maximumf %21, %22 : vector<8x640xf32>
    %c0_18 = arith.constant 0 : index
    %c0_19 = arith.constant 0 : index
    %24 = vector.load %arg8[%c0_18, %c0_19] : memref<1x640xf32, #tpu.memory_space<vmem>>, vector<1x640xf32>
    %25 = vector.broadcast %24 : vector<1x640xf32> to vector<8x640xf32>
    %26 = arith.mulf %23, %25 : vector<8x640xf32>
    %cst_20 = arith.constant dense<0.000000e+00> : vector<8xf32>
    %27 = vector.multi_reduction <add>, %26, %cst_20 [1] : vector<8x640xf32> to vector<8xf32>
    %28 = vector.shape_cast %27 : vector<8xf32> to vector<8x1xf32>
    %c0_21 = arith.constant 0 : index
    %c0_22 = arith.constant 0 : index
    %29 = vector.load %arg9[%c0_21, %c0_22] : memref<1x1xf32, #tpu.memory_space<vmem>>, vector<1x1xf32>
    %30 = vector.broadcast %29 : vector<1x1xf32> to vector<8x1xf32>
    %31 = arith.addf %28, %30 : vector<8x1xf32>
    %32 = math.absf %31 : vector<8x1xf32>
    %cst_23 = arith.constant 0.000000e+00 : f32
    %33 = vector.broadcast %cst_23 : f32 to vector<8x1xf32>
    %34 = arith.subf %33, %32 : vector<8x1xf32>
    %35 = math.exp %34 : vector<8x1xf32>
    %cst_24 = arith.constant 1.000000e+00 : f32
    %36 = vector.broadcast %cst_24 : f32 to vector<8x1xf32>
    %37 = arith.addf %36, %35 : vector<8x1xf32>
    %38 = tpu.reciprocal %37 {approx = true} : vector<8x1xf32> -> vector<8x1xf32>
    %cst_25 = arith.constant 0.000000e+00 : f32
    %39 = vector.broadcast %cst_25 : f32 to vector<8x1xf32>
    %40 = arith.cmpf oge, %31, %39 : vector<8x1xf32>
    %41 = arith.mulf %35, %38 : vector<8x1xf32>
    %42 = arith.select %40, %38, %41 : vector<8x1xi1>, vector<8x1xf32>
    %c0_26 = arith.constant 0 : index
    %c0_27 = arith.constant 0 : index
    %43 = vector.load %arg10[%c0_26, %c0_27] : memref<8x1xf32, #tpu.memory_space<vmem>>, vector<8x1xf32>
    tpu.vector_store %arg10[%c0_26, %c0_27], %42 {strides = array<i32>} : memref<8x1xf32, #tpu.memory_space<vmem>>, vector<8x1xf32>,
    return
  }
  func.func @transform_0(%arg0: i32) -> (i32, i32) {
    %c0_i32 = arith.constant 0 : i32
    %c0_i32_0 = arith.constant 0 : i32
    return %arg0, %c0_i32 : i32, i32
  }
  func.func @transform_1(%arg0: i32) -> (i32, i32) {
    %c0_i32 = arith.constant 0 : i32
    %c0_i32_0 = arith.constant 0 : i32
    %c0_i32_1 = arith.constant 0 : i32
    return %c0_i32, %c0_i32_0 : i32, i32
  }
  func.func @transform_2(%arg0: i32) -> (i32, i32) {
    %c0_i32 = arith.constant 0 : i32
    %c0_i32_0 = arith.constant 0 : i32
    %c0_i32_1 = arith.constant 0 : i32
    return %c0_i32, %c0_i32_0 : i32, i32
  }
  func.func @transform_3(%arg0: i32) -> (i32, i32) {
    %c0_i32 = arith.constant 0 : i32
    %c0_i32_0 = arith.constant 0 : i32
    %c0_i32_1 = arith.constant 0 : i32
    return %c0_i32, %c0_i32_0 : i32, i32
  }
  func.func @transform_4(%arg0: i32) -> (i32, i32) {
    %c0_i32 = arith.constant 0 : i32
    %c0_i32_0 = arith.constant 0 : i32
    %c0_i32_1 = arith.constant 0 : i32
    return %c0_i32, %c0_i32_0 : i32, i32
  }
  func.func @transform_5(%arg0: i32) -> (i32, i32) {
    %c0_i32 = arith.constant 0 : i32
    %c0_i32_0 = arith.constant 0 : i32
    %c0_i32_1 = arith.constant 0 : i32
    return %c0_i32, %c0_i32_0 : i32, i32
  }
  func.func @transform_6(%arg0: i32) -> (i32, i32) {
    %c0_i32 = arith.constant 0 : i32
    %c0_i32_0 = arith.constant 0 : i32
    %c0_i32_1 = arith.constant 0 : i32
    return %c0_i32, %c0_i32_0 : i32, i32
  }
  func.func @transform_7(%arg0: i32) -> (i32, i32) {
    %c0_i32 = arith.constant 0 : i32
    %c0_i32_0 = arith.constant 0 : i32
    %c0_i32_1 = arith.constant 0 : i32
    return %c0_i32, %c0_i32_0 : i32, i32
  }
  func.func @transform_8(%arg0: i32) -> (i32, i32) {
    %c0_i32 = arith.constant 0 : i32
    %c0_i32_0 = arith.constant 0 : i32
    %c0_i32_1 = arith.constant 0 : i32
    return %c0_i32, %c0_i32_0 : i32, i32
  }
  func.func @transform_9(%arg0: i32) -> (i32, i32) {
    %c0_i32 = arith.constant 0 : i32
    %c0_i32_0 = arith.constant 0 : i32
    return %arg0, %c0_i32 : i32, i32
  }
}

</mosaic_0001>

<bundles_post_ra>
// kernel: salary_predictor_forward.1
= control target key start
LH: loop header
LB: loop body
LE: loop exit
PB: predicated region body
PF: predicated region fallthrough
CT: control target
= control target key end

     0   :  { %s6396_s0 = inlined_call_operand.vmem [shape: bf16[16,8], index: 0, kind: input, shape index: {}]   ;;  %s6397_s1 = inlined_call_operand.vmem [shape: bf16[8,640], index: 1, kind: input, shape index: {}]   ;;  %s6398_s2 = inlined_call_operand.vmem [shape: f32[1,640], index: 2, kind: input, shape index: {}]   ;;  %s6399_s3 = inlined_call_operand.hbm [shape: bf16[640,640], index: 3, kind: input, shape index: {}]   ;;  %s6400_s4 = inlined_call_operand.hbm [shape: f32[1,640], index: 4, kind: input, shape index: {}]   ;;  %s6401_s5 = inlined_call_operand.hbm [shape: bf16[640,640], index: 5, kind: input, shape index: {}]   ;;  %s6402_s6 = inlined_call_operand.hbm [shape: f32[1,640], index: 6, kind: input, shape index: {}]   ;;  %s6403_s7 = inlined_call_operand.vmem [shape: f32[1,640], index: 7, kind: input, shape index: {}]   ;;  %s6404_s8 = inlined_call_operand.<no memory space> [shape: f32[1,1], index: 8, kind: input, shape index: {}]   ;;  %s6405_s9 = inlined_call_operand.vmem [shape: f32[16,1], index: 9, kind: output, shape index: {}]  }
   0x1   :  { %v14_v0 = vstv %s6404_s8 }
   0x2   :  { %15 = vst [vmem:[#allocation2] sm:$0x1] %v14_v0 }
   0x3   :  { %16 = vsyncpa [#allocation4], 0 }
   0x4   :  { %17 = vsyncpa [#allocation6], 0 }
   0x5   :  { %18 = vsyncpa [#allocation9], 0  ;;  %s6178_s11 = smov 0  }
   0x6 LB: > { %s281_s14 = sshll.u32 %s6400_s4, 4  ;;  %s6187_s8 = sadd.s32 4294967295, %s6117_s11   ;;  %s6117_s11 = sphi %s6178_s11, %s24_s11   ;;  %s282_s14 = int_to_ptr.hbm [resolvable:$true] %s281_s14 }
   0x7   : > { %p3902_p0 = scmp.ge.s32.totalorder %s6117_s11, 1  ;;  %p249_p1 = scmp.lt.s32.totalorder %s6117_s11, 3 }
   0x8   : > { %p5951_p2 = scmp.eq.s32.totalorder %s6187_s8, 0  ;;  %s6119_s16 = smov [#allocation5]  }
   0x9   : > { %p6192_p3 = pnand %p3902_p0, %p249_p1  ;;  %s283_s17 = sshll.u32 %s6119_s16, 4  ;;  %s284_s17 = int_to_ptr.vmem [resolvable:$true] %s283_s17 }
   0xa   : > { %s266_s20 = sshll.u32 %s6399_s3, 4  ;;  %s6120_s22 = smov [#allocation3]   ;;  %s267_s20 = int_to_ptr.hbm [resolvable:$true] %s266_s20 }
   0xb   : > { %p5938_p4 = pneg %p6192_p3  ;;  %s268_s23 = sshll.u32 %s6120_s22, 4  ;;  %s269_s23 = int_to_ptr.vmem [resolvable:$true] %s268_s23 }
   0xc   : > { %s292_s26 = sshll.u32 %s6401_s5, 4  ;;  %s6121_s27 = smov 320   ;;  %s293_s26 = int_to_ptr.hbm [resolvable:$true] %s292_s26 }
   0xd   : > { %p6203_p5 = pnand %p5951_p2, %p5938_p4  ;;  %s6122_s28 = smov 20  }
   0xe   : > { %s6123_s29 = smov [#allocation7]   ;;  %s307_s13 = sshll.u32 %s6402_s6, 4  ;;  %s308_s13 = int_to_ptr.hbm [resolvable:$true] %s307_s13 }
   0xf   : > { %5944 = dma.hbm_to_vmem [thread:$0]  (!%p6203_p5), %s282_s14, 80, %s284_s17, [#allocation6]  }
  0x10   : > { %5941 = dma.hbm_to_vmem [thread:$0]  (!%p6203_p5), %s267_s20, 25600, %s269_s23, [#allocation4], %s6121_s27, %s6121_s27, %s6122_s28  }
  0x11   : > { %s294_s30 = sshll.u32 %s6123_s29, 4  ;;  %s6124_s16 = smov [#allocation8]   ;;  %s295_s30 = int_to_ptr.vmem [resolvable:$true] %s294_s30 }
  0x12   : > { %5947 = dma.hbm_to_vmem [thread:$0]  (!%p6203_p5), %s293_s26, 25600, %s295_s30, [#allocation6], %s6121_s27, %s6121_s27, %s6122_s28  }
  0x13   : > { %s309_s18 = sshll.u32 %s6124_s16, 4  ;;  %335 = sbr.rel (%p6192_p3) target bundleno = 876 (0x36c), region = 56  ;;  %s310_s18 = int_to_ptr.vmem [resolvable:$true] %s309_s18 }
  0x14   : > { %5950 = dma.hbm_to_vmem [thread:$0]  (!%p6203_p5), %s308_s13, 80, %s310_s18, [#allocation9]  }
  0x18   : > { %6104 = dma.done.wait (%p5951_p2), [#allocation4], 25600  }
  0x19   : > { %6106 = vsyncadd (%p5951_p2), [#allocation4], 4294941696 }
  0x1a   : > { %6108 = dma.done.wait (%p5951_p2), [#allocation6], 25680  }
  0x1b   : > { %6110 = vsyncadd (%p5951_p2), [#allocation6], 4294941616 }
  0x1c   : > { %6112 = dma.done.wait (%p5951_p2), [#allocation9], 80  }
  0x1d   : > { %6114 = vsyncadd (%p5951_p2), [#allocation9], 4294967216  ;;  %p385_p6 = scmp.lt.s32.totalorder %s6187_s8, 1  ;;  %v395_v1 = vld [vmem:[%s6397_s1] sm:$0xff]  ;;  %v396_v2 = vld [vmem:[%s6397_s1 + $0x8] sm:$0xff]  ;;  %vm427_vm0 = vcmask 1043456  }
  0x1e   : > { %v413_v3 = vunpack.c.l.b16 %v395_v1  ;;  %v414_v4 = vunpack.c.h.b16 %v395_v1  ;;  %v415_v5 = vunpack.c.l.b16 %v396_v2  ;;  %v416_v6 = vunpack.c.h.b16 %v396_v2  ;;  %v397_v7 = vld [vmem:[%s6397_s1 + $0x10] sm:$0xf]  ;;  %v4062_v8 = vld [vmem:[#allocation3 + $0x118] sm:$0xf]  ;;  %v5554_v13 = vld [vmem:[#allocation3 + $0x100] sm:$0xf0] }
  0x1f   : > { %s6409_s8 = smov (!%p385_p6, %s6187_s8), 1  ;;  %v5559_v9 = vld [vmem:[#allocation3 + $0x128] sm:$0xf0]  ;;  %v417_v10 = vunpack.c.l.b16 %v397_v7  ;;  %v4042_v12 = vld [vmem:[#allocation3 + $0xf0] sm:$0xf]  ;;  %vm423_vm1 = vcmask 64512  }
  0x20   : > { %s3913_s20 = sshll.u32 %s6409_s8, 2  ;;  %v4063_v11 = vor.u32 %v5559_v9, %v4062_v8  ;;  %v418_v14 = vpack.c.b16 %v413_v3, %v413_v3  ;;  %v419_v15 = vpack.c.b16 %v414_v4, %v414_v4  ;;  %v420_v16 = vpack.c.b16 %v415_v5, %v415_v5  ;;  %v4382_v18 = vld [vmem:[#allocation3 + $0x398] sm:$0xf]  ;;  %v5639_v19 = vld [vmem:[#allocation3 + $0x3a8] sm:$0xf0]  ;;  %s3914_s30 = sshll.u32 %s6409_s8, 3 }
  0x21   : > { %s388_s25 = scalar_lea.vmem %s6396_s0, %s3913_s20  ;;  %v421_v17 = vpack.c.b16 %v416_v6, %v416_v6  ;;  %v422_v20 = vpack.c.b16 %v417_v10, %v417_v10  ;;  %v4043_v21 = vor.u32 %v5554_v13, %v4042_v12  ;;  %v4222_v22 = vld [vmem:[#allocation3 + $0x258] sm:$0xf]  ;;  %v5599_v23 = vld [vmem:[#allocation3 + $0x268] sm:$0xf0]  ;;  %v4022_v24 = vld [vmem:[#allocation3 + $0xc8] sm:$0xf]  ;;  %v4383_v32 = vor.u32 %v5639_v19, %v4382_v18  ;;  %s392_s13 = scalar_lea.vmem %s6405_s9, %s3914_s30 }
  0x22   : > { %1810 = vmatpush.bf16.msra.mxu1 %v4063_v11  ;;  %v429_v25 = vsel %vm427_vm0, %v418_v14, 0  ;;  %v432_v26 = vsel %vm427_vm0, %v419_v15, 0  ;;  %v435_v27 = vsel %vm427_vm0, %v420_v16, 0  ;;  %v5549_v29 = vld [vmem:[#allocation3 + $0xd8] sm:$0xf0]  ;;  %v4223_v33 = vor.u32 %v5599_v23, %v4222_v22 }
  0x23   : > { %v438_v28 = vsel %vm427_vm0, %v421_v17, 0  ;;  %450 = vmatpush.bf16.msra.mxu0 %v429_v25  ;;  %463 = vmatpush.bf16.msra.mxu3 %v432_v26  ;;  %v6256_v30 = vld [vmem:[%s388_s25] sm:$0xf]  ;;  %v441_v31 = vsel %vm427_vm0, %v422_v20, 0  ;;  %v4362_v34 = vld [vmem:[#allocation3 + $0x370] sm:$0xf]  ;;  %v4023_v36 = vor.u32 %v5549_v29, %v4022_v24 }
  0x24   : > { %476 = vmatpush.bf16.msra.mxu2 %v435_v27  ;;  %v5634_v35 = vld [vmem:[#allocation3 + $0x380] sm:$0xf0]  ;;  %v4202_v37 = vld [vmem:[#allocation3 + $0x230] sm:$0xf]  ;;  %v4002_v39 = vld [vmem:[#allocation3 + $0xa0] sm:$0xf] }
  0x25   : > { %v5594_v38 = vld [vmem:[#allocation3 + $0x240] sm:$0xf0]  ;;  %v5544_v40 = vld [vmem:[#allocation3 + $0xb0] sm:$0xf0]  ;;  %v4363_v41 = vor.u32 %v5634_v35, %v4362_v34  ;;  %v4342_v43 = vld [vmem:[#allocation3 + $0x348] sm:$0xf] }
  0x26   : > { %1811 = vmatpush.bf16.msra.mxu1 %v4043_v21  ;;  %3915 = vmatmul.msk.bf16.vlgmr.msra.gmra.mxu0 %vm423_vm1, %v6256_v30  ;;  %v4203_v42 = vor.u32 %v5594_v38, %v4202_v37  ;;  %v5629_v44 = vld [vmem:[#allocation3 + $0x358] sm:$0xf0]  ;;  %v4003_v45 = vor.u32 %v5544_v40, %v4002_v39  ;;  %v4182_v46 = vld [vmem:[#allocation3 + $0x208] sm:$0xf]  ;;  %v3982_v48 = vld [vmem:[#allocation3 + $0x78] sm:$0xf] }
  0x27   : > { %489 = vmatpush.bf16.msrb.mxu3 %v438_v28  ;;  %502 = vmatpush.bf16.msrb.mxu0 %v441_v31  ;;  %v5589_v47 = vld [vmem:[#allocation3 + $0x218] sm:$0xf0]  ;;  %v5539_v49 = vld [vmem:[#allocation3 + $0x88] sm:$0xf0]  ;;  %v4542_v50 = vld [vmem:[#allocation3 + $0x4d8] sm:$0xf]  ;;  %v4343_v52 = vor.u32 %v5629_v44, %v4342_v43 }
  0x28   : > { %3916 = vmatmul.msk.bf16.vlgmr.msra.gmra.mxu3 %vm423_vm1, %v6256_v30  ;;  %3917 = vmatmul.msk.bf16.vlgmr.msra.gmra.mxu2 %vm423_vm1, %v6256_v30  ;;  %v5679_v51 = vld [vmem:[#allocation3 + $0x4e8] sm:$0xf0]  ;;  %v4183_v54 = vor.u32 %v5589_v47, %v4182_v46  ;;  %v4322_v55 = vld [vmem:[#allocation3 + $0x320] sm:$0xf]  ;;  %v5624_v56 = vld [vmem:[#allocation3 + $0x330] sm:$0xf0]  ;;  %v3983_v58 = vor.u32 %v5539_v49, %v3982_v48 }
  0x29   : > { %1823 = vmatpush.bf16.msrb.mxu2 %v4223_v33  ;;  %v4543_v53 = vor.u32 %v5679_v51, %v4542_v50  ;;  %v4522_v57 = vld [vmem:[#allocation3 + $0x4b0] sm:$0xf]  ;;  %v4162_v59 = vld [vmem:[#allocation3 + $0x1e0] sm:$0xf]  ;;  %v5584_v60 = vld [vmem:[#allocation3 + $0x1f0] sm:$0xf0]  ;;  %v4323_v1 = vor.u32 %v5624_v56, %v4322_v55 }
  0x2a   : > { %1812 = vmatpush.bf16.msra.mxu1 %v4023_v36  ;;  %v5674_v61 = vld [vmem:[#allocation3 + $0x4c0] sm:$0xf0]  ;;  %v3962_v62 = vld [vmem:[#allocation3 + $0x50] sm:$0xf]  ;;  %v4302_v2 = vld [vmem:[#allocation3 + $0x2f8] sm:$0xf]  ;;  %v4163_v3 = vor.u32 %v5584_v60, %v4162_v59 }
  0x2b   : > { %1836 = vmatpush.bf16.msra.mxu3 %v4383_v32  ;;  %1849 = vmatpush.bf16.msra.mxu0 %v4543_v53  ;;  %v5534_v63 = vld [vmem:[#allocation3 + $0x60] sm:$0xf0]  ;;  %v4523_v0 = vor.u32 %v5674_v61, %v4522_v57  ;;  %v5619_v4 = vld [vmem:[#allocation3 + $0x308] sm:$0xf0]  ;;  %v4502_v5 = vld [vmem:[#allocation3 + $0x488] sm:$0xf] }
  0x2c   : > { %v5669_v6 = vld [vmem:[#allocation3 + $0x498] sm:$0xf0]  ;;  %v3963_v7 = vor.u32 %v5534_v63, %v3962_v62  ;;  %v4142_v8 = vld [vmem:[#allocation3 + $0x1b8] sm:$0xf]  ;;  %v5579_v9 = vld [vmem:[#allocation3 + $0x1c8] sm:$0xf0]  ;;  %v4303_v14 = vor.u32 %v5619_v4, %v4302_v2 }
  0x2d   : > { %1824 = vmatpush.bf16.msrb.mxu2 %v4203_v42  ;;  %v4503_v10 = vor.u32 %v5669_v6, %v4502_v5  ;;  %v3942_v11 = vld [vmem:[#allocation3 + $0x28] sm:$0xf]  ;;  %v5529_v12 = vld [vmem:[#allocation3 + $0x38] sm:$0xf0]  ;;  %v4482_v13 = vld [vmem:[#allocation3 + $0x460] sm:$0xf]  ;;  %v4143_v16 = vor.u32 %v5579_v9, %v4142_v8 }
  0x2e   : > { %1813 = vmatpush.bf16.msra.mxu1 %v4003_v45  ;;  %v5664_v15 = vld [vmem:[#allocation3 + $0x470] sm:$0xf0]  ;;  %v4282_v17 = vld [vmem:[#allocation3 + $0x2d0] sm:$0xf]  ;;  %v5614_v18 = vld [vmem:[#allocation3 + $0x2e0] sm:$0xf0]  ;;  %v3943_v19 = vor.u32 %v5529_v12, %v3942_v11 }
  0x2f   : > { %1837 = vmatpush.bf16.msra.mxu3 %v4363_v41  ;;  %1850 = vmatpush.bf16.msra.mxu0 %v4523_v0  ;;  %v4122_v20 = vld [vmem:[#allocation3 + $0x190] sm:$0xf]  ;;  %v5574_v21 = vld [vmem:[#allocation3 + $0x1a0] sm:$0xf0]  ;;  %v3922_v22 = vld [vmem:[#allocation3] sm:$0xf]  ;;  %v4483_v23 = vor.u32 %v5664_v15, %v4482_v13  ;;  %v4283_v27 = vor.u32 %v5614_v18, %v4282_v17 }
  0x30   : > { %v5524_v24 = vld [vmem:[#allocation3 + $0x10] sm:$0xf0]  ;;  %v4462_v25 = vld [vmem:[#allocation3 + $0x438] sm:$0xf]  ;;  %v5659_v26 = vld [vmem:[#allocation3 + $0x448] sm:$0xf0]  ;;  %v4123_v31 = vor.u32 %v5574_v21, %v4122_v20 }
  0x31   : > { %1825 = vmatpush.bf16.msrb.mxu2 %v4183_v54  ;;  %v4702_v28 = vld [vmem:[#allocation3 + $0x618] sm:$0xf]  ;;  %v5719_v29 = vld [vmem:[#allocation3 + $0x628] sm:$0xf0]  ;;  %v4262_v32 = vld [vmem:[#allocation3 + $0x2a8] sm:$0xf]  ;;  %v3923_v34 = vor.u32 %v5524_v24, %v3922_v22  ;;  %v4463_v37 = vor.u32 %v5659_v26, %v4462_v25 }
  0x32   : > { %1814 = vmatpush.bf16.msra.mxu1 %v3983_v58  ;;  %v5609_v33 = vld [vmem:[#allocation3 + $0x2b8] sm:$0xf0]  ;;  %v4102_v35 = vld [vmem:[#allocation3 + $0x168] sm:$0xf]  ;;  %v4703_v38 = vor.u32 %v5719_v29, %v4702_v28  ;;  %v4682_v39 = vld [vmem:[#allocation3 + $0x5f0] sm:$0xf] }
  0x33   : > { %1838 = vmatpush.bf16.msra.mxu3 %v4343_v52  ;;  %1851 = vmatpush.bf16.msra.mxu0 %v4503_v10  ;;  %v5569_v36 = vld [vmem:[#allocation3 + $0x178] sm:$0xf0]  ;;  %v5654_v40 = vld [vmem:[#allocation3 + $0x420] sm:$0xf0]  ;;  %v4263_v41 = vor.u32 %v5609_v33, %v4262_v32  ;;  %v4082_v43 = vld [vmem:[#allocation3 + $0x140] sm:$0xf] }
  0x34   : > { %v5714_v42 = vld [vmem:[#allocation3 + $0x600] sm:$0xf0]  ;;  %v5564_v44 = vld [vmem:[#allocation3 + $0x150] sm:$0xf0]  ;;  %v4103_v45 = vor.u32 %v5569_v36, %v4102_v35  ;;  %v4242_v46 = vld [vmem:[#allocation3 + $0x280] sm:$0xf] }
  0x35   : > { %1826 = vmatpush.bf16.msrb.mxu2 %v4163_v3  ;;  %v5604_v47 = vld [vmem:[#allocation3 + $0x290] sm:$0xf0]  ;;  %v5557_v48 = vld [vmem:[#allocation3 + $0x11c] sm:$0xf]  ;;  %v4064_v49 = vld [vmem:[#allocation3 + $0x12c] sm:$0xf0]  ;;  %v4683_v53 = vor.u32 %v5714_v42, %v4682_v39  ;;  %v4083_v59 = vor.u32 %v5564_v44, %v4082_v43 }
  0x36   : > { %1815 = vmatpush.bf16.msra.mxu1 %v3963_v7  ;;  %3919 = vmatmul.msk.bf16.vlgmr.msrb.gmra.mxu0 %vm423_vm1, %v6256_v30  ;;  %v5597_v50 = vld [vmem:[#allocation3 + $0x25c] sm:$0xf]  ;;  %v4224_v51 = vld [vmem:[#allocation3 + $0x26c] sm:$0xf0]  ;;  %v4422_v54 = vld [vmem:[#allocation3 + $0x3e8] sm:$0xf]  ;;  %v4243_v56 = vor.u32 %v5604_v47, %v4242_v46  ;;  %v4067_v61 = vor.u32 %v5557_v48, %v4064_v49 }
  0x37   : > { %1839 = vmatpush.bf16.msra.mxu3 %v4323_v1  ;;  %1852 = vmatpush.bf16.msra.mxu0 %v4483_v23  ;;  %v5649_v55 = vld [vmem:[#allocation3 + $0x3f8] sm:$0xf0]  ;;  %v4662_v57 = vld [vmem:[#allocation3 + $0x5c8] sm:$0xf]  ;;  %v4227_v60 = vor.u32 %v5597_v50, %v4224_v51  ;;  %v5552_v62 = vld [vmem:[#allocation3 + $0xf4] sm:$0xf] }
  0x38   : > { %3918 = vmatmul.msk.bf16.vlgmr.msrb.gmra.mxu3 %vm423_vm1, %v6256_v30  ;;  %v4442_v30 = vld [vmem:[#allocation3 + $0x410] sm:$0xf]  ;;  %v5709_v58 = vld [vmem:[#allocation3 + $0x5d8] sm:$0xf0]  ;;  %v5592_v63 = vld [vmem:[#allocation3 + $0x234] sm:$0xf]  ;;  %v4423_v1 = vor.u32 %v5649_v55, %v4422_v54 }
  0x39   : > { %1827 = vmatpush.bf16.msrb.mxu2 %v4143_v16  ;;  %v4443_v52 = vor.u32 %v5654_v40, %v4442_v30  ;;  %v4204_v0 = vld [vmem:[#allocation3 + $0x244] sm:$0xf0]  ;;  %v4663_v2 = vor.u32 %v5709_v58, %v4662_v57  ;;  %v4402_v4 = vld [vmem:[#allocation3 + $0x3c0] sm:$0xf]  ;;  %v5644_v5 = vld [vmem:[#allocation3 + $0x3d0] sm:$0xf0] }
  0x3a   : > { %1816 = vmatpush.bf16.msra.mxu1 %v3943_v19  ;;  %v4044_v3 = vld [vmem:[#allocation3 + $0x104] sm:$0xf0]  ;;  %v4642_v6 = vld [vmem:[#allocation3 + $0x5a0] sm:$0xf]  ;;  %v5704_v7 = vld [vmem:[#allocation3 + $0x5b0] sm:$0xf0]  ;;  %v4207_v8 = vor.u32 %v5592_v63, %v4204_v0  ;;  %v4403_v12 = vor.u32 %v5644_v5, %v4402_v4 }
  0x3b   : > { %1840 = vmatpush.bf16.msra.mxu3 %v4303_v14  ;;  %1853 = vmatpush.bf16.msra.mxu0 %v4463_v37  ;;  %v4047_v9 = vor.u32 %v5552_v62, %v4044_v3  ;;  %v5587_v10 = vld [vmem:[#allocation3 + $0x20c] sm:$0xf]  ;;  %v4184_v11 = vld [vmem:[#allocation3 + $0x21c] sm:$0xf0]  ;;  %v4643_v13 = vor.u32 %v5704_v7, %v4642_v6  ;;  %v4622_v16 = vld [vmem:[#allocation3 + $0x578] sm:$0xf] }
  0x3c   : > { %v5547_v14 = vld [vmem:[#allocation3 + $0xcc] sm:$0xf]  ;;  %v4024_v15 = vld [vmem:[#allocation3 + $0xdc] sm:$0xf0]  ;;  %v4187_v18 = vor.u32 %v5587_v10, %v4184_v11  ;;  %v5582_v20 = vld [vmem:[#allocation3 + $0x1e4] sm:$0xf] }
  0x3d   : > { %1828 = vmatpush.bf16.msrb.mxu2 %v4123_v31  ;;  %v5699_v17 = vld [vmem:[#allocation3 + $0x588] sm:$0xf0]  ;;  %v4027_v19 = vor.u32 %v5547_v14, %v4024_v15  ;;  %v4164_v21 = vld [vmem:[#allocation3 + $0x1f4] sm:$0xf0]  ;;  %v5542_v23 = vld [vmem:[#allocation3 + $0xa4] sm:$0xf] }
  0x3e   : > { %1817 = vmatpush.bf16.msra.mxu1 %v3923_v34  ;;  %v4623_v22 = vor.u32 %v5699_v17, %v4622_v16  ;;  %v4004_v24 = vld [vmem:[#allocation3 + $0xb4] sm:$0xf0]  ;;  %v4602_v25 = vld [vmem:[#allocation3 + $0x550] sm:$0xf]  ;;  %v5694_v26 = vld [vmem:[#allocation3 + $0x560] sm:$0xf0] }
  0x3f   : > { %1841 = vmatpush.bf16.msra.mxu3 %v4283_v27  ;;  %1854 = vmatpush.bf16.msra.mxu0 %v4443_v52  ;;  %v4167_v27 = vor.u32 %v5582_v20, %v4164_v21  ;;  %v4007_v28 = vor.u32 %v5542_v23, %v4004_v24  ;;  %v4603_v29 = vor.u32 %v5694_v26, %v4602_v25  ;;  %v5537_v31 = vld [vmem:[#allocation3 + $0x7c] sm:$0xf]  ;;  %v3984_v32 = vld [vmem:[#allocation3 + $0x8c] sm:$0xf0]  ;;  %v4582_v30 = vld [vmem:[#allocation3 + $0x528] sm:$0xf] }
  0x40   : > { %v5577_v33 = vld [vmem:[#allocation3 + $0x1bc] sm:$0xf]  ;;  %v3987_v34 = vor.u32 %v5537_v31, %v3984_v32  ;;  %v4144_v35 = vld [vmem:[#allocation3 + $0x1cc] sm:$0xf0]  ;;  %v5532_v42 = vld [vmem:[#allocation3 + $0x54] sm:$0xf] }
  0x41   : > { %1829 = vmatpush.bf16.msrb.mxu2 %v4103_v45  ;;  %v5637_v36 = vld [vmem:[#allocation3 + $0x39c] sm:$0xf]  ;;  %v4384_v37 = vld [vmem:[#allocation3 + $0x3ac] sm:$0xf0]  ;;  %v3964_v43 = vld [vmem:[#allocation3 + $0x64] sm:$0xf0] }
  0x42   : > { %1862 = vmatpush.bf16.msrb.mxu1 %v4703_v38  ;;  %v4147_v38 = vor.u32 %v5577_v33, %v4144_v35  ;;  %v4387_v39 = vor.u32 %v5637_v36, %v4384_v37  ;;  %v5689_v40 = vld [vmem:[#allocation3 + $0x538] sm:$0xf0]  ;;  %v5572_v44 = vld [vmem:[#allocation3 + $0x194] sm:$0xf]  ;;  %v3967_v45 = vor.u32 %v5532_v42, %v3964_v43  ;;  %v4124_v46 = vld [vmem:[#allocation3 + $0x1a4] sm:$0xf0] }
  0x43   : > { %1842 = vmatpush.bf16.msra.mxu3 %v4263_v41  ;;  %1855 = vmatpush.bf16.msra.mxu0 %v4423_v1  ;;  %v4583_v41 = vor.u32 %v5689_v40, %v4582_v30  ;;  %v5632_v47 = vld [vmem:[#allocation3 + $0x374] sm:$0xf]  ;;  %v4364_v48 = vld [vmem:[#allocation3 + $0x384] sm:$0xf0]  ;;  %v4127_v49 = vor.u32 %v5572_v44, %v4124_v46  ;;  %v4562_v51 = vld [vmem:[#allocation3 + $0x500] sm:$0xf] }
  0x44   : > { %v4367_v50 = vor.u32 %v5632_v47, %v4364_v48  ;;  %v5684_v52 = vld [vmem:[#allocation3 + $0x510] sm:$0xf0]  ;;  %v5527_v54 = vld [vmem:[#allocation3 + $0x2c] sm:$0xf]  ;;  %v3944_v55 = vld [vmem:[#allocation3 + $0x3c] sm:$0xf0] }
  0x45   : > { %1830 = vmatpush.bf16.msrb.mxu2 %v4083_v59  ;;  %v5567_v57 = vld [vmem:[#allocation3 + $0x16c] sm:$0xf]  ;;  %v4104_v58 = vld [vmem:[#allocation3 + $0x17c] sm:$0xf0]  ;;  %v5522_v63 = vld [vmem:[#allocation3 + $0x4] sm:$0xf] }
  0x46   : > { %1863 = vmatpush.bf16.msrb.mxu1 %v4683_v53  ;;  %v4563_v53 = vor.u32 %v5684_v52, %v4562_v51  ;;  %v5627_v59 = vld [vmem:[#allocation3 + $0x34c] sm:$0xf]  ;;  %v3924_v0 = vld [vmem:[#allocation3 + $0x14] sm:$0xf0]  ;;  %v5562_v1 = vld [vmem:[#allocation3 + $0x144] sm:$0xf] }
  0x47   : > { %1843 = vmatpush.bf16.msra.mxu3 %v4243_v56  ;;  %1856 = vmatpush.bf16.msra.mxu0 %v4403_v12  ;;  %v3947_v56 = vor.u32 %v5527_v54, %v3944_v55  ;;  %v4084_v3 = vld [vmem:[#allocation3 + $0x154] sm:$0xf0]  ;;  %v5622_v4 = vld [vmem:[#allocation3 + $0x324] sm:$0xf]  ;;  %v5612_v11 = vld [vmem:[#allocation3 + $0x2d4] sm:$0xf] }
  0x48   : > { %v4324_v5 = vld [vmem:[#allocation3 + $0x334] sm:$0xf0]  ;;  %v4087_v6 = vor.u32 %v5562_v1, %v4084_v3  ;;  %v4284_v12 = vld [vmem:[#allocation3 + $0x2e4] sm:$0xf0]  ;;  %v5607_v14 = vld [vmem:[#allocation3 + $0x2ac] sm:$0xf] }
  0x49   : > { %1875 = vmatpush.bf16.msra.mxu2 %v4067_v61  ;;  %v4344_v61 = vld [vmem:[#allocation3 + $0x35c] sm:$0xf0]  ;;  %v4327_v7 = vor.u32 %v5622_v4, %v4324_v5  ;;  %v5677_v24 = vld [vmem:[#allocation3 + $0x4dc] sm:$0xf]  ;;  %v4544_v25 = vld [vmem:[#allocation3 + $0x4ec] sm:$0xf0] }
  0x4a   : > { %1864 = vmatpush.bf16.msrb.mxu1 %v4663_v2  ;;  %v4347_v62 = vor.u32 %v5627_v59, %v4344_v61  ;;  %v3927_v2 = vor.u32 %v5522_v63, %v3924_v0  ;;  %v4264_v15 = vld [vmem:[#allocation3 + $0x2bc] sm:$0xf0]  ;;  %v5672_v32 = vld [vmem:[#allocation3 + $0x4b4] sm:$0xf]  ;;  %v4524_v33 = vld [vmem:[#allocation3 + $0x4c4] sm:$0xf0] }
  0x4b   : > { %1888 = vmatpush.bf16.msrb.mxu3 %v4227_v60  ;;  %1901 = vmatpush.bf16.msrb.mxu0 %v4387_v39  ;;  %v4107_v60 = vor.u32 %v5567_v57, %v4104_v58  ;;  %v4267_v16 = vor.u32 %v5607_v14, %v4264_v15  ;;  %v6272_v17 = vld [vmem:[%s6398_s2] sm:$0x1f]  ;;  %v4527_v40 = vor.u32 %v5672_v32, %v4524_v33  ;;  %v5560_v42 = vld [vmem:[#allocation3 + $0x130] sm:$0xf0]  ;;  %v5667_v44 = vld [vmem:[#allocation3 + $0x48c] sm:$0xf] }
  0x4c   : > { %v400_v21 = vperm.slane %v6272_v17, 0  ;;  %v5717_v37 = vld [vmem:[#allocation3 + $0x61c] sm:$0xf]  ;;  %v4684_v51 = vld [vmem:[#allocation3 + $0x604] sm:$0xf0]  ;;  %vm3804_vm2 = vcmask 7168  }
  0x4d   : > { %1876 = vmatpush.bf16.msra.mxu2 %v4047_v9  ;;  %v4304_v9 = vld [vmem:[#allocation3 + $0x30c] sm:$0xf0]  ;;  %v4050_v54 = vld [vmem:[#allocation3 + $0xf8] sm:$0xf]  ;;  %v5555_v55 = vld [vmem:[#allocation3 + $0x108] sm:$0xf0] }
  0x4e   : > { %1865 = vmatpush.bf16.msrb.mxu1 %v4643_v13  ;;  %v4287_v13 = vor.u32 %v5612_v11, %v4284_v12  ;;  %v5662_v57 = vld [vmem:[#allocation3 + $0x464] sm:$0xf]  ;;  %v4484_v58 = vld [vmem:[#allocation3 + $0x474] sm:$0xf0]  ;;  %v4051_v61 = vor.u32 %v5555_v55, %v4050_v54  ;;  %v5707_v63 = vld [vmem:[#allocation3 + $0x5cc] sm:$0xf] }
  0x4f   : > { %1889 = vmatpush.bf16.msrb.mxu3 %v4207_v8  ;;  %1902 = vmatpush.bf16.msrb.mxu0 %v4367_v50  ;;  %v5617_v8 = vld [vmem:[#allocation3 + $0x2fc] sm:$0xf]  ;;  %v5712_v50 = vld [vmem:[#allocation3 + $0x5f4] sm:$0xf]  ;;  %v4664_v0 = vld [vmem:[#allocation3 + $0x5dc] sm:$0xf0] }
  0x50   : > { %v4307_v10 = vor.u32 %v5617_v8, %v4304_v9  ;;  %v4030_v3 = vld [vmem:[#allocation3 + $0xd0] sm:$0xf]  ;;  %v5550_v4 = vld [vmem:[#allocation3 + $0xe0] sm:$0xf0]  ;;  %v4667_v8 = vor.u32 %v5707_v63, %v4664_v0  ;;  %v403_v11 = vperm.slane %v6272_v17, 3 }
  0x51   : > { %1877 = vmatpush.bf16.msra.mxu2 %v4027_v19  ;;  %v4244_v19 = vld [vmem:[#allocation3 + $0x294] sm:$0xf0]  ;;  %v5702_v12 = vld [vmem:[#allocation3 + $0x5a4] sm:$0xf]  ;;  %v4010_v15 = vld [vmem:[#allocation3 + $0xa8] sm:$0xf] }
  0x52   : > { %1866 = vmatpush.bf16.msrb.mxu1 %v4623_v22  ;;  %v4230_v32 = vld [vmem:[#allocation3 + $0x260] sm:$0xf]  ;;  %v5600_v33 = vld [vmem:[#allocation3 + $0x270] sm:$0xf0]  ;;  %v5590_v63 = vld [vmem:[#allocation3 + $0x220] sm:$0xf0] }
  0x53   : > { %1890 = vmatpush.bf16.msrb.mxu3 %v4187_v18  ;;  %1903 = vmatpush.bf16.msrb.mxu0 %v4347_v62  ;;  %v5602_v18 = vld [vmem:[#allocation3 + $0x284] sm:$0xf]  ;;  %v5640_v54 = vld [vmem:[#allocation3 + $0x3b0] sm:$0xf0] }
  0x54   : > { %v4247_v20 = vor.u32 %v5602_v18, %v4244_v19  ;;  %v5652_v19 = vld [vmem:[#allocation3 + $0x414] sm:$0xf] }
  0x55   : > { %1878 = vmatpush.bf16.msra.mxu2 %v4007_v28  ;;  %v402_v28 = vperm.slane %v6272_v17, 2 }
  0x56   : > { %1867 = vmatpush.bf16.msrb.mxu1 %v4603_v29  ;;  %v4547_v29 = vor.u32 %v5677_v24, %v4544_v25  ;;  %v5697_v25 = vld [vmem:[#allocation3 + $0x57c] sm:$0xf] }
  0x57   : > { %1891 = vmatpush.bf16.msrb.mxu3 %v4167_v27  ;;  %1904 = vmatpush.bf16.msrb.mxu0 %v4327_v7  ;;  %v401_v27 = vperm.slane %v6272_v17, 1  ;;  %v4464_v7 = vld [vmem:[#allocation3 + $0x44c] sm:$0xf0] }
  0x59   : > { %1879 = vmatpush.bf16.msra.mxu2 %v3987_v34 }
  0x5a   : > { %1868 = vmatpush.bf16.msrb.mxu1 %v4583_v41  ;;  %v4070_v41 = vld [vmem:[#allocation3 + $0x120] sm:$0xf] }
  0x5b   : > { %1892 = vmatpush.bf16.msrb.mxu3 %v4147_v38  ;;  %1905 = vmatpush.bf16.msrb.mxu0 %v4307_v10  ;;  %v4704_v38 = vld [vmem:[#allocation3 + $0x62c] sm:$0xf0]  ;;  %v4031_v10 = vor.u32 %v5550_v4, %v4030_v3  ;;  %v5635_v3 = vld [vmem:[#allocation3 + $0x388] sm:$0xf0]  ;;  %v5682_v4 = vld [vmem:[#allocation3 + $0x504] sm:$0xf] }
  0x5c   : > { %v4707_v47 = vor.u32 %v5717_v37, %v4704_v38 }
  0x5d   : > { %1880 = vmatpush.bf16.msra.mxu2 %v3967_v45  ;;  %v4504_v45 = vld [vmem:[#allocation3 + $0x49c] sm:$0xf0] }
  0x5e   : > { %1869 = vmatpush.bf16.msrb.mxu1 %v4563_v53  ;;  %v4507_v53 = vor.u32 %v5667_v44, %v4504_v45  ;;  %v5535_v44 = vld [vmem:[#allocation3 + $0x68] sm:$0xf0]  ;;  %v4210_v45 = vld [vmem:[#allocation3 + $0x238] sm:$0xf] }
  0x5f   : > { %1893 = vmatpush.bf16.msrb.mxu3 %v4127_v49  ;;  %1906 = vmatpush.bf16.msrb.mxu0 %v4287_v13  ;;  %v4071_v49 = vor.u32 %v5560_v42, %v4070_v41  ;;  %v4644_v13 = vld [vmem:[#allocation3 + $0x5b4] sm:$0xf0]  ;;  %v4604_v41 = vld [vmem:[#allocation3 + $0x564] sm:$0xf0] }
  0x60   : > { %v3970_v42 = vld [vmem:[#allocation3 + $0x58] sm:$0xf] }
  0x61   : > { %1881 = vmatpush.bf16.msra.mxu2 %v3947_v56  ;;  %v404_v56 = vperm.slane %v6272_v17, 4  ;;  %v4624_v17 = vld [vmem:[#allocation3 + $0x58c] sm:$0xf0]  ;;  %v3971_v55 = vor.u32 %v5535_v44, %v3970_v42 }
  0x62   : > { %v4627_v37 = vor.u32 %v5697_v25, %v4624_v17  ;;  %v4150_v17 = vld [vmem:[#allocation3 + $0x1c0] sm:$0xf]  ;;  %v4670_v44 = vld [vmem:[#allocation3 + $0x5d0] sm:$0xf] }
  0x63   : > { %1894 = vmatpush.bf16.msrb.mxu3 %v4107_v60  ;;  %1907 = vmatpush.bf16.msrb.mxu0 %v4267_v16  ;;  %v4687_v60 = vor.u32 %v5712_v50, %v4684_v51  ;;  %v5545_v16 = vld [vmem:[#allocation3 + $0xb8] sm:$0xf0] }
  0x64   : > { %v4011_v24 = vor.u32 %v5545_v16, %v4010_v15  ;;  %v4710_v15 = vld [vmem:[#allocation3 + $0x620] sm:$0xf]  ;;  %v5720_v16 = vld [vmem:[#allocation3 + $0x630] sm:$0xf0] }
  0x65   : > { %1882 = vmatpush.bf16.msra.mxu2 %v3927_v2  ;;  %v4487_v2 = vor.u32 %v5662_v57, %v4484_v58  ;;  %v5687_v57 = vld [vmem:[#allocation3 + $0x52c] sm:$0xf]  ;;  %v4584_v58 = vld [vmem:[#allocation3 + $0x53c] sm:$0xf0]  ;;  %v4711_v25 = vor.u32 %v5720_v16, %v4710_v15  ;;  %v4450_v15 = vld [vmem:[#allocation3 + $0x418] sm:$0xf] }
  0x66   : > { %v5655_v16 = vld [vmem:[#allocation3 + $0x428] sm:$0xf0] }
  0x67   : > { %1895 = vmatpush.bf16.msrb.mxu3 %v4087_v6  ;;  %1908 = vmatpush.bf16.msrb.mxu0 %v4247_v20  ;;  %v5657_v6 = vld [vmem:[#allocation3 + $0x43c] sm:$0xf]  ;;  %v4444_v20 = vld [vmem:[#allocation3 + $0x424] sm:$0xf0] }
  0x68   : > { %v4467_v14 = vor.u32 %v5657_v6, %v4464_v7  ;;  %v4564_v7 = vld [vmem:[#allocation3 + $0x514] sm:$0xf0] }
  0xa3   : > { %v452_v22 = vpop.f32.mrf.mxu0 }
  0xa4   : > { %v453_v23 = vadd.f32 %v452_v22, %v400_v21  ;;  %v4647_v22 = vor.u32 %v5702_v12, %v4644_v13  ;;  %v4550_v12 = vld [vmem:[#allocation3 + $0x4e0] sm:$0xf] }
  0xa6   : > { %v508_v26 = vmax.f32 %v453_v23, 0.0 }
  0xa8   : > { %v6277_v31 = vpack.c.bf16 %v508_v26, %v508_v26  ;;  %v3990_v26 = vld [vmem:[#allocation3 + $0x80] sm:$0xf] }
  0xaa   : > { %1818 = vmatmul.bf16.vlgmr.msra.gmra.mxu1 %v6277_v31 }
  0xab   : > { %v465_v34 = vpop.f32.mrf.mxu3  ;;  %v478_v36 = vpop.f32.mrf.mxu2  ;;  %1914 = vmatpush.bf16.msra.mxu1 %v4547_v29  ;;  %v5540_v29 = vld [vmem:[#allocation3 + $0x90] sm:$0xf0] }
  0xac   : > { %v466_v35 = vadd.f32 %v465_v34, %v401_v27  ;;  %v479_v39 = vadd.f32 %v478_v36, %v402_v28  ;;  %v454_v30 = vpop.f32.mrf.mxu0  ;;  %v4447_v27 = vor.u32 %v5652_v19, %v4444_v20  ;;  %v4424_v36 = vld [vmem:[#allocation3 + $0x3fc] sm:$0xf0]  ;;  %v4567_v19 = vor.u32 %v5682_v4, %v4564_v7  ;;  %v4350_v20 = vld [vmem:[#allocation3 + $0x350] sm:$0xf]  ;;  %v5660_v4 = vld [vmem:[#allocation3 + $0x450] sm:$0xf0] }
  0xad   : > { %v4231_v30 = vor.u32 %v5600_v33, %v4230_v32  ;;  %v4690_v32 = vld [vmem:[#allocation3 + $0x5f8] sm:$0xf]  ;;  %v5715_v33 = vld [vmem:[#allocation3 + $0x608] sm:$0xf0]  ;;  %v5700_v7 = vld [vmem:[#allocation3 + $0x590] sm:$0xf0] }
  0xae   : > { %v509_v43 = vmax.f32 %v466_v35, 0.0  ;;  %v510_v46 = vmax.f32 %v479_v39, 0.0  ;;  %v5647_v35 = vld [vmem:[#allocation3 + $0x3ec] sm:$0xf]  ;;  %v3991_v39 = vor.u32 %v5540_v29, %v3990_v26  ;;  %v5580_v26 = vld [vmem:[#allocation3 + $0x1d0] sm:$0xf0] }
  0xaf   : > { %1915 = vmatpush.bf16.msra.mxu1 %v4527_v40  ;;  %v5692_v40 = vld [vmem:[#allocation3 + $0x554] sm:$0xf]  ;;  %v5675_v29 = vld [vmem:[#allocation3 + $0x4c8] sm:$0xf0] }
  0xb0   : > { %v6280_v48 = vpack.c.bf16 %v509_v43, %v509_v43  ;;  %v6282_v52 = vpack.c.bf16 %v510_v46, %v510_v46  ;;  %v4427_v43 = vor.u32 %v5647_v35, %v4424_v36  ;;  %v5595_v46 = vld [vmem:[#allocation3 + $0x248] sm:$0xf0]  ;;  %v4607_v51 = vor.u32 %v5692_v40, %v4604_v41  ;;  %v5625_v35 = vld [vmem:[#allocation3 + $0x338] sm:$0xf0]  ;;  %v4510_v41 = vld [vmem:[#allocation3 + $0x490] sm:$0xf] }
  0xb1   : > { %v4151_v36 = vor.u32 %v5580_v26, %v4150_v17  ;;  %v5575_v40 = vld [vmem:[#allocation3 + $0x1a8] sm:$0xf0]  ;;  %v5605_v17 = vld [vmem:[#allocation3 + $0x298] sm:$0xf0]  ;;  %v5598_v26 = vld [vmem:[#allocation3 + $0x264] sm:$0xf] }
  0xb2   : > { %1831 = vmatmul.bf16.vlgmr.msrb.gmra.mxu2 %v6280_v48  ;;  %1844 = vmatmul.bf16.vlgmr.msra.gmra.mxu3 %v6282_v52 }
  0xb3   : > { %1927 = vmatpush.bf16.msrb.mxu2 %v4707_v47  ;;  %v467_v59 = vpop.f32.mrf.mxu3  ;;  %1940 = vmatpush.bf16.msra.mxu3 %v4071_v49  ;;  %v480_v62 = vpop.f32.mrf.mxu2  ;;  %v5642_v47 = vld [vmem:[#allocation3 + $0x3c4] sm:$0xf]  ;;  %v4404_v49 = vld [vmem:[#allocation3 + $0x3d4] sm:$0xf0] }
  0xb4   : > { %1916 = vmatpush.bf16.msra.mxu1 %v4507_v53  ;;  %v504_v1 = vpop.f32.mrf.mxu0  ;;  %v4390_v53 = vld [vmem:[#allocation3 + $0x3a0] sm:$0xf]  ;;  %v3950_v59 = vld [vmem:[#allocation3 + $0x30] sm:$0xf] }
  0xb5   : > { %v505_v5 = vadd.f32 %v504_v1, %v404_v56  ;;  %v4211_v56 = vor.u32 %v5595_v46, %v4210_v45  ;;  %v4190_v62 = vld [vmem:[#allocation3 + $0x210] sm:$0xf]  ;;  %v4391_v0 = vor.u32 %v5640_v54, %v4390_v53  ;;  %v4587_v1 = vor.u32 %v5687_v57, %v4584_v58  ;;  %v5710_v45 = vld [vmem:[#allocation3 + $0x5e0] sm:$0xf0]  ;;  %v4310_v46 = vld [vmem:[#allocation3 + $0x300] sm:$0xf] }
  0xb6   : > { %v4191_v6 = vor.u32 %v5590_v63, %v4190_v62  ;;  %v4110_v53 = vld [vmem:[#allocation3 + $0x170] sm:$0xf]  ;;  %v5570_v54 = vld [vmem:[#allocation3 + $0x180] sm:$0xf0]  ;;  %v5665_v57 = vld [vmem:[#allocation3 + $0x478] sm:$0xf0] }
  0xb7   : > { %1928 = vmatpush.bf16.msrb.mxu2 %v4687_v60  ;;  %v512_v9 = vmax.f32 %v505_v5, 0.0  ;;  %1941 = vmatpush.bf16.msra.mxu3 %v4051_v61  ;;  %v4407_v60 = vor.u32 %v5642_v47, %v4404_v49  ;;  %v5530_v61 = vld [vmem:[#allocation3 + $0x40] sm:$0xf0]  ;;  %v5620_v47 = vld [vmem:[#allocation3 + $0x310] sm:$0xf0]  ;;  %v4111_v62 = vor.u32 %v5570_v54, %v4110_v53 }
  0xb8   : > { %1917 = vmatpush.bf16.msra.mxu1 %v4487_v2  ;;  %v4370_v2 = vld [vmem:[#allocation3 + $0x378] sm:$0xf]  ;;  %v3951_v5 = vor.u32 %v5530_v61, %v3950_v59  ;;  %v4650_v58 = vld [vmem:[#allocation3 + $0x5a8] sm:$0xf]  ;;  %v5705_v59 = vld [vmem:[#allocation3 + $0x5b8] sm:$0xf0] }
  0xb9   : > { %v6288_v18 = vpack.c.bf16 %v512_v9, %v512_v9  ;;  %v5525_v9 = vld [vmem:[#allocation3 + $0x18] sm:$0xf0]  ;;  %v4371_v13 = vor.u32 %v5635_v3, %v4370_v2  ;;  %v5615_v61 = vld [vmem:[#allocation3 + $0x2e8] sm:$0xf0]  ;;  %v4090_v63 = vld [vmem:[#allocation3 + $0x148] sm:$0xf] }
  0xba   : > { %v5565_v2 = vld [vmem:[#allocation3 + $0x158] sm:$0xf0]  ;;  %v4470_v3 = vld [vmem:[#allocation3 + $0x440] sm:$0xf] }
  0xbb   : > { %1929 = vmatpush.bf16.msrb.mxu2 %v4667_v8  ;;  %v491_v21 = vpop.f32.mrf.mxu3  ;;  %1942 = vmatpush.bf16.msra.mxu3 %v4031_v10  ;;  %v3930_v8 = vld [vmem:[#allocation3 + $0x8] sm:$0xf]  ;;  %v4012_v53 = vld [vmem:[#allocation3 + $0xbc] sm:$0xf0] }
  0xbc   : > { %v492_v23 = vadd.f32 %v491_v21, %v403_v11  ;;  %1870 = vmatmul.bf16.vlgmr.msrb.gmra.mxu1 %v6288_v18  ;;  %v506_v28 = vpop.f32.mrf.mxu0  ;;  %v4170_v10 = vld [vmem:[#allocation3 + $0x1e8] sm:$0xf]  ;;  %v5585_v11 = vld [vmem:[#allocation3 + $0x1f8] sm:$0xf0]  ;;  %v5630_v21 = vld [vmem:[#allocation3 + $0x360] sm:$0xf0] }
  0xbd   : > { %1918 = vmatpush.bf16.msra.mxu1 %v4467_v14  ;;  %v5680_v14 = vld [vmem:[#allocation3 + $0x4f0] sm:$0xf0]  ;;  %v4351_v28 = vor.u32 %v5630_v21, %v4350_v20  ;;  %v4610_v21 = vld [vmem:[#allocation3 + $0x558] sm:$0xf] }
  0xbe   : > { %v511_v34 = vmax.f32 %v492_v23, 0.0  ;;  %v4171_v23 = vor.u32 %v5585_v11, %v4170_v10  ;;  %v4270_v10 = vld [vmem:[#allocation3 + $0x2b0] sm:$0xf]  ;;  %v5610_v11 = vld [vmem:[#allocation3 + $0x2c0] sm:$0xf0] }
  0xbf   : > { %1930 = vmatpush.bf16.msrb.mxu2 %v4647_v22  ;;  %1943 = vmatpush.bf16.msra.mxu3 %v4011_v24  ;;  %v3931_v22 = vor.u32 %v5525_v9, %v3930_v8  ;;  %v4551_v24 = vor.u32 %v5680_v14, %v4550_v12  ;;  %v5558_v8 = vld [vmem:[#allocation3 + $0x124] sm:$0xf]  ;;  %v4072_v9 = vld [vmem:[#allocation3 + $0x134] sm:$0xf0]  ;;  %v4091_v12 = vor.u32 %v5565_v2, %v4090_v63 }
  0xc0   : > { %v6291_v38 = vpack.c.bf16 %v511_v34, %v511_v34  ;;  %v4330_v34 = vld [vmem:[#allocation3 + $0x328] sm:$0xf]  ;;  %v4271_v20 = vor.u32 %v5610_v11, %v4270_v10  ;;  %v3992_v2 = vld [vmem:[#allocation3 + $0x94] sm:$0xf0]  ;;  %v4172_v10 = vld [vmem:[#allocation3 + $0x1fc] sm:$0xf0] }
  0xc1   : > { %1919 = vmatpush.bf16.msra.mxu1 %v4447_v27  ;;  %v4530_v27 = vld [vmem:[#allocation3 + $0x4b8] sm:$0xf]  ;;  %v4331_v42 = vor.u32 %v5625_v35, %v4330_v34  ;;  %v5650_v35 = vld [vmem:[#allocation3 + $0x400] sm:$0xf0] }
  0xc2   : > { %1857 = vmatmul.bf16.vlgmr.msra.gmra.mxu0 %v6291_v38  ;;  %1883 = vmatmul.bf16.vlgmr.msra.gmra.mxu2 %v6277_v31 }
  0xc3   : > { %1896 = vmatmul.bf16.vlgmr.msrb.gmra.mxu3 %v6280_v48  ;;  %1931 = vmatpush.bf16.msrb.mxu2 %v4627_v37  ;;  %v493_v50 = vpop.f32.mrf.mxu3  ;;  %v4531_v37 = vor.u32 %v5675_v29, %v4530_v27  ;;  %v4232_v27 = vld [vmem:[#allocation3 + $0x274] sm:$0xf0] }
  0xc4   : > { %1944 = vmatpush.bf16.msra.mxu3 %v3991_v39  ;;  %1953 = vmatpush.bf16.msra.mxu0 %v4231_v30  ;;  %v4691_v39 = vor.u32 %v5715_v33, %v4690_v32  ;;  %v4130_v30 = vld [vmem:[#allocation3 + $0x198] sm:$0xf]  ;;  %v4430_v32 = vld [vmem:[#allocation3 + $0x3f0] sm:$0xf] }
  0xc5   : > { %1920 = vmatpush.bf16.msra.mxu1 %v4427_v43  ;;  %v5670_v43 = vld [vmem:[#allocation3 + $0x4a0] sm:$0xf0]  ;;  %v4131_v49 = vor.u32 %v5575_v40, %v4130_v30  ;;  %v5548_v30 = vld [vmem:[#allocation3 + $0xd4] sm:$0xf]  ;;  %v4032_v40 = vld [vmem:[#allocation3 + $0xe4] sm:$0xf0] }
  0xc6   : > { %v4511_v50 = vor.u32 %v5670_v43, %v4510_v41  ;;  %v5593_v41 = vld [vmem:[#allocation3 + $0x23c] sm:$0xf]  ;;  %v4431_v43 = vor.u32 %v5650_v35, %v4430_v32  ;;  %v5623_v32 = vld [vmem:[#allocation3 + $0x32c] sm:$0xf]  ;;  %v4492_v35 = vld [vmem:[#allocation3 + $0x47c] sm:$0xf0] }
  0xc7   : > { %1932 = vmatpush.bf16.msrb.mxu2 %v4607_v51  ;;  %v4671_v51 = vor.u32 %v5710_v45, %v4670_v44  ;;  %v4410_v45 = vld [vmem:[#allocation3 + $0x3c8] sm:$0xf] }
  0xc8   : > { %1945 = vmatpush.bf16.msra.mxu3 %v3971_v55  ;;  %1954 = vmatpush.bf16.msra.mxu0 %v4211_v56  ;;  %v4490_v55 = vld [vmem:[#allocation3 + $0x468] sm:$0xf]  ;;  %v4311_v56 = vor.u32 %v5620_v47, %v4310_v46  ;;  %v5645_v46 = vld [vmem:[#allocation3 + $0x3d8] sm:$0xf0] }
  0xc9   : > { %1921 = vmatpush.bf16.msra.mxu1 %v4407_v60  ;;  %v4290_v60 = vld [vmem:[#allocation3 + $0x2d8] sm:$0xf]  ;;  %v4570_v47 = vld [vmem:[#allocation3 + $0x508] sm:$0xf] }
  0xcb   : > { %1933 = vmatpush.bf16.msrb.mxu2 %v4587_v1  ;;  %v4651_v1 = vor.u32 %v5705_v59, %v4650_v58  ;;  %v4552_v58 = vld [vmem:[#allocation3 + $0x4f4] sm:$0xf0]  ;;  %v5588_v59 = vld [vmem:[#allocation3 + $0x214] sm:$0xf] }
  0xcc   : > { %1946 = vmatpush.bf16.msra.mxu3 %v3951_v5  ;;  %1955 = vmatpush.bf16.msra.mxu0 %v4191_v6  ;;  %v4291_v5 = vor.u32 %v5615_v61, %v4290_v60  ;;  %v4630_v6 = vld [vmem:[#allocation3 + $0x580] sm:$0xf]  ;;  %v4192_v60 = vld [vmem:[#allocation3 + $0x224] sm:$0xf0]  ;;  %v4411_v61 = vor.u32 %v5645_v46, %v4410_v45  ;;  %v4312_v45 = vld [vmem:[#allocation3 + $0x314] sm:$0xf0] }
  0xcd   : > { %1966 = vmatpush.bf16.msrb.mxu1 %v4391_v0  ;;  %v4491_v0 = vor.u32 %v5665_v57, %v4490_v55  ;;  %v4631_v14 = vor.u32 %v5700_v7, %v4630_v6  ;;  %v5638_v55 = vld [vmem:[#allocation3 + $0x3a4] sm:$0xf]  ;;  %v4372_v6 = vld [vmem:[#allocation3 + $0x38c] sm:$0xf0]  ;;  %v5673_v7 = vld [vmem:[#allocation3 + $0x4bc] sm:$0xf] }
  0xce   : > { %1922 = vmatmul.bf16.vlgmr.msra.gmra.mxu1 %v6291_v38  ;;  %v5678_v57 = vld [vmem:[#allocation3 + $0x4e4] sm:$0xf] }
  0xcf   : > { %1934 = vmatpush.bf16.msrb.mxu2 %v4567_v19  ;;  %v4075_v19 = vor.u32 %v5558_v8, %v4072_v9  ;;  %v4532_v8 = vld [vmem:[#allocation3 + $0x4cc] sm:$0xf0]  ;;  %v5583_v9 = vld [vmem:[#allocation3 + $0x1ec] sm:$0xf]  ;;  %v5658_v46 = vld [vmem:[#allocation3 + $0x444] sm:$0xf] }
  0xd0   : > { %1947 = vmatpush.bf16.msra.mxu3 %v3931_v22  ;;  %1956 = vmatpush.bf16.msra.mxu0 %v4171_v23  ;;  %v5695_v22 = vld [vmem:[#allocation3 + $0x568] sm:$0xf0]  ;;  %v5553_v23 = vld [vmem:[#allocation3 + $0xfc] sm:$0xf] }
  0xd1   : > { %1967 = vmatpush.bf16.msrb.mxu1 %v4371_v13  ;;  %v4471_v13 = vor.u32 %v5660_v4, %v4470_v3  ;;  %v4611_v29 = vor.u32 %v5695_v22, %v4610_v21  ;;  %v4555_v3 = vor.u32 %v5678_v57, %v4552_v58  ;;  %v4195_v4 = vor.u32 %v5588_v59, %v4192_v60  ;;  %v5668_v21 = vld [vmem:[#allocation3 + $0x494] sm:$0xf]  ;;  %v4512_v22 = vld [vmem:[#allocation3 + $0x4a4] sm:$0xf0]  ;;  %v5613_v58 = vld [vmem:[#allocation3 + $0x2dc] sm:$0xf] }
  0xd2   : > { %1909 = vmatmul.bf16.vlgmr.msrb.gmra.mxu0 %v6282_v52  ;;  %1935 = vmatmul.bf16.vlgmr.msrb.gmra.mxu2 %v6288_v18  ;;  %v4292_v59 = vld [vmem:[#allocation3 + $0x2ec] sm:$0xf0]  ;;  %v5653_v60 = vld [vmem:[#allocation3 + $0x41c] sm:$0xf] }
  0xd3   : > { %1979 = vmatpush.bf16.msra.mxu2 %v4551_v24  ;;  %1948 = vmatmul.bf16.vlgmr.msra.gmra.mxu3 %v6277_v31  ;;  %v4052_v24 = vld [vmem:[#allocation3 + $0x10c] sm:$0xf0] }
  0xd4   : > { %1992 = vmatpush.bf16.msrb.mxu3 %v4711_v25  ;;  %1957 = vmatpush.bf16.msra.mxu0 %v4151_v36  ;;  %v4250_v25 = vld [vmem:[#allocation3 + $0x288] sm:$0xf]  ;;  %v4055_v33 = vor.u32 %v5553_v23, %v4052_v24  ;;  %v4590_v36 = vld [vmem:[#allocation3 + $0x530] sm:$0xf]  ;;  %v5578_v23 = vld [vmem:[#allocation3 + $0x1c4] sm:$0xf] }
  0xd5   : > { %1968 = vmatpush.bf16.msrb.mxu1 %v4351_v28  ;;  %v4451_v28 = vor.u32 %v5655_v16, %v4450_v15  ;;  %v4251_v34 = vor.u32 %v5605_v17, %v4250_v25  ;;  %v4535_v15 = vor.u32 %v5673_v7, %v4532_v8  ;;  %v4175_v16 = vor.u32 %v5583_v9, %v4172_v10  ;;  %v4152_v24 = vld [vmem:[#allocation3 + $0x1d4] sm:$0xf0]  ;;  %v5608_v8 = vld [vmem:[#allocation3 + $0x2b4] sm:$0xf]  ;;  %v4272_v9 = vld [vmem:[#allocation3 + $0x2c4] sm:$0xf0] }
  0xd6   : > { %v5648_v10 = vld [vmem:[#allocation3 + $0x3f4] sm:$0xf] }
  0xd7   : > { %1980 = vmatpush.bf16.msra.mxu2 %v4531_v37  ;;  %v5690_v37 = vld [vmem:[#allocation3 + $0x540] sm:$0xf0] }
  0xd8   : > { %1993 = vmatpush.bf16.msrb.mxu3 %v4691_v39  ;;  %1958 = vmatpush.bf16.msra.mxu0 %v4131_v49  ;;  %v4235_v39 = vor.u32 %v5598_v26, %v4232_v27  ;;  %v4591_v44 = vor.u32 %v5690_v37, %v4590_v36  ;;  %v4035_v49 = vor.u32 %v5548_v30, %v4032_v40  ;;  %v5528_v26 = vld [vmem:[#allocation3 + $0x34] sm:$0xf]  ;;  %v3952_v27 = vld [vmem:[#allocation3 + $0x44] sm:$0xf0]  ;;  %v5573_v36 = vld [vmem:[#allocation3 + $0x19c] sm:$0xf] }
  0xd9   : > { %1969 = vmatpush.bf16.msrb.mxu1 %v4331_v42  ;;  %v4212_v42 = vld [vmem:[#allocation3 + $0x24c] sm:$0xf0]  ;;  %v5523_v40 = vld [vmem:[#allocation3 + $0xc] sm:$0xf] }
  0xda   : > { %v4215_v54 = vor.u32 %v5593_v41, %v4212_v42  ;;  %v4132_v37 = vld [vmem:[#allocation3 + $0x1ac] sm:$0xf0]  ;;  %v3932_v41 = vld [vmem:[#allocation3 + $0x1c] sm:$0xf0] }
  0xdb   : > { %1981 = vmatpush.bf16.msra.mxu2 %v4511_v50  ;;  %v5685_v50 = vld [vmem:[#allocation3 + $0x518] sm:$0xf0] }
  0xdc   : > { %1994 = vmatpush.bf16.msrb.mxu3 %v4671_v51  ;;  %1959 = vmatpush.bf16.msra.mxu0 %v4111_v62  ;;  %v5543_v51 = vld [vmem:[#allocation3 + $0xac] sm:$0xf]  ;;  %v4571_v62 = vor.u32 %v5685_v50, %v4570_v47  ;;  %v4472_v47 = vld [vmem:[#allocation3 + $0x454] sm:$0xf0] }
  0xdd   : > { %1970 = vmatpush.bf16.msrb.mxu1 %v4311_v56  ;;  %v4392_v56 = vld [vmem:[#allocation3 + $0x3b4] sm:$0xf0]  ;;  %v4015_v63 = vor.u32 %v5543_v51, %v4012_v53  ;;  %v5568_v51 = vld [vmem:[#allocation3 + $0x174] sm:$0xf]  ;;  %v4112_v53 = vld [vmem:[#allocation3 + $0x184] sm:$0xf0] }
  0xde   : > { %v4712_v50 = vld [vmem:[#allocation3 + $0x634] sm:$0xf0] }
  0xdf   : > { %1982 = vmatpush.bf16.msra.mxu2 %v4491_v0  ;;  %v4395_v0 = vor.u32 %v5638_v55, %v4392_v56  ;;  %v4475_v56 = vor.u32 %v5658_v46, %v4472_v47  ;;  %v5596_v46 = vld [vmem:[#allocation3 + $0x250] sm:$0xf0]  ;;  %v4378_v47 = vld [vmem:[#allocation3 + $0x380] sm:$0xf] }
  0xe0   : > { %1995 = vmatpush.bf16.msrb.mxu3 %v4651_v1  ;;  %1960 = vmatpush.bf16.msra.mxu0 %v4091_v12  ;;  %v5538_v1 = vld [vmem:[#allocation3 + $0x84] sm:$0xf] }
  0xe1   : > { %1971 = vmatpush.bf16.msrb.mxu1 %v4291_v5  ;;  %v5633_v5 = vld [vmem:[#allocation3 + $0x37c] sm:$0xf]  ;;  %v3995_v11 = vor.u32 %v5538_v1, %v3992_v2  ;;  %v5563_v1 = vld [vmem:[#allocation3 + $0x14c] sm:$0xf]  ;;  %v4092_v2 = vld [vmem:[#allocation3 + $0x15c] sm:$0xf0] }
  0xe2   : > { %v4375_v12 = vor.u32 %v5633_v5, %v4372_v6  ;;  %v5561_v5 = vld [vmem:[#allocation3 + $0x138] sm:$0xf0] }
  0xe3   : > { %1983 = vmatpush.bf16.msra.mxu2 %v4471_v13  ;;  %1961 = vmatmul.bf16.vlgmr.msra.gmra.mxu0 %v6280_v48  ;;  %v5533_v13 = vld [vmem:[#allocation3 + $0x5c] sm:$0xf] }
  0xe4   : > { %1996 = vmatpush.bf16.msrb.mxu3 %v4631_v14  ;;  %2005 = vmatpush.bf16.msrb.mxu0 %v4075_v19  ;;  %v3972_v14 = vld [vmem:[#allocation3 + $0x6c] sm:$0xf0]  ;;  %v5628_v19 = vld [vmem:[#allocation3 + $0x354] sm:$0xf] }
  0xe5   : > { %1972 = vmatpush.bf16.msrb.mxu1 %v4271_v20  ;;  %v4352_v20 = vld [vmem:[#allocation3 + $0x364] sm:$0xf0]  ;;  %v3975_v25 = vor.u32 %v5533_v13, %v3972_v14  ;;  %v5708_v13 = vld [vmem:[#allocation3 + $0x5d4] sm:$0xf] }
  0xe6   : > { %v4355_v17 = vor.u32 %v5628_v19, %v4352_v20  ;;  %v4672_v14 = vld [vmem:[#allocation3 + $0x5e4] sm:$0xf0]  ;;  %v4058_v19 = vld [vmem:[#allocation3 + $0x100] sm:$0xf]  ;;  %v5556_v20 = vld [vmem:[#allocation3 + $0x110] sm:$0xf0] }
  0xe7   : > { %1984 = vmatpush.bf16.msra.mxu2 %v4451_v28  ;;  %v4515_v28 = vor.u32 %v5668_v21, %v4512_v22  ;;  %v5603_v21 = vld [vmem:[#allocation3 + $0x28c] sm:$0xf] }
  0xe8   : > { %1997 = vmatpush.bf16.msrb.mxu3 %v4611_v29  ;;  %2006 = vmatpush.bf16.msrb.mxu0 %v4055_v33  ;;  %v4155_v29 = vor.u32 %v5578_v23, %v4152_v24  ;;  %v4332_v33 = vld [vmem:[#allocation3 + $0x33c] sm:$0xf0]  ;;  %v4675_v23 = vor.u32 %v5708_v13, %v4672_v14  ;;  %v5683_v14 = vld [vmem:[#allocation3 + $0x50c] sm:$0xf] }
  0xe9   : > { %1973 = vmatpush.bf16.msrb.mxu1 %v4251_v34  ;;  %v5663_v34 = vld [vmem:[#allocation3 + $0x46c] sm:$0xf]  ;;  %v4335_v30 = vor.u32 %v5623_v32, %v4332_v33  ;;  %v4252_v24 = vld [vmem:[#allocation3 + $0x29c] sm:$0xf0]  ;;  %v5601_v32 = vld [vmem:[#allocation3 + $0x278] sm:$0xf0] }
  0xea   : > { %v4495_v42 = vor.u32 %v5663_v34, %v4492_v35  ;;  %v4398_v33 = vld [vmem:[#allocation3 + $0x3a8] sm:$0xf]  ;;  %v5641_v34 = vld [vmem:[#allocation3 + $0x3b8] sm:$0xf0]  ;;  %v4255_v35 = vor.u32 %v5603_v21, %v4252_v24 }
  0xeb   : > { %1985 = vmatpush.bf16.msra.mxu2 %v4431_v43  ;;  %v4135_v43 = vor.u32 %v5573_v36, %v4132_v37  ;;  %v4038_v36 = vld [vmem:[#allocation3 + $0xd8] sm:$0xf]  ;;  %v5551_v37 = vld [vmem:[#allocation3 + $0xe8] sm:$0xf0]  ;;  %v5581_v21 = vld [vmem:[#allocation3 + $0x1d8] sm:$0xf0] }
  0xec   : > { %1998 = vmatpush.bf16.msrb.mxu3 %v4591_v44  ;;  %2007 = vmatpush.bf16.msrb.mxu0 %v4035_v49  ;;  %v5618_v44 = vld [vmem:[#allocation3 + $0x304] sm:$0xf]  ;;  %v5621_v24 = vld [vmem:[#allocation3 + $0x318] sm:$0xf0] }
  0xed   : > { %2018 = vmatpush.bf16.msra.mxu1 %v4235_v39  ;;  %v3955_v39 = vor.u32 %v5528_v26, %v3952_v27  ;;  %v5718_v49 = vld [vmem:[#allocation3 + $0x624] sm:$0xf]  ;;  %v4315_v55 = vor.u32 %v5618_v44, %v4312_v45  ;;  %v5703_v26 = vld [vmem:[#allocation3 + $0x5ac] sm:$0xf]  ;;  %v4652_v27 = vld [vmem:[#allocation3 + $0x5bc] sm:$0xf0]  ;;  %v4039_v45 = vor.u32 %v5551_v37, %v4038_v36 }
  0xee   : > { %1974 = vmatmul.bf16.vlgmr.msrb.gmra.mxu1 %v6282_v52  ;;  %v4715_v57 = vor.u32 %v5718_v49, %v4712_v50  ;;  %v4218_v44 = vld [vmem:[#allocation3 + $0x240] sm:$0xf]  ;;  %v5636_v49 = vld [vmem:[#allocation3 + $0x390] sm:$0xf0]  ;;  %v4018_v50 = vld [vmem:[#allocation3 + $0xb0] sm:$0xf] }
  0xef   : > { %1986 = vmatpush.bf16.msra.mxu2 %v4411_v61  ;;  %v4115_v61 = vor.u32 %v5568_v51, %v4112_v53  ;;  %v5546_v51 = vld [vmem:[#allocation3 + $0xc0] sm:$0xf0]  ;;  %v4298_v37 = vld [vmem:[#allocation3 + $0x2e0] sm:$0xf] }
  0xf0   : > { %1999 = vmatpush.bf16.msrb.mxu3 %v4571_v62  ;;  %2008 = vmatpush.bf16.msrb.mxu0 %v4015_v63  ;;  %v4452_v62 = vld [vmem:[#allocation3 + $0x42c] sm:$0xf0]  ;;  %v5713_v63 = vld [vmem:[#allocation3 + $0x5fc] sm:$0xf] }
  0xf1   : > { %2019 = vmatpush.bf16.msra.mxu1 %v4215_v54  ;;  %v3935_v54 = vor.u32 %v5523_v40, %v3932_v41  ;;  %v4455_v6 = vor.u32 %v5653_v60, %v4452_v62  ;;  %v4399_v41 = vor.u32 %v5641_v34, %v4398_v33  ;;  %v5591_v60 = vld [vmem:[#allocation3 + $0x228] sm:$0xf0]  ;;  %v4138_v33 = vld [vmem:[#allocation3 + $0x1a0] sm:$0xf]  ;;  %v5576_v34 = vld [vmem:[#allocation3 + $0x1b0] sm:$0xf0] }
  0xf2   : > { %1987 = vmatmul.bf16.vlgmr.msra.gmra.mxu2 %v6291_v38  ;;  %v5631_v62 = vld [vmem:[#allocation3 + $0x368] sm:$0xf0] }
  0xf3   : > { %2031 = vmatpush.bf16.msrb.mxu2 %v4395_v0  ;;  %2000 = vmatmul.bf16.vlgmr.msrb.gmra.mxu3 %v6288_v18  ;;  %v4692_v0 = vld [vmem:[#allocation3 + $0x60c] sm:$0xf0] }
  0xf4   : > { %2044 = vmatpush.bf16.msra.mxu3 %v4555_v3  ;;  %2009 = vmatpush.bf16.msrb.mxu0 %v3995_v11  ;;  %v4295_v3 = vor.u32 %v5613_v58, %v4292_v59  ;;  %v4695_v7 = vor.u32 %v5713_v63, %v4692_v0  ;;  %v4095_v11 = vor.u32 %v5563_v1, %v4092_v2  ;;  %v4198_v58 = vld [vmem:[#allocation3 + $0x218] sm:$0xf]  ;;  %v3998_v63 = vld [vmem:[#allocation3 + $0x88] sm:$0xf]  ;;  %v5541_v0 = vld [vmem:[#allocation3 + $0x98] sm:$0xf0] }
  0xf5   : > { %2020 = vmatpush.bf16.msra.mxu1 %v4195_v4  ;;  %v4078_v4 = vld [vmem:[#allocation3 + $0x128] sm:$0xf]  ;;  %v4019_v59 = vor.u32 %v5546_v51, %v4018_v50  ;;  %v4199_v2 = vor.u32 %v5591_v60, %v4198_v58  ;;  %v5571_v51 = vld [vmem:[#allocation3 + $0x188] sm:$0xf0]  ;;  %v4698_v58 = vld [vmem:[#allocation3 + $0x600] sm:$0xf] }
  0xf7   : > { %2032 = vmatpush.bf16.msrb.mxu2 %v4375_v12  ;;  %v4432_v12 = vld [vmem:[#allocation3 + $0x404] sm:$0xf0] }
  0xf8   : > { %2045 = vmatpush.bf16.msra.mxu3 %v4535_v15  ;;  %2010 = vmatpush.bf16.msrb.mxu0 %v3975_v25  ;;  %v4079_v15 = vor.u32 %v5561_v5, %v4078_v4  ;;  %v4435_v22 = vor.u32 %v5648_v10, %v4432_v12  ;;  %v5643_v25 = vld [vmem:[#allocation3 + $0x3cc] sm:$0xf]  ;;  %v5688_v4 = vld [vmem:[#allocation3 + $0x534] sm:$0xf]  ;;  %v4592_v5 = vld [vmem:[#allocation3 + $0x544] sm:$0xf0] }
  0xf9   : > { %2021 = vmatpush.bf16.msra.mxu1 %v4175_v16  ;;  %v4275_v16 = vor.u32 %v5608_v8, %v4272_v9  ;;  %v5586_v8 = vld [vmem:[#allocation3 + $0x200] sm:$0xf0]  ;;  %v4338_v9 = vld [vmem:[#allocation3 + $0x330] sm:$0xf]  ;;  %v5536_v12 = vld [vmem:[#allocation3 + $0x70] sm:$0xf0]  ;;  %v4595_v13 = vor.u32 %v5688_v4, %v4592_v5 }
  0xfa   : > { %v5626_v10 = vld [vmem:[#allocation3 + $0x340] sm:$0xf0] }
  0xfb   : > { %2033 = vmatpush.bf16.msrb.mxu2 %v4355_v17  ;;  %v4412_v17 = vld [vmem:[#allocation3 + $0x3dc] sm:$0xf0]  ;;  %v5666_v4 = vld [vmem:[#allocation3 + $0x480] sm:$0xf0] }
  0xfc   : > { %2046 = vmatpush.bf16.msra.mxu3 %v4515_v28  ;;  %2011 = vmatpush.bf16.msrb.mxu0 %v3955_v39  ;;  %v4238_v28 = vld [vmem:[#allocation3 + $0x268] sm:$0xf]  ;;  %v4415_v39 = vor.u32 %v5643_v25, %v4412_v17  ;;  %v5681_v17 = vld [vmem:[#allocation3 + $0x4f8] sm:$0xf0] }
  0xfd   : > { %2022 = vmatpush.bf16.msra.mxu1 %v4155_v29  ;;  %v4059_v29 = vor.u32 %v5556_v20, %v4058_v19  ;;  %v4239_v40 = vor.u32 %v5601_v32, %v4238_v28  ;;  %v4572_v19 = vld [vmem:[#allocation3 + $0x51c] sm:$0xf0]  ;;  %v4158_v20 = vld [vmem:[#allocation3 + $0x1c8] sm:$0xf] }
  0xfe   : > { %v4558_v25 = vld [vmem:[#allocation3 + $0x4e8] sm:$0xf]  ;;  %v4575_v28 = vor.u32 %v5683_v14, %v4572_v19 }
  0xff   : > { %2034 = vmatpush.bf16.msrb.mxu2 %v4335_v30  ;;  %v4655_v30 = vor.u32 %v5703_v26, %v4652_v27  ;;  %v3958_v26 = vld [vmem:[#allocation3 + $0x38] sm:$0xf]  ;;  %v5531_v27 = vld [vmem:[#allocation3 + $0x48] sm:$0xf0] }
 0x100   : > { %2047 = vmatpush.bf16.msra.mxu3 %v4495_v42  ;;  %2012 = vmatpush.bf16.msrb.mxu0 %v3935_v54  ;;  %v5698_v42 = vld [vmem:[#allocation3 + $0x584] sm:$0xf]  ;;  %v4219_v54 = vor.u32 %v5596_v46, %v4218_v44  ;;  %v3959_v36 = vor.u32 %v5531_v27, %v3958_v26  ;;  %v5721_v44 = vld [vmem:[#allocation3 + $0x638] sm:$0xf0]  ;;  %v5794_v26 = vld [vmem:[#allocation7 + $0x240] sm:$0xf0] }
 0x101   : > { %2023 = vmatpush.bf16.msra.mxu1 %v4135_v43  ;;  %v4632_v43 = vld [vmem:[#allocation3 + $0x594] sm:$0xf0] }
 0x102   : > { %v4635_v53 = vor.u32 %v5698_v42, %v4632_v43  ;;  %v5526_v42 = vld [vmem:[#allocation3 + $0x20] sm:$0xf0]  ;;  %v4718_v43 = vld [vmem:[#allocation3 + $0x628] sm:$0xf] }
 0x103   : > { %2035 = vmatpush.bf16.msrb.mxu2 %v4315_v55  ;;  %2013 = vmatmul.bf16.vlgmr.msrb.gmra.mxu0 %v6277_v31  ;;  %v4379_v55 = vor.u32 %v5636_v49, %v4378_v47  ;;  %v4118_v47 = vld [vmem:[#allocation3 + $0x178] sm:$0xf] }
 0x104   : > { %2048 = vmatpush.bf16.msra.mxu3 %v4475_v56  ;;  %2057 = vmatpush.bf16.msra.mxu0 %v4715_v57  ;;  %v5693_v56 = vld [vmem:[#allocation3 + $0x55c] sm:$0xf]  ;;  %v4612_v57 = vld [vmem:[#allocation3 + $0x56c] sm:$0xf0]  ;;  %v4119_v60 = vor.u32 %v5571_v51, %v4118_v47  ;;  %v4802_v47 = vld [vmem:[#allocation7 + $0xa0] sm:$0xf] }
 0x105   : > { %2024 = vmatpush.bf16.msra.mxu1 %v4115_v61  ;;  %v4358_v61 = vld [vmem:[#allocation3 + $0x358] sm:$0xf]  ;;  %v4615_v1 = vor.u32 %v5693_v56, %v4612_v57  ;;  %v5671_v57 = vld [vmem:[#allocation3 + $0x4a8] sm:$0xf0]  ;;  %v5696_v51 = vld [vmem:[#allocation3 + $0x570] sm:$0xf0] }
 0x106   : > { %v4518_v56 = vld [vmem:[#allocation3 + $0x498] sm:$0xf] }
 0x107   : > { %2036 = vmatpush.bf16.msrb.mxu2 %v4295_v3  ;;  %v4359_v3 = vor.u32 %v5631_v62, %v4358_v61  ;;  %v4098_v62 = vld [vmem:[#allocation3 + $0x150] sm:$0xf] }
 0x108   : > { %2049 = vmatpush.bf16.msra.mxu3 %v4455_v6  ;;  %2058 = vmatpush.bf16.msra.mxu0 %v4695_v7  ;;  %v4178_v6 = vld [vmem:[#allocation3 + $0x1f0] sm:$0xf]  ;;  %v3999_v7 = vor.u32 %v5541_v0, %v3998_v63  ;;  %v5566_v63 = vld [vmem:[#allocation3 + $0x160] sm:$0xf0] }
 0x109   : > { %2025 = vmatpush.bf16.msra.mxu1 %v4095_v11  ;;  %v3978_v11 = vld [vmem:[#allocation3 + $0x60] sm:$0xf]  ;;  %v4258_v0 = vld [vmem:[#allocation3 + $0x290] sm:$0xf] }
 0x10b   : > { %2037 = vmatpush.bf16.msrb.mxu2 %v4275_v16  ;;  %v4339_v16 = vor.u32 %v5626_v10, %v4338_v9  ;;  %v5711_v9 = vld [vmem:[#allocation3 + $0x5e8] sm:$0xf0]  ;;  %v5022_v10 = vld [vmem:[#allocation7 + $0x258] sm:$0xf] }
 0x10c   : > { %2050 = vmatpush.bf16.msra.mxu3 %v4435_v22  ;;  %2059 = vmatpush.bf16.msra.mxu0 %v4675_v23  ;;  %v3979_v22 = vor.u32 %v5536_v12, %v3978_v11  ;;  %v4318_v23 = vld [vmem:[#allocation3 + $0x308] sm:$0xf]  ;;  %v5799_v11 = vld [vmem:[#allocation7 + $0x268] sm:$0xf0]  ;;  %v4099_v12 = vor.u32 %v5566_v63, %v4098_v62 }
 0x10d   : > { %2070 = vmatpush.bf16.msrb.mxu1 %v4079_v15  ;;  %v4179_v15 = vor.u32 %v5586_v8, %v4178_v6  ;;  %v4319_v32 = vor.u32 %v5621_v24, %v4318_v23  ;;  %v4678_v6 = vld [vmem:[#allocation3 + $0x5d8] sm:$0xf]  ;;  %v5759_v8 = vld [vmem:[#allocation7 + $0x128] sm:$0xf0]  ;;  %v5754_v23 = vld [vmem:[#allocation7 + $0x100] sm:$0xf0]  ;;  %v5023_v24 = vor.u32 %v5799_v11, %v5022_v10 }
 0x10e   : > { %2026 = vmatmul.bf16.vlgmr.msra.gmra.mxu1 %v6280_v48  ;;  %v5739_v62 = vld [vmem:[#allocation7 + $0x88] sm:$0xf0] }
 0x10f   : > { %2038 = vmatpush.bf16.msrb.mxu2 %v4255_v35  ;;  %v4559_v35 = vor.u32 %v5681_v17, %v4558_v25  ;;  %v5706_v25 = vld [vmem:[#allocation3 + $0x5c0] sm:$0xf0]  ;;  %v5002_v17 = vld [vmem:[#allocation7 + $0x230] sm:$0xf]  ;;  %v4578_v11 = vld [vmem:[#allocation3 + $0x510] sm:$0xf] }
 0x110   : > { %2051 = vmatpush.bf16.msra.mxu3 %v4415_v39  ;;  %2060 = vmatpush.bf16.msra.mxu0 %v4655_v30  ;;  %v5616_v39 = vld [vmem:[#allocation3 + $0x2f0] sm:$0xf0]  ;;  %v4538_v30 = vld [vmem:[#allocation3 + $0x4c0] sm:$0xf] }
 0x111   : > { %2071 = vmatpush.bf16.msrb.mxu1 %v4059_v29  ;;  %v4159_v29 = vor.u32 %v5581_v21, %v4158_v20  ;;  %v4299_v46 = vor.u32 %v5616_v39, %v4298_v37  ;;  %v4679_v20 = vor.u32 %v5711_v9, %v4678_v6  ;;  %v4658_v21 = vld [vmem:[#allocation3 + $0x5b0] sm:$0xf]  ;;  %v5003_v37 = vor.u32 %v5794_v26, %v5002_v17  ;;  %v5701_v39 = vld [vmem:[#allocation3 + $0x598] sm:$0xf0] }
 0x112   : > { %2039 = vmatmul.bf16.vlgmr.msrb.gmra.mxu2 %v6282_v52 }
 0x113   : > { %2083 = vmatpush.bf16.msra.mxu2 %v4239_v40  ;;  %2052 = vmatmul.bf16.vlgmr.msra.gmra.mxu3 %v6291_v38  ;;  %v5676_v40 = vld [vmem:[#allocation3 + $0x4d0] sm:$0xf0] }
 0x114   : > { %2096 = vmatpush.bf16.msrb.mxu3 %v4399_v41  ;;  %2061 = vmatpush.bf16.msra.mxu0 %v4635_v53  ;;  %v3938_v41 = vld [vmem:[#allocation3 + $0x10] sm:$0xf]  ;;  %v4539_v49 = vor.u32 %v5676_v40, %v4538_v30  ;;  %v4278_v53 = vld [vmem:[#allocation3 + $0x2b8] sm:$0xf]  ;;  %v5789_v40 = vld [vmem:[#allocation7 + $0x218] sm:$0xf0] }
 0x115   : > { %2072 = vmatpush.bf16.msrb.mxu1 %v4039_v45  ;;  %v4139_v45 = vor.u32 %v5576_v34, %v4138_v33  ;;  %v3939_v50 = vor.u32 %v5526_v42, %v3938_v41  ;;  %v4659_v33 = vor.u32 %v5706_v25, %v4658_v21  ;;  %v4638_v34 = vld [vmem:[#allocation3 + $0x588] sm:$0xf]  ;;  %v4982_v30 = vld [vmem:[#allocation7 + $0x208] sm:$0xf]  ;;  %v4438_v42 = vld [vmem:[#allocation3 + $0x3f8] sm:$0xf] }
 0x117   : > { %2084 = vmatpush.bf16.msra.mxu2 %v4219_v54  ;;  %v5611_v54 = vld [vmem:[#allocation3 + $0x2c8] sm:$0xf0] }
 0x118   : > { %2097 = vmatpush.bf16.msrb.mxu3 %v4379_v55  ;;  %2062 = vmatpush.bf16.msra.mxu0 %v4615_v1  ;;  %v4719_v55 = vor.u32 %v5721_v44, %v4718_v43  ;;  %v4279_v61 = vor.u32 %v5611_v54, %v4278_v53  ;;  %v4519_v1 = vor.u32 %v5671_v57, %v4518_v56  ;;  %v5651_v43 = vld [vmem:[#allocation3 + $0x408] sm:$0xf0]  ;;  %v5784_v53 = vld [vmem:[#allocation7 + $0x1f0] sm:$0xf0]  ;;  %v4418_v56 = vld [vmem:[#allocation3 + $0x3d0] sm:$0xf] }
 0x119   : > { %2073 = vmatpush.bf16.msrb.mxu1 %v4019_v59  ;;  %v5716_v59 = vld [vmem:[#allocation3 + $0x610] sm:$0xf0]  ;;  %v5646_v57 = vld [vmem:[#allocation3 + $0x3e0] sm:$0xf0] }
 0x11a   : > { %v4699_v5 = vor.u32 %v5716_v59, %v4698_v58 }
 0x11b   : > { %2085 = vmatpush.bf16.msra.mxu2 %v4199_v2  ;;  %v5606_v2 = vld [vmem:[#allocation3 + $0x2a0] sm:$0xf0] }
 0x11c   : > { %2098 = vmatpush.bf16.msrb.mxu3 %v4359_v3  ;;  %2063 = vmatpush.bf16.msra.mxu0 %v4595_v13  ;;  %v4498_v3 = vld [vmem:[#allocation3 + $0x470] sm:$0xf]  ;;  %v4259_v13 = vor.u32 %v5606_v2, %v4258_v0  ;;  %v5691_v0 = vld [vmem:[#allocation3 + $0x548] sm:$0xf0] }
 0x11d   : > { %2074 = vmatpush.bf16.msrb.mxu1 %v3999_v7  ;;  %v4862_v7 = vld [vmem:[#allocation7 + $0x118] sm:$0xf]  ;;  %v4499_v14 = vor.u32 %v5666_v4, %v4498_v3  ;;  %v5779_v2 = vld [vmem:[#allocation7 + $0x1c8] sm:$0xf0] }
 0x11e   : > { %v4863_v19 = vor.u32 %v5759_v8, %v4862_v7  ;;  %v5182_v4 = vld [vmem:[#allocation7 + $0x398] sm:$0xf]  ;;  %v4419_v7 = vor.u32 %v5646_v57, %v4418_v56 }
 0x11f   : > { %2086 = vmatpush.bf16.msra.mxu2 %v4179_v15  ;;  %v4478_v15 = vld [vmem:[#allocation3 + $0x448] sm:$0xf] }
 0x120   : > { %2099 = vmatpush.bf16.msrb.mxu3 %v4339_v16  ;;  %2064 = vmatpush.bf16.msra.mxu0 %v4575_v28  ;;  %v5661_v16 = vld [vmem:[#allocation3 + $0x458] sm:$0xf0] }
 0x121   : > { %2075 = vmatpush.bf16.msrb.mxu1 %v3979_v22  ;;  %v4842_v22 = vld [vmem:[#allocation7 + $0xf0] sm:$0xf]  ;;  %v4479_v28 = vor.u32 %v5661_v16, %v4478_v15  ;;  %v5686_v15 = vld [vmem:[#allocation3 + $0x520] sm:$0xf0] }
 0x122   : > { %v4579_v26 = vor.u32 %v5686_v15, %v4578_v11  ;;  %v4824_v11 = vld [vmem:[#allocation7 + $0xdc] sm:$0xf0] }
 0x123   : > { %2087 = vmatpush.bf16.msra.mxu2 %v4159_v29  ;;  %2065 = vmatmul.bf16.vlgmr.msra.gmra.mxu0 %v6288_v18  ;;  %v5656_v29 = vld [vmem:[#allocation3 + $0x430] sm:$0xf0] }
 0x124   : > { %2100 = vmatpush.bf16.msrb.mxu3 %v4319_v32  ;;  %2109 = vmatpush.bf16.msrb.mxu0 %v4559_v35  ;;  %v4843_v32 = vor.u32 %v5754_v23, %v4842_v22  ;;  %v4822_v35 = vld [vmem:[#allocation7 + $0xc8] sm:$0xf]  ;;  %v5162_v22 = vld [vmem:[#allocation7 + $0x370] sm:$0xf]  ;;  %v5834_v23 = vld [vmem:[#allocation7 + $0x380] sm:$0xf0] }
 0x125   : > { %2076 = vmatpush.bf16.msrb.mxu1 %v3959_v36  ;;  %v5749_v36 = vld [vmem:[#allocation7 + $0xd8] sm:$0xf0] }
 0x126   : > { %v4823_v44 = vor.u32 %v5749_v36, %v4822_v35  ;;  %v5829_v35 = vld [vmem:[#allocation7 + $0x358] sm:$0xf0] }
 0x127   : > { %2088 = vmatpush.bf16.msra.mxu2 %v4139_v45  ;;  %v6310_v27 = vpop.f32.mrf.mxu1  ;;  %v4639_v45 = vor.u32 %v5701_v39, %v4638_v34  ;;  %v5769_v34 = vld [vmem:[#allocation7 + $0x178] sm:$0xf0] }
 0x128   : > { %2101 = vmatpush.bf16.msrb.mxu3 %v4299_v46  ;;  %2110 = vmatpush.bf16.msrb.mxu0 %v4539_v49  ;;  %v4618_v46 = vld [vmem:[#allocation3 + $0x560] sm:$0xf]  ;;  %v5744_v49 = vld [vmem:[#allocation7 + $0xb0] sm:$0xf0] }
 0x129   : > { %2077 = vmatpush.bf16.msrb.mxu1 %v3939_v50  ;;  %v4983_v50 = vor.u32 %v5789_v40, %v4982_v30  ;;  %v4803_v58 = vor.u32 %v5744_v49, %v4802_v47  ;;  %v4619_v59 = vor.u32 %v5696_v51, %v4618_v46  ;;  %v4722_v40 = vld [vmem:[#allocation7] sm:$0xf]  ;;  %v5764_v46 = vld [vmem:[#allocation7 + $0x150] sm:$0xf0]  ;;  %v4864_v51 = vld [vmem:[#allocation7 + $0x12c] sm:$0xf0] }
 0x12a   : > { %v5122_v47 = vld [vmem:[#allocation7 + $0x320] sm:$0xf] }
 0x12b   : > { %2089 = vmatpush.bf16.msra.mxu2 %v4119_v60  ;;  %v4598_v60 = vld [vmem:[#allocation3 + $0x538] sm:$0xf] }
 0x12c   : > { %2102 = vmatpush.bf16.msrb.mxu3 %v4279_v61  ;;  %2111 = vmatpush.bf16.msrb.mxu0 %v4519_v1  ;;  %v4782_v61 = vld [vmem:[#allocation7 + $0x78] sm:$0xf]  ;;  %v4599_v10 = vor.u32 %v5691_v0, %v4598_v60 }
 0x12d   : > { %2122 = vmatpush.bf16.msra.mxu1 %v4719_v55  ;;  %v4439_v55 = vor.u32 %v5651_v43, %v4438_v42  ;;  %v4942_v1 = vld [vmem:[#allocation7 + $0x1b8] sm:$0xf]  ;;  %v4783_v8 = vor.u32 %v5739_v62, %v4782_v61  ;;  %v5752_v61 = vld [vmem:[#allocation7 + $0xf4] sm:$0xf]  ;;  %v4844_v62 = vld [vmem:[#allocation7 + $0x104] sm:$0xf0] }
 0x12e   : > { %2078 = vmatmul.bf16.vlgmr.msrb.gmra.mxu1 %v6277_v31  ;;  %v4458_v31 = vld [vmem:[#allocation3 + $0x420] sm:$0xf] }
 0x12f   : > { %2090 = vmatpush.bf16.msra.mxu2 %v4099_v12  ;;  %v4459_v41 = vor.u32 %v5656_v29, %v4458_v31  ;;  %v1821_v54 = vpop.f32.mrf.mxu1  ;;  %v4762_v12 = vld [vmem:[#allocation7 + $0x50] sm:$0xf]  ;;  %v5729_v31 = vld [vmem:[#allocation7 + $0x38] sm:$0xf0] }
 0x130   : > { %2103 = vmatpush.bf16.msrb.mxu3 %v4259_v13  ;;  %2112 = vmatpush.bf16.msrb.mxu0 %v4499_v14  ;;  %v5734_v13 = vld [vmem:[#allocation7 + $0x60] sm:$0xf0]  ;;  %v4943_v14 = vor.u32 %v5779_v2, %v4942_v1  ;;  %v5342_v2 = vld [vmem:[#allocation7 + $0x4d8] sm:$0xf] }
 0x131   : > { %2123 = vmatpush.bf16.msra.mxu1 %v4699_v5  ;;  %v5839_v5 = vld [vmem:[#allocation7 + $0x3a8] sm:$0xf0]  ;;  %v4763_v25 = vor.u32 %v5734_v13, %v4762_v12  ;;  %v5322_v12 = vld [vmem:[#allocation7 + $0x4b0] sm:$0xf]  ;;  %v5874_v13 = vld [vmem:[#allocation7 + $0x4c0] sm:$0xf0] }
 0x132   : > { %2091 = vmatmul.bf16.vlgmr.msra.gmra.mxu2 %v6280_v48  ;;  %v4962_v48 = vld [vmem:[#allocation7 + $0x1e0] sm:$0xf]  ;;  %v5183_v16 = vor.u32 %v5839_v5, %v5182_v4 }
 0x133   : > { %3437 = vmatpush.bf16.msrb.mxu2 %v4863_v19  ;;  %2104 = vmatmul.bf16.vlgmr.msrb.gmra.mxu3 %v6282_v52  ;;  %v6314_v52 = vld [vmem:[#allocation5] sm:$0x1f]  ;;  %v4963_v63 = vor.u32 %v5784_v53, %v4962_v48  ;;  %v4922_v19 = vld [vmem:[#allocation7 + $0x190] sm:$0xf] }
 0x134   : > { %3450 = vmatpush.bf16.msra.mxu3 %v5023_v24  ;;  %2113 = vmatpush.bf16.msrb.mxu0 %v4479_v28  ;;  %v760_v3 = vperm.slane %v6314_v52, 0  ;;  %v4742_v28 = vld [vmem:[#allocation7 + $0x28] sm:$0xf] }
 0x135   : > { %2124 = vmatpush.bf16.msra.mxu1 %v4679_v20  ;;  %v1832_v6 = vpop.f32.mrf.mxu2  ;;  %v1845_v9 = vpop.f32.mrf.mxu3  ;;  %v5774_v20 = vld [vmem:[#allocation7 + $0x1a0] sm:$0xf0] }
 0x136   : > { %v1820_v21 = vadd.f32 %v6310_v27, %v760_v3  ;;  %v4923_v29 = vor.u32 %v5774_v20, %v4922_v19  ;;  %v5142_v27 = vld [vmem:[#allocation7 + $0x348] sm:$0xf]  ;;  %v5879_v3 = vld [vmem:[#allocation7 + $0x4e8] sm:$0xf0] }
 0x137   : > { %3438 = vmatpush.bf16.msrb.mxu2 %v4843_v32  ;;  %v5163_v32 = vor.u32 %v5834_v23, %v5162_v22  ;;  %v5809_v22 = vld [vmem:[#allocation7 + $0x2b8] sm:$0xf0]  ;;  %v5742_v23 = vld [vmem:[#allocation7 + $0xa4] sm:$0xf] }
 0x138   : > { %3451 = vmatpush.bf16.msra.mxu3 %v5003_v37  ;;  %2114 = vmatpush.bf16.msrb.mxu0 %v4459_v41  ;;  %v1833_v17 = vadd.f32 %v1832_v6, %v1820_v21  ;;  %v4743_v37 = vor.u32 %v5729_v31, %v4742_v28  ;;  %v5724_v41 = vld [vmem:[#allocation7 + $0x10] sm:$0xf0]  ;;  %v4847_v6 = vor.u32 %v5752_v61, %v4844_v62  ;;  %v5062_v21 = vld [vmem:[#allocation7 + $0x2a8] sm:$0xf]  ;;  %v5869_v31 = vld [vmem:[#allocation7 + $0x498] sm:$0xf0] }
 0x139   : > { %2125 = vmatpush.bf16.msra.mxu1 %v4659_v33  ;;  %v1871_v24 = vpop.f32.mrf.mxu1  ;;  %v4902_v33 = vld [vmem:[#allocation7 + $0x168] sm:$0xf]  ;;  %v4723_v53 = vor.u32 %v5724_v41, %v4722_v40  ;;  %v5024_v40 = vld [vmem:[#allocation7 + $0x26c] sm:$0xf0]  ;;  %v5727_v62 = vld [vmem:[#allocation7 + $0x2c] sm:$0xf] }
 0x13a   : > { %v1846_v39 = vadd.f32 %v1845_v9, %v1833_v17  ;;  %v4903_v42 = vor.u32 %v5769_v34, %v4902_v33  ;;  %v5747_v9 = vld [vmem:[#allocation7 + $0xcc] sm:$0xf]  ;;  %v5302_v28 = vld [vmem:[#allocation7 + $0x488] sm:$0xf]  ;;  %v5042_v34 = vld [vmem:[#allocation7 + $0x280] sm:$0xf] }
 0x13b   : > { %3439 = vmatpush.bf16.msrb.mxu2 %v4823_v44  ;;  %v5143_v44 = vor.u32 %v5829_v35, %v5142_v27  ;;  %v4827_v20 = vor.u32 %v5747_v9, %v4824_v11  ;;  %v5303_v27 = vor.u32 %v5869_v31, %v5302_v28  ;;  %v5804_v35 = vld [vmem:[#allocation7 + $0x290] sm:$0xf0]  ;;  %v5722_v9 = vld [vmem:[#allocation7 + $0x4] sm:$0xf]  ;;  %v5837_v28 = vld [vmem:[#allocation7 + $0x39c] sm:$0xf] }
 0x13c   : > { %3452 = vmatpush.bf16.msra.mxu3 %v4983_v50  ;;  %2115 = vmatpush.bf16.msrb.mxu0 %v4439_v55  ;;  %v5757_v50 = vld [vmem:[#allocation7 + $0x11c] sm:$0xf]  ;;  %v5782_v11 = vld [vmem:[#allocation7 + $0x1e4] sm:$0xf]  ;;  %v5184_v31 = vld [vmem:[#allocation7 + $0x3ac] sm:$0xf0] }
 0x13d   : > { %2126 = vmatpush.bf16.msra.mxu1 %v4639_v45  ;;  %v1834_v36 = vpop.f32.mrf.mxu2  ;;  %v1847_v30 = vpop.f32.mrf.mxu3  ;;  %v4882_v45 = vld [vmem:[#allocation7 + $0x140] sm:$0xf]  ;;  %v4867_v57 = vor.u32 %v5757_v50, %v4864_v51  ;;  %v5792_v51 = vld [vmem:[#allocation7 + $0x234] sm:$0xf] }
 0x13e   : > { %v4883_v55 = vor.u32 %v5764_v46, %v4882_v45  ;;  %v5737_v36 = vld [vmem:[#allocation7 + $0x7c] sm:$0xf] }
 0x13f   : > { %3440 = vmatpush.bf16.msrb.mxu2 %v4803_v58  ;;  %v1858_v43 = vpop.f32.mrf.mxu0  ;;  %v5102_v58 = vld [vmem:[#allocation7 + $0x2f8] sm:$0xf]  ;;  %v5797_v30 = vld [vmem:[#allocation7 + $0x25c] sm:$0xf] }
 0x140   : > { %3453 = vmatpush.bf16.msra.mxu3 %v4963_v63  ;;  %2116 = vmatpush.bf16.msrb.mxu0 %v4419_v7  ;;  %v1859_v49 = vadd.f32 %v1858_v43, %v1846_v39  ;;  %v5082_v7 = vld [vmem:[#allocation7 + $0x2d0] sm:$0xf]  ;;  %v5864_v43 = vld [vmem:[#allocation7 + $0x470] sm:$0xf0] }
 0x141   : > { %2127 = vmatpush.bf16.msra.mxu1 %v4619_v59  ;;  %v1873_v48 = vpop.f32.mrf.mxu1  ;;  %v5819_v59 = vld [vmem:[#allocation7 + $0x308] sm:$0xf0] }
 0x142   : > { %v1872_v54 = vadd.f32 %v1871_v24, %v1859_v49  ;;  %v5103_v5 = vor.u32 %v5819_v59, %v5102_v58  ;;  %v4804_v24 = vld [vmem:[#allocation7 + $0xb4] sm:$0xf0]  ;;  %v5732_v49 = vld [vmem:[#allocation7 + $0x54] sm:$0xf]  ;;  %v5004_v48 = vld [vmem:[#allocation7 + $0x244] sm:$0xf0] }
 0x143   : > { %3441 = vmatpush.bf16.msrb.mxu2 %v4783_v8  ;;  %2117 = vmatmul.bf16.vlgmr.msrb.gmra.mxu0 %v6291_v38  ;;  %v5824_v38 = vld [vmem:[#allocation7 + $0x330] sm:$0xf0]  ;;  %v5814_v8 = vld [vmem:[#allocation7 + $0x2e0] sm:$0xf0]  ;;  %v4807_v33 = vor.u32 %v5742_v23, %v4804_v24  ;;  %v5007_v61 = vor.u32 %v5792_v51, %v5004_v48  ;;  %v5777_v23 = vld [vmem:[#allocation7 + $0x1bc] sm:$0xf] }
 0x144   : > { %3454 = vmatpush.bf16.msra.mxu3 %v4943_v14  ;;  %3463 = vmatpush.bf16.msra.mxu0 %v5183_v16  ;;  %v5123_v56 = vor.u32 %v5824_v38, %v5122_v47  ;;  %v2135_v60 = vmax.f32 %v1872_v54, 0.0  ;;  %v5323_v14 = vor.u32 %v5874_v13, %v5322_v12  ;;  %v5083_v19 = vor.u32 %v5814_v8, %v5082_v7  ;;  %v4764_v38 = vld [vmem:[#allocation7 + $0x64] sm:$0xf0]  ;;  %v4964_v12 = vld [vmem:[#allocation7 + $0x1f4] sm:$0xf0] }
 0x145   : > { %2128 = vmatpush.bf16.msra.mxu1 %v4599_v10  ;;  %v1884_v63 = vpop.f32.mrf.mxu2  ;;  %v5343_v10 = vor.u32 %v5879_v3, %v5342_v2  ;;  %v5027_v47 = vor.u32 %v5797_v30, %v5024_v40  ;;  %v4767_v59 = vor.u32 %v5732_v49, %v4764_v38  ;;  %v4984_v2 = vld [vmem:[#allocation7 + $0x21c] sm:$0xf0]  ;;  %v5242_v3 = vld [vmem:[#allocation7 + $0x410] sm:$0xf]  ;;  %v5767_v40 = vld [vmem:[#allocation7 + $0x16c] sm:$0xf] }
 0x146   : > { %v6320_v0 = vpack.c.bf16 %v2135_v60, %v2135_v60  ;;  %v1897_v1 = vpop.f32.mrf.mxu3  ;;  %v4944_v24 = vld [vmem:[#allocation7 + $0x1cc] sm:$0xf0]  ;;  %v5827_v38 = vld [vmem:[#allocation7 + $0x34c] sm:$0xf]  ;;  %v5762_v48 = vld [vmem:[#allocation7 + $0x144] sm:$0xf] }
 0x147   : > { %3442 = vmatpush.bf16.msrb.mxu2 %v4763_v25  ;;  %v1860_v4 = vpop.f32.mrf.mxu0 }
 0x148   : > { %3455 = vmatpush.bf16.msra.mxu3 %v4923_v29  ;;  %3464 = vmatpush.bf16.msra.mxu0 %v5163_v32  ;;  %v5854_v4 = vld [vmem:[#allocation7 + $0x420] sm:$0xf0] }
 0x149   : > { %2129 = vmatpush.bf16.msra.mxu1 %v4579_v26  ;;  %v5063_v26 = vor.u32 %v5809_v22, %v5062_v21  ;;  %v5243_v7 = vor.u32 %v5854_v4, %v5242_v3  ;;  %v4967_v22 = vor.u32 %v5782_v11, %v4964_v12  ;;  %v5464_v12 = vld [vmem:[#allocation7 + $0x5dc] sm:$0xf0] }
 0x14b   : > { %3443 = vmatpush.bf16.msrb.mxu2 %v4743_v37  ;;  %v1923_v15 = vpop.f32.mrf.mxu1  ;;  %v4784_v37 = vld [vmem:[#allocation7 + $0x8c] sm:$0xf0] }
 0x14c   : > { %2130 = vmatmul.bf16.vlgmr.msra.gmra.mxu1 %v6288_v18  ;;  %3456 = vmatpush.bf16.msra.mxu3 %v4903_v42  ;;  %v761_v18 = vperm.slane %v6314_v52, 1  ;;  %v5282_v42 = vld [vmem:[#allocation7 + $0x460] sm:$0xf]  ;;  %v4787_v45 = vor.u32 %v5737_v36, %v4784_v37 }
 0x14d   : > { %3465 = vmatpush.bf16.msra.mxu0 %v5143_v44  ;;  %3476 = vmatpush.bf16.msrb.mxu1 %v5343_v10  ;;  %v1886_v25 = vpop.f32.mrf.mxu2  ;;  %v5043_v44 = vor.u32 %v5804_v35, %v5042_v34  ;;  %v5283_v46 = vor.u32 %v5864_v43, %v5282_v42  ;;  %v4724_v10 = vld [vmem:[#allocation7 + $0x14] sm:$0xf0]  ;;  %v4924_v34 = vld [vmem:[#allocation7 + $0x1a4] sm:$0xf0]  ;;  %v5919_v43 = vld [vmem:[#allocation7 + $0x628] sm:$0xf0] }
 0x14e   : > { %v1885_v16 = vadd.f32 %v1884_v63, %v761_v18  ;;  %v1899_v17 = vpop.f32.mrf.mxu3  ;;  %v4744_v63 = vld [vmem:[#allocation7 + $0x3c] sm:$0xf0]  ;;  %v5164_v35 = vld [vmem:[#allocation7 + $0x384] sm:$0xf0]  ;;  %v5502_v42 = vld [vmem:[#allocation7 + $0x618] sm:$0xf] }
 0x14f   : > { %3444 = vmatpush.bf16.msrb.mxu2 %v4723_v53  ;;  %v1910_v32 = vpop.f32.mrf.mxu0  ;;  %v5202_v25 = vld [vmem:[#allocation7 + $0x3c0] sm:$0xf]  ;;  %v5844_v17 = vld [vmem:[#allocation7 + $0x3d0] sm:$0xf0] }
 0x150   : > { %3457 = vmatpush.bf16.msra.mxu3 %v4883_v55  ;;  %v1898_v29 = vadd.f32 %v1897_v1, %v1885_v16  ;;  %v5262_v55 = vld [vmem:[#allocation7 + $0x438] sm:$0xf]  ;;  %v5787_v1 = vld [vmem:[#allocation7 + $0x20c] sm:$0xf]  ;;  %v5849_v16 = vld [vmem:[#allocation7 + $0x3f8] sm:$0xf0] }
 0x151   : > { %3466 = vmatpush.bf16.msra.mxu0 %v5123_v56  ;;  %3477 = vmatpush.bf16.msrb.mxu1 %v5323_v14  ;;  %v5859_v56 = vld [vmem:[#allocation7 + $0x448] sm:$0xf0]  ;;  %v4987_v8 = vor.u32 %v5787_v1, %v4984_v2  ;;  %v5124_v1 = vld [vmem:[#allocation7 + $0x334] sm:$0xf0] }
 0x152   : > { %3445 = vmatmul.bf16.vlgmr.msrb.gmra.mxu2 %v6320_v0  ;;  %v1911_v39 = vadd.f32 %v1910_v32, %v1898_v29  ;;  %v5263_v60 = vor.u32 %v5859_v56, %v5262_v55  ;;  %v4947_v29 = vor.u32 %v5777_v23, %v4944_v24  ;;  %v5187_v32 = vor.u32 %v5837_v28, %v5184_v31  ;;  %v5482_v56 = vld [vmem:[#allocation7 + $0x5f0] sm:$0xf]  ;;  %v4870_v24 = vld [vmem:[#allocation7 + $0x120] sm:$0xf]  ;;  %v5812_v31 = vld [vmem:[#allocation7 + $0x2d4] sm:$0xf] }
 0x153   : > { %v1925_v41 = vpop.f32.mrf.mxu1 }
 0x154   : > { %3502 = vmatpush.bf16.msrb.mxu3 %v4867_v57  ;;  %v1924_v50 = vadd.f32 %v1923_v15, %v1911_v39  ;;  %v5222_v15 = vld [vmem:[#allocation7 + $0x3e8] sm:$0xf]  ;;  %v4904_v41 = vld [vmem:[#allocation7 + $0x17c] sm:$0xf0] }
 0x155   : > { %3467 = vmatpush.bf16.msra.mxu0 %v5103_v5  ;;  %3478 = vmatpush.bf16.msrb.mxu1 %v5303_v27  ;;  %v1936_v53 = vpop.f32.mrf.mxu2  ;;  %v5832_v27 = vld [vmem:[#allocation7 + $0x374] sm:$0xf]  ;;  %v4907_v51 = vor.u32 %v5767_v40, %v4904_v41 }
 0x156   : > { %v6324_v54 = vpop.f32.mrf.mxu3  ;;  %v1937_v57 = vadd.f32 %v1936_v53, %v1924_v50  ;;  %v5167_v37 = vor.u32 %v5832_v27, %v5164_v35  ;;  %v5144_v50 = vld [vmem:[#allocation7 + $0x35c] sm:$0xf0]  ;;  %v4884_v53 = vld [vmem:[#allocation7 + $0x154] sm:$0xf0]  ;;  %v5755_v35 = vld [vmem:[#allocation7 + $0x108] sm:$0xf0] }
 0x157   : > { %v1912_v58 = vpop.f32.mrf.mxu0  ;;  %v5147_v55 = vor.u32 %v5827_v38, %v5144_v50  ;;  %v4887_v3 = vor.u32 %v5762_v48, %v4884_v53  ;;  %v4850_v27 = vld [vmem:[#allocation7 + $0xf8] sm:$0xf]  ;;  %v4830_v38 = vld [vmem:[#allocation7 + $0xd0] sm:$0xf]  ;;  %v5750_v50 = vld [vmem:[#allocation7 + $0xe0] sm:$0xf0] }
 0x158   : > { %3503 = vmatpush.bf16.msrb.mxu3 %v4847_v6  ;;  %v2136_v18 = vmax.f32 %v1937_v57, 0.0  ;;  %v4747_v6 = vor.u32 %v5727_v62, %v4744_v63  ;;  %v5914_v57 = vld [vmem:[#allocation7 + $0x600] sm:$0xf0]  ;;  %v5912_v58 = vld [vmem:[#allocation7 + $0x5f4] sm:$0xf] }
 0x159   : > { %3468 = vmatpush.bf16.msra.mxu0 %v5083_v19  ;;  %3479 = vmatpush.bf16.msrb.mxu1 %v5283_v46  ;;  %v4727_v19 = vor.u32 %v5722_v9, %v4724_v10  ;;  %v5503_v46 = vor.u32 %v5919_v43, %v5502_v42  ;;  %v5907_v9 = vld [vmem:[#allocation7 + $0x5cc] sm:$0xf]  ;;  %v5424_v43 = vld [vmem:[#allocation7 + $0x58c] sm:$0xf0]  ;;  %v5894_v53 = vld [vmem:[#allocation7 + $0x560] sm:$0xf0] }
 0x15a   : > { %v6326_v5 = vpack.c.bf16 %v2136_v18, %v2136_v18  ;;  %v5822_v18 = vld [vmem:[#allocation7 + $0x324] sm:$0xf]  ;;  %v5402_v48 = vld [vmem:[#allocation7 + $0x550] sm:$0xf] }
 0x15b   : > { %3489 = vmatpush.bf16.msra.mxu2 %v5503_v46  ;;  %v5127_v4 = vor.u32 %v5822_v18, %v5124_v1  ;;  %v5745_v18 = vld [vmem:[#allocation7 + $0xb8] sm:$0xf0]  ;;  %v5382_v1 = vld [vmem:[#allocation7 + $0x528] sm:$0xf] }
 0x15c   : > { %3504 = vmatpush.bf16.msrb.mxu3 %v4827_v20  ;;  %v5223_v20 = vor.u32 %v5849_v16, %v5222_v15  ;;  %v5467_v16 = vor.u32 %v5907_v9, %v5464_v12  ;;  %v5362_v12 = vld [vmem:[#allocation7 + $0x500] sm:$0xf] }
 0x15d   : > { %3469 = vmatpush.bf16.msra.mxu0 %v5063_v26  ;;  %3480 = vmatpush.bf16.msrb.mxu1 %v5263_v60  ;;  %v1938_v13 = vpop.f32.mrf.mxu2  ;;  %v5203_v26 = vor.u32 %v5844_v17, %v5202_v25  ;;  %v5483_v60 = vor.u32 %v5914_v57, %v5482_v56  ;;  %v5760_v25 = vld [vmem:[#allocation7 + $0x130] sm:$0xf0]  ;;  %v5403_v56 = vor.u32 %v5894_v53, %v5402_v48  ;;  %v5404_v57 = vld [vmem:[#allocation7 + $0x564] sm:$0xf0]  ;;  %v5725_v53 = vld [vmem:[#allocation7 + $0x18] sm:$0xf0] }
 0x15e   : > { %3458 = vmatmul.bf16.vlgmr.msra.gmra.mxu3 %v6326_v5  ;;  %v1951_v14 = vpop.f32.mrf.mxu3  ;;  %v5817_v13 = vld [vmem:[#allocation7 + $0x2fc] sm:$0xf] }
 0x15f   : > { %3490 = vmatpush.bf16.msra.mxu2 %v5483_v60  ;;  %v5104_v14 = vld [vmem:[#allocation7 + $0x30c] sm:$0xf0] }
 0x160   : > { %3505 = vmatpush.bf16.msrb.mxu3 %v4807_v33  ;;  %v1962_v21 = vpop.f32.mrf.mxu0  ;;  %v5772_v33 = vld [vmem:[#allocation7 + $0x194] sm:$0xf] }
 0x161   : > { %3470 = vmatpush.bf16.msra.mxu0 %v5043_v44  ;;  %3481 = vmatpush.bf16.msrb.mxu1 %v5243_v7  ;;  %v4927_v30 = vor.u32 %v5772_v33, %v4924_v34  ;;  %v5917_v44 = vld [vmem:[#allocation7 + $0x61c] sm:$0xf]  ;;  %v5462_v7 = vld [vmem:[#allocation7 + $0x5c8] sm:$0xf]  ;;  %v4871_v34 = vor.u32 %v5760_v25, %v4870_v24  ;;  %v5880_v24 = vld [vmem:[#allocation7 + $0x4f0] sm:$0xf0] }
 0x164   : > { %3506 = vmatpush.bf16.msrb.mxu3 %v4787_v45  ;;  %v762_v45 = vperm.slane %v6314_v52, 2 }
 0x165   : > { %3515 = vmatpush.bf16.msrb.mxu0 %v5027_v47  ;;  %3482 = vmatpush.bf16.msrb.mxu1 %v5223_v20  ;;  %v5504_v47 = vld [vmem:[#allocation7 + $0x62c] sm:$0xf0]  ;;  %v5442_v20 = vld [vmem:[#allocation7 + $0x5a0] sm:$0xf] }
 0x166   : > { %v5507_v49 = vor.u32 %v5917_v44, %v5504_v47  ;;  %v5807_v44 = vld [vmem:[#allocation7 + $0x2ac] sm:$0xf] }
 0x168   : > { %3507 = vmatpush.bf16.msrb.mxu3 %v4767_v59  ;;  %v1964_v39 = vpop.f32.mrf.mxu0  ;;  %v1950_v59 = vadd.f32 %v6324_v54, %v762_v45  ;;  %v5064_v45 = vld [vmem:[#allocation7 + $0x2bc] sm:$0xf0] }
 0x169   : > { %3516 = vmatpush.bf16.msrb.mxu0 %v5007_v61  ;;  %3483 = vmatpush.bf16.msrb.mxu1 %v5203_v26  ;;  %v5484_v61 = vld [vmem:[#allocation7 + $0x604] sm:$0xf0]  ;;  %v5444_v26 = vld [vmem:[#allocation7 + $0x5b4] sm:$0xf0]  ;;  %v5899_v39 = vld [vmem:[#allocation7 + $0x588] sm:$0xf0]  ;;  %v5067_v47 = vor.u32 %v5807_v44, %v5064_v45 }
 0x16a   : > { %v5487_v63 = vor.u32 %v5912_v58, %v5484_v61  ;;  %v1963_v2 = vadd.f32 %v1962_v21, %v1950_v59  ;;  %v5904_v21 = vld [vmem:[#allocation7 + $0x5b0] sm:$0xf0]  ;;  %v5802_v58 = vld [vmem:[#allocation7 + $0x284] sm:$0xf]  ;;  %v5044_v59 = vld [vmem:[#allocation7 + $0x294] sm:$0xf0] }
 0x16b   : > { %v1975_v36 = vpop.f32.mrf.mxu1  ;;  %v5443_v17 = vor.u32 %v5904_v21, %v5442_v20  ;;  %v5047_v61 = vor.u32 %v5802_v58, %v5044_v59  ;;  %v5344_v20 = vld [vmem:[#allocation7 + $0x4ec] sm:$0xf0]  ;;  %v5290_v58 = vld [vmem:[#allocation7 + $0x468] sm:$0xf] }
 0x16c   : > { %3508 = vmatpush.bf16.msrb.mxu3 %v4747_v6  ;;  %v1976_v6 = vadd.f32 %v1975_v36, %v1963_v2  ;;  %v5889_v2 = vld [vmem:[#allocation7 + $0x538] sm:$0xf0] }
 0x16d   : > { %3517 = vmatpush.bf16.msrb.mxu0 %v4987_v8  ;;  %3528 = vmatpush.bf16.msra.mxu1 %v5187_v32  ;;  %v5909_v8 = vld [vmem:[#allocation7 + $0x5d8] sm:$0xf0] }
 0x16e   : > { %v5463_v11 = vor.u32 %v5909_v8, %v5462_v7 }
 0x170   : > { %3509 = vmatpush.bf16.msrb.mxu3 %v4727_v19  ;;  %v5107_v19 = vor.u32 %v5817_v13, %v5104_v14  ;;  %3491 = vmatpush.bf16.msra.mxu2 %v5463_v11  ;;  %v5884_v13 = vld [vmem:[#allocation7 + $0x510] sm:$0xf0]  ;;  %v5882_v14 = vld [vmem:[#allocation7 + $0x504] sm:$0xf] }
 0x171   : > { %3518 = vmatpush.bf16.msrb.mxu0 %v4967_v22  ;;  %3529 = vmatpush.bf16.msra.mxu1 %v5167_v37  ;;  %v5902_v22 = vld [vmem:[#allocation7 + $0x5a4] sm:$0xf]  ;;  %v5422_v37 = vld [vmem:[#allocation7 + $0x578] sm:$0xf] }
 0x172   : > { %v5447_v28 = vor.u32 %v5902_v22, %v5444_v26  ;;  %v5423_v42 = vor.u32 %v5899_v39, %v5422_v37  ;;  %v4770_v26 = vld [vmem:[#allocation7 + $0x58] sm:$0xf]  ;;  %v763_v39 = vperm.slane %v6314_v52, 3  ;;  %v5920_v52 = vld [vmem:[#allocation7 + $0x630] sm:$0xf0] }
 0x173   : > { %3510 = vmatmul.bf16.vlgmr.msrb.gmra.mxu3 %v6320_v0  ;;  %v1977_v62 = vpop.f32.mrf.mxu1 }
 0x174   : > { %3554 = vmatpush.bf16.msra.mxu3 %v5507_v49  ;;  %3492 = vmatpush.bf16.msra.mxu2 %v5443_v17  ;;  %v4851_v49 = vor.u32 %v5755_v35, %v4850_v27  ;;  %v4831_v62 = vor.u32 %v5750_v50, %v4830_v38  ;;  %v4730_v38 = vld [vmem:[#allocation7 + $0x8] sm:$0xf] }
 0x175   : > { %3519 = vmatpush.bf16.msrb.mxu0 %v4947_v29  ;;  %3530 = vmatpush.bf16.msra.mxu1 %v5147_v55  ;;  %v1988_v54 = vpop.f32.mrf.mxu2  ;;  %v5084_v29 = vld [vmem:[#allocation7 + $0x2e4] sm:$0xf0]  ;;  %v5892_v55 = vld [vmem:[#allocation7 + $0x554] sm:$0xf] }
 0x176   : > { %v2001_v10 = vpop.f32.mrf.mxu3  ;;  %v1989_v15 = vadd.f32 %v1988_v54, %v1976_v6  ;;  %v5087_v33 = vor.u32 %v5812_v31, %v5084_v29  ;;  %v5407_v60 = vor.u32 %v5892_v55, %v5404_v57  ;;  %v5384_v6 = vld [vmem:[#allocation7 + $0x53c] sm:$0xf0]  ;;  %v5872_v31 = vld [vmem:[#allocation7 + $0x4b4] sm:$0xf]  ;;  %v5324_v29 = vld [vmem:[#allocation7 + $0x4c4] sm:$0xf0] }
 0x177   : > { %v4790_v54 = vld [vmem:[#allocation7 + $0x80] sm:$0xf]  ;;  %v5284_v57 = vld [vmem:[#allocation7 + $0x474] sm:$0xf0] }
 0x178   : > { %3555 = vmatpush.bf16.msra.mxu3 %v5487_v63  ;;  %v2002_v23 = vadd.f32 %v2001_v10, %v1989_v15  ;;  %3493 = vmatpush.bf16.msra.mxu2 %v5423_v42  ;;  %v4810_v63 = vld [vmem:[#allocation7 + $0xa8] sm:$0xf]  ;;  %v5740_v10 = vld [vmem:[#allocation7 + $0x90] sm:$0xf0]  ;;  %v5363_v15 = vor.u32 %v5884_v13, %v5362_v12  ;;  %v5304_v42 = vld [vmem:[#allocation7 + $0x49c] sm:$0xf0] }
 0x179   : > { %3520 = vmatpush.bf16.msrb.mxu0 %v4927_v30  ;;  %3531 = vmatpush.bf16.msra.mxu1 %v5127_v4  ;;  %v5897_v30 = vld [vmem:[#allocation7 + $0x57c] sm:$0xf]  ;;  %v5383_v4 = vor.u32 %v5889_v2, %v5382_v1  ;;  %v4811_v9 = vor.u32 %v5745_v18, %v4810_v63  ;;  %v4791_v25 = vor.u32 %v5740_v10, %v4790_v54  ;;  %v5510_v55 = vld [vmem:[#allocation7 + $0x620] sm:$0xf]  ;;  %v5490_v2 = vld [vmem:[#allocation7 + $0x5f8] sm:$0xf] }
 0x17a   : > { %v2137_v32 = vmax.f32 %v2002_v23, 0.0  ;;  %v5427_v46 = vor.u32 %v5897_v30, %v5424_v43  ;;  %v5350_v23 = vld [vmem:[#allocation7 + $0x4e0] sm:$0xf]  ;;  %v4750_v30 = vld [vmem:[#allocation7 + $0x30] sm:$0xf]  ;;  %v5511_v1 = vor.u32 %v5920_v52, %v5510_v55 }
 0x17b   : > { %v5351_v17 = vor.u32 %v5880_v24, %v5350_v23  ;;  %v5310_v43 = vld [vmem:[#allocation7 + $0x490] sm:$0xf]  ;;  %v5860_v54 = vld [vmem:[#allocation7 + $0x450] sm:$0xf0]  ;;  %v5845_v52 = vld [vmem:[#allocation7 + $0x3d8] sm:$0xf0] }
 0x17c   : > { %3556 = vmatpush.bf16.msra.mxu3 %v5467_v16  ;;  %v6332_v36 = vpack.c.bf16 %v2137_v32, %v2137_v32  ;;  %3494 = vmatpush.bf16.msra.mxu2 %v5403_v56  ;;  %v5364_v16 = vld [vmem:[#allocation7 + $0x514] sm:$0xf0]  ;;  %v5862_v56 = vld [vmem:[#allocation7 + $0x464] sm:$0xf]  ;;  %v5470_v13 = vld [vmem:[#allocation7 + $0x5d0] sm:$0xf] }
 0x17d   : > { %3521 = vmatpush.bf16.msrb.mxu0 %v4907_v51  ;;  %3532 = vmatpush.bf16.msra.mxu1 %v5107_v19  ;;  %v1990_v40 = vpop.f32.mrf.mxu2  ;;  %v5877_v19 = vld [vmem:[#allocation7 + $0x4dc] sm:$0xf]  ;;  %v5367_v21 = vor.u32 %v5882_v14, %v5364_v16  ;;  %v5330_v32 = vld [vmem:[#allocation7 + $0x4b8] sm:$0xf]  ;;  %v5910_v14 = vld [vmem:[#allocation7 + $0x5e0] sm:$0xf0] }
 0x17e   : > { %v2003_v41 = vpop.f32.mrf.mxu3  ;;  %3471 = vmatmul.bf16.vlgmr.msra.gmra.mxu0 %v6332_v36  ;;  %v5347_v22 = vor.u32 %v5877_v19, %v5344_v20  ;;  %v5730_v40 = vld [vmem:[#allocation7 + $0x40] sm:$0xf0]  ;;  %v5852_v16 = vld [vmem:[#allocation7 + $0x414] sm:$0xf]  ;;  %v5244_v19 = vld [vmem:[#allocation7 + $0x424] sm:$0xf0] }
 0x17f   : > { %v5867_v41 = vld [vmem:[#allocation7 + $0x48c] sm:$0xf]  ;;  %v5250_v20 = vld [vmem:[#allocation7 + $0x418] sm:$0xf]  ;;  %v5800_v23 = vld [vmem:[#allocation7 + $0x270] sm:$0xf0]  ;;  %v5247_v24 = vor.u32 %v5852_v16, %v5244_v19 }
 0x180   : > { %3557 = vmatpush.bf16.msra.mxu3 %v5447_v28  ;;  %v6335_v51 = vpop.f32.mrf.mxu0  ;;  %3495 = vmatpush.bf16.msra.mxu2 %v5383_v4  ;;  %v5735_v28 = vld [vmem:[#allocation7 + $0x68] sm:$0xf0]  ;;  %v5307_v45 = vor.u32 %v5867_v41, %v5304_v42  ;;  %v5264_v4 = vld [vmem:[#allocation7 + $0x44c] sm:$0xf0] }
 0x181   : > { %3522 = vmatpush.bf16.msrb.mxu0 %v4887_v3  ;;  %3533 = vmatpush.bf16.msra.mxu1 %v5087_v33  ;;  %v5887_v3 = vld [vmem:[#allocation7 + $0x52c] sm:$0xf]  ;;  %v5327_v33 = vor.u32 %v5872_v31, %v5324_v29  ;;  %v4771_v35 = vor.u32 %v5735_v28, %v4770_v26  ;;  %v2015_v48 = vadd.f32 %v6335_v51, %v763_v39  ;;  %v5857_v51 = vld [vmem:[#allocation7 + $0x43c] sm:$0xf]  ;;  %v5450_v31 = vld [vmem:[#allocation7 + $0x5a8] sm:$0xf] }
 0x182   : > { %v5387_v7 = vor.u32 %v5887_v3, %v5384_v6  ;;  %v5915_v3 = vld [vmem:[#allocation7 + $0x608] sm:$0xf0]  ;;  %v5270_v6 = vld [vmem:[#allocation7 + $0x440] sm:$0xf]  ;;  %v5471_v28 = vor.u32 %v5910_v14, %v5470_v13  ;;  %v5905_v29 = vld [vmem:[#allocation7 + $0x5b8] sm:$0xf0] }
 0x183   : > { %v5491_v12 = vor.u32 %v5915_v3, %v5490_v2  ;;  %v5795_v39 = vld [vmem:[#allocation7 + $0x248] sm:$0xf0]  ;;  %v5390_v2 = vld [vmem:[#allocation7 + $0x530] sm:$0xf]  ;;  %v5890_v3 = vld [vmem:[#allocation7 + $0x540] sm:$0xf0] }
 0x184   : > { %3558 = vmatpush.bf16.msra.mxu3 %v5427_v46  ;;  %3496 = vmatpush.bf16.msra.mxu2 %v5363_v15  ;;  %v5870_v46 = vld [vmem:[#allocation7 + $0x4a0] sm:$0xf0]  ;;  %v5352_v14 = vld [vmem:[#allocation7 + $0x4f4] sm:$0xf0] }
 0x185   : > { %3567 = vmatpush.bf16.msra.mxu0 %v4871_v34  ;;  %3534 = vmatpush.bf16.msra.mxu1 %v5067_v47  ;;  %v5875_v34 = vld [vmem:[#allocation7 + $0x4c8] sm:$0xf0]  ;;  %v5311_v50 = vor.u32 %v5870_v46, %v5310_v43  ;;  %v5451_v43 = vor.u32 %v5905_v29, %v5450_v31  ;;  %v5878_v13 = vld [vmem:[#allocation7 + $0x4e4] sm:$0xf] }
 0x186   : > { %v5331_v37 = vor.u32 %v5875_v34, %v5330_v32  ;;  %v5224_v34 = vld [vmem:[#allocation7 + $0x3fc] sm:$0xf0] }
 0x188   : > { %3559 = vmatpush.bf16.msra.mxu3 %v5407_v60  ;;  %v2016_v11 = vpop.f32.mrf.mxu0  ;;  %3541 = vmatpush.bf16.msrb.mxu2 %v5347_v22  ;;  %v5287_v60 = vor.u32 %v5862_v56, %v5284_v57  ;;  %v5030_v22 = vld [vmem:[#allocation7 + $0x260] sm:$0xf] }
 0x189   : > { %3568 = vmatpush.bf16.msra.mxu0 %v4851_v49  ;;  %3535 = vmatpush.bf16.msra.mxu1 %v5047_v61  ;;  %v4751_v49 = vor.u32 %v5730_v40, %v4750_v30  ;;  %v5865_v61 = vld [vmem:[#allocation7 + $0x478] sm:$0xf0]  ;;  %v5031_v32 = vor.u32 %v5800_v23, %v5030_v22  ;;  %v5850_v40 = vld [vmem:[#allocation7 + $0x400] sm:$0xf0]  ;;  %v4910_v22 = vld [vmem:[#allocation7 + $0x170] sm:$0xf] }
 0x18a   : > { %v5291_v63 = vor.u32 %v5865_v61, %v5290_v58  ;;  %v4970_v61 = vld [vmem:[#allocation7 + $0x1e8] sm:$0xf]  ;;  %v5770_v23 = vld [vmem:[#allocation7 + $0x180] sm:$0xf0] }
 0x18b   : > { %v6337_v8 = vpop.f32.mrf.mxu1  ;;  %v4911_v29 = vor.u32 %v5770_v23, %v4910_v22  ;;  %v5152_v23 = vld [vmem:[#allocation7 + $0x364] sm:$0xf0] }
 0x18c   : > { %3560 = vmatpush.bf16.msra.mxu3 %v5387_v7  ;;  %3542 = vmatpush.bf16.msrb.mxu2 %v5327_v33  ;;  %v2028_v59 = vadd.f32 %v6337_v8, %v2015_v48  ;;  %v5271_v8 = vor.u32 %v5860_v54, %v5270_v6  ;;  %v5847_v33 = vld [vmem:[#allocation7 + $0x3ec] sm:$0xf]  ;;  %v4990_v48 = vld [vmem:[#allocation7 + $0x210] sm:$0xf] }
 0x18d   : > { %3569 = vmatpush.bf16.msra.mxu0 %v4831_v62  ;;  %v4731_v62 = vor.u32 %v5725_v53, %v4730_v38  ;;  %v5227_v30 = vor.u32 %v5847_v33, %v5224_v34  ;;  %v5204_v38 = vld [vmem:[#allocation7 + $0x3d4] sm:$0xf0]  ;;  %v5790_v53 = vld [vmem:[#allocation7 + $0x220] sm:$0xf0]  ;;  %v4890_v33 = vld [vmem:[#allocation7 + $0x148] sm:$0xf] }
 0x18e   : > { %3523 = vmatmul.bf16.vlgmr.msrb.gmra.mxu0 %v6326_v5  ;;  %v4991_v58 = vor.u32 %v5790_v53, %v4990_v48  ;;  %v5765_v34 = vld [vmem:[#allocation7 + $0x158] sm:$0xf0] }
 0x190   : > { %3561 = vmatpush.bf16.msra.mxu3 %v5367_v21  ;;  %3543 = vmatpush.bf16.msrb.mxu2 %v5307_v45  ;;  %v5900_v45 = vld [vmem:[#allocation7 + $0x590] sm:$0xf0] }
 0x191   : > { %3570 = vmatpush.bf16.msra.mxu0 %v4811_v9  ;;  %v5267_v9 = vor.u32 %v5857_v51, %v5264_v4  ;;  %v4950_v51 = vld [vmem:[#allocation7 + $0x1c0] sm:$0xf]  ;;  %v5780_v4 = vld [vmem:[#allocation7 + $0x1d0] sm:$0xf0] }
 0x192   : > { %v4951_v54 = vor.u32 %v5780_v4, %v4950_v51  ;;  %v5170_v4 = vld [vmem:[#allocation7 + $0x378] sm:$0xf] }
 0x193   : > { %v2029_v27 = vpop.f32.mrf.mxu1 }
 0x194   : > { %3606 = vmatpush.bf16.msrb.mxu3 %v5351_v17  ;;  %3544 = vmatpush.bf16.msrb.mxu2 %v5287_v60  ;;  %v5230_v27 = vld [vmem:[#allocation7 + $0x3f0] sm:$0xf]  ;;  %v5895_v60 = vld [vmem:[#allocation7 + $0x568] sm:$0xf0] }
 0x195   : > { %3571 = vmatpush.bf16.msra.mxu0 %v4791_v25  ;;  %v2040_v44 = vpop.f32.mrf.mxu2  ;;  %v5855_v25 = vld [vmem:[#allocation7 + $0x428] sm:$0xf0]  ;;  %v5231_v41 = vor.u32 %v5850_v40, %v5230_v27  ;;  %v5868_v27 = vld [vmem:[#allocation7 + $0x494] sm:$0xf]  ;;  %v4872_v40 = vld [vmem:[#allocation7 + $0x134] sm:$0xf0] }
 0x196   : > { %v2053_v47 = vpop.f32.mrf.mxu3  ;;  %v2041_v18 = vadd.f32 %v2040_v44, %v2028_v59  ;;  %v5251_v17 = vor.u32 %v5855_v25, %v5250_v20  ;;  %v5430_v44 = vld [vmem:[#allocation7 + $0x580] sm:$0xf]  ;;  %v5410_v59 = vld [vmem:[#allocation7 + $0x558] sm:$0xf]  ;;  %v5332_v25 = vld [vmem:[#allocation7 + $0x4cc] sm:$0xf0] }
 0x197   : > { %v5431_v57 = vor.u32 %v5900_v45, %v5430_v44  ;;  %v5863_v45 = vld [vmem:[#allocation7 + $0x46c] sm:$0xf] }
 0x198   : > { %3607 = vmatpush.bf16.msrb.mxu3 %v5331_v37  ;;  %v2054_v11 = vadd.f32 %v2053_v47, %v2041_v18  ;;  %3545 = vmatpush.bf16.msrb.mxu2 %v5267_v9  ;;  %v5010_v37 = vld [vmem:[#allocation7 + $0x238] sm:$0xf]  ;;  %v5411_v18 = vor.u32 %v5895_v60, %v5410_v59  ;;  %v5391_v9 = vor.u32 %v5890_v3, %v5390_v2  ;;  %v5858_v59 = vld [vmem:[#allocation7 + $0x444] sm:$0xf] }
 0x199   : > { %3572 = vmatpush.bf16.msra.mxu0 %v4771_v35  ;;  %v5011_v47 = vor.u32 %v5795_v39, %v5010_v37  ;;  %v5312_v37 = vld [vmem:[#allocation7 + $0x4a4] sm:$0xf0]  ;;  %v5272_v60 = vld [vmem:[#allocation7 + $0x454] sm:$0xf0] }
 0x19a   : > { %v5275_v51 = vor.u32 %v5858_v59, %v5272_v60 }
 0x19c   : > { %3608 = vmatpush.bf16.msrb.mxu3 %v5311_v50  ;;  %3546 = vmatpush.bf16.msrb.mxu2 %v5247_v24  ;;  %v5210_v50 = vld [vmem:[#allocation7 + $0x3c8] sm:$0xf]  ;;  %v5873_v24 = vld [vmem:[#allocation7 + $0x4bc] sm:$0xf] }
 0x19d   : > { %3573 = vmatpush.bf16.msra.mxu0 %v4751_v49  ;;  %v2042_v7 = vpop.f32.mrf.mxu2  ;;  %v5842_v49 = vld [vmem:[#allocation7 + $0x3c4] sm:$0xf]  ;;  %v5211_v56 = vor.u32 %v5845_v52, %v5210_v50  ;;  %v5840_v52 = vld [vmem:[#allocation7 + $0x3b0] sm:$0xf0] }
 0x19e   : > { %v2055_v10 = vpop.f32.mrf.mxu3  ;;  %v5207_v55 = vor.u32 %v5842_v49, %v5204_v38  ;;  %v5753_v49 = vld [vmem:[#allocation7 + $0xfc] sm:$0xf]  ;;  %v4852_v38 = vld [vmem:[#allocation7 + $0x10c] sm:$0xf0] }
 0x19f   : > { %v4930_v10 = vld [vmem:[#allocation7 + $0x198] sm:$0xf] }
 0x1a0   : > { %3609 = vmatpush.bf16.msrb.mxu3 %v5291_v63  ;;  %v2066_v15 = vpop.f32.mrf.mxu0  ;;  %3547 = vmatpush.bf16.msrb.mxu2 %v5227_v30  ;;  %v5758_v30 = vld [vmem:[#allocation7 + $0x124] sm:$0xf] }
 0x1a1   : > { %3574 = vmatpush.bf16.msra.mxu0 %v4731_v62  ;;  %v2067_v21 = vadd.f32 %v2066_v15, %v2054_v11  ;;  %v5785_v62 = vld [vmem:[#allocation7 + $0x1f8] sm:$0xf0]  ;;  %v4875_v44 = vor.u32 %v5758_v30, %v4872_v40  ;;  %v5843_v40 = vld [vmem:[#allocation7 + $0x3cc] sm:$0xf] }
 0x1a2   : > { %v5885_v11 = vld [vmem:[#allocation7 + $0x518] sm:$0xf0] }
 0x1a3   : > { %v2138_v26 = vmax.f32 %v2067_v21, 0.0  ;;  %v5978_v15 = vld [vmem:[#allocation5] sm:$0x1f]  ;;  %v5355_v21 = vor.u32 %v5878_v13, %v5352_v14 }
 0x1a4   : > { %3610 = vmatpush.bf16.msrb.mxu3 %v5271_v8  ;;  %3575 = vmatmul.bf16.vlgmr.msra.gmra.mxu0 %v6320_v0  ;;  %v5370_v8 = vld [vmem:[#allocation7 + $0x508] sm:$0xf]  ;;  %v764_v16 = vperm.slane %v5978_v15, 4  ;;  %v5733_v30 = vld [vmem:[#allocation7 + $0x5c] sm:$0xf] }
 0x1a5   : > { %3619 = vmatpush.bf16.msrb.mxu0 %v5511_v1  ;;  %v6344_v35 = vpack.c.bf16 %v2138_v26, %v2138_v26  ;;  %3548 = vmatpush.bf16.msrb.mxu2 %v5207_v55  ;;  %v4971_v1 = vor.u32 %v5785_v62, %v4970_v61  ;;  %v5371_v19 = vor.u32 %v5885_v11, %v5370_v8  ;;  %v5190_v55 = vld [vmem:[#allocation7 + $0x3a0] sm:$0xf]  ;;  %v5252_v8 = vld [vmem:[#allocation7 + $0x42c] sm:$0xf0]  ;;  %v5743_v11 = vld [vmem:[#allocation7 + $0xac] sm:$0xf] }
 0x1a7   : > { %3484 = vmatmul.bf16.vlgmr.msrb.gmra.mxu1 %v6344_v35 }
 0x1a8   : > { %3611 = vmatpush.bf16.msrb.mxu3 %v5251_v17  ;;  %3580 = vmatpush.bf16.msrb.mxu1 %v5031_v32  ;;  %v2068_v46 = vpop.f32.mrf.mxu0  ;;  %v5335_v32 = vor.u32 %v5873_v24, %v5332_v25  ;;  %v5848_v24 = vld [vmem:[#allocation7 + $0x3f4] sm:$0xf]  ;;  %v5232_v25 = vld [vmem:[#allocation7 + $0x404] sm:$0xf0] }
 0x1a9   : > { %3620 = vmatpush.bf16.msrb.mxu0 %v5491_v12  ;;  %v5775_v12 = vld [vmem:[#allocation7 + $0x1a8] sm:$0xf0]  ;;  %v5292_v46 = vld [vmem:[#allocation7 + $0x47c] sm:$0xf0] }
 0x1aa   : > { %v4931_v20 = vor.u32 %v5775_v12, %v4930_v10  ;;  %v5295_v53 = vor.u32 %v5863_v45, %v5292_v46  ;;  %v5853_v10 = vld [vmem:[#allocation7 + $0x41c] sm:$0xf]  ;;  %v4812_v12 = vld [vmem:[#allocation7 + $0xbc] sm:$0xf0] }
 0x1ab   : > { %v2079_v42 = vpop.f32.mrf.mxu1  ;;  %v4815_v22 = vor.u32 %v5743_v11, %v4812_v12  ;;  %v5512_v11 = vld [vmem:[#allocation7 + $0x634] sm:$0xf0] }
 0x1ac   : > { %3612 = vmatpush.bf16.msrb.mxu3 %v5231_v41  ;;  %3581 = vmatpush.bf16.msrb.mxu1 %v5011_v47  ;;  %v2080_v17 = vadd.f32 %v2079_v42, %v764_v16  ;;  %v5315_v42 = vor.u32 %v5868_v27, %v5312_v37  ;;  %v5255_v16 = vor.u32 %v5853_v10, %v5252_v8  ;;  %v5823_v27 = vld [vmem:[#allocation7 + $0x32c] sm:$0xf]  ;;  %v5132_v37 = vld [vmem:[#allocation7 + $0x33c] sm:$0xf0]  ;;  %v5918_v8 = vld [vmem:[#allocation7 + $0x624] sm:$0xf] }
 0x1ad   : > { %3621 = vmatpush.bf16.msrb.mxu0 %v5471_v28  ;;  %v5135_v46 = vor.u32 %v5823_v27, %v5132_v37  ;;  %v5798_v37 = vld [vmem:[#allocation7 + $0x264] sm:$0xf] }
 0x1b0   : > { %3613 = vmatpush.bf16.msrb.mxu3 %v5211_v56  ;;  %3582 = vmatpush.bf16.msrb.mxu1 %v4991_v58  ;;  %v5838_v56 = vld [vmem:[#allocation7 + $0x3a4] sm:$0xf]  ;;  %v5192_v58 = vld [vmem:[#allocation7 + $0x3b4] sm:$0xf0] }
 0x1b1   : > { %3622 = vmatpush.bf16.msrb.mxu0 %v5451_v43  ;;  %v4891_v43 = vor.u32 %v5765_v34, %v4890_v33  ;;  %v5195_v3 = vor.u32 %v5838_v56, %v5192_v58  ;;  %v5235_v33 = vor.u32 %v5848_v24, %v5232_v25  ;;  %v5825_v34 = vld [vmem:[#allocation7 + $0x338] sm:$0xf0]  ;;  %v4752_v56 = vld [vmem:[#allocation7 + $0x44] sm:$0xf0]  ;;  %v5836_v58 = vld [vmem:[#allocation7 + $0x390] sm:$0xf0] }
 0x1b2   : > { %v5826_v24 = vld [vmem:[#allocation7 + $0x340] sm:$0xf0] }
 0x1b3   : > { %v2081_v63 = vpop.f32.mrf.mxu1 }
 0x1b4   : > { %3583 = vmatpush.bf16.msrb.mxu1 %v4971_v1  ;;  %v5748_v63 = vld [vmem:[#allocation7 + $0xd4] sm:$0xf]  ;;  %v5191_v1 = vor.u32 %v5840_v52, %v5190_v55  ;;  %v5112_v55 = vld [vmem:[#allocation7 + $0x314] sm:$0xf0] }
 0x1b5   : > { %3623 = vmatpush.bf16.msrb.mxu0 %v5431_v57  ;;  %v2092_v6 = vpop.f32.mrf.mxu2  ;;  %v4855_v57 = vor.u32 %v5753_v49, %v4852_v38  ;;  %v5110_v49 = vld [vmem:[#allocation7 + $0x300] sm:$0xf]  ;;  %v5820_v38 = vld [vmem:[#allocation7 + $0x310] sm:$0xf0] }
 0x1b6   : > { %v2105_v7 = vpop.f32.mrf.mxu3  ;;  %v2093_v31 = vadd.f32 %v2092_v6, %v2080_v17  ;;  %v5835_v6 = vld [vmem:[#allocation7 + $0x388] sm:$0xf0]  ;;  %v5738_v17 = vld [vmem:[#allocation7 + $0x84] sm:$0xf]  ;;  %v5728_v52 = vld [vmem:[#allocation7 + $0x34] sm:$0xf]  ;;  %v5111_v59 = vor.u32 %v5820_v38, %v5110_v49 }
 0x1b7   : > { %3536 = vmatmul.bf16.vlgmr.msra.gmra.mxu1 %v6332_v36  ;;  %v5171_v14 = vor.u32 %v5835_v6, %v5170_v4  ;;  %v5723_v4 = vld [vmem:[#allocation7 + $0xc] sm:$0xf]  ;;  %v4732_v6 = vld [vmem:[#allocation7 + $0x1c] sm:$0xf0] }
 0x1b8   : > { %3584 = vmatpush.bf16.msrb.mxu1 %v4951_v54  ;;  %v2106_v41 = vadd.f32 %v2105_v7, %v2093_v31  ;;  %v5833_v7 = vld [vmem:[#allocation7 + $0x37c] sm:$0xf]  ;;  %v5172_v54 = vld [vmem:[#allocation7 + $0x38c] sm:$0xf0]  ;;  %v5130_v31 = vld [vmem:[#allocation7 + $0x328] sm:$0xf] }
 0x1b9   : > { %3624 = vmatpush.bf16.msrb.mxu0 %v5411_v18  ;;  %v4832_v18 = vld [vmem:[#allocation7 + $0xe4] sm:$0xf0]  ;;  %v5175_v15 = vor.u32 %v5833_v7, %v5172_v54  ;;  %v5131_v45 = vor.u32 %v5825_v34, %v5130_v31  ;;  %v5158_v7 = vld [vmem:[#allocation7 + $0x358] sm:$0xf]  ;;  %v6358_v54 = vld [vmem:[#allocation8] sm:$0x1f] }
 0x1ba   : > { %v5052_v34 = vld [vmem:[#allocation7 + $0x29c] sm:$0xf0] }
 0x1bc   : > { %3585 = vmatpush.bf16.msrb.mxu1 %v4931_v20  ;;  %v5830_v20 = vld [vmem:[#allocation7 + $0x360] sm:$0xf0] }
 0x1bd   : > { %3625 = vmatpush.bf16.msrb.mxu0 %v5391_v9  ;;  %v2094_v26 = vpop.f32.mrf.mxu2  ;;  %v4835_v9 = vor.u32 %v5748_v63, %v4832_v18  ;;  %v5815_v63 = vld [vmem:[#allocation7 + $0x2e8] sm:$0xf0]  ;;  %v4755_v18 = vor.u32 %v5728_v52, %v4752_v56  ;;  %v5012_v52 = vld [vmem:[#allocation7 + $0x24c] sm:$0xf0]  ;;  %v5018_v56 = vld [vmem:[#allocation7 + $0x240] sm:$0xf] }
 0x1be   : > { %v2107_v28 = vpop.f32.mrf.mxu3  ;;  %v4792_v26 = vld [vmem:[#allocation7 + $0x94] sm:$0xf0] }
 0x1c0   : > { %v2118_v39 = vpop.f32.mrf.mxu0  ;;  %3586 = vmatpush.bf16.msrb.mxu1 %v4911_v29 }
 0x1c1   : > { %3626 = vmatpush.bf16.msrb.mxu0 %v5371_v19  ;;  %v2119_v47 = vadd.f32 %v2118_v39, %v2106_v41  ;;  %v5150_v19 = vld [vmem:[#allocation7 + $0x350] sm:$0xf]  ;;  %v4795_v39 = vor.u32 %v5738_v17, %v4792_v26  ;;  %v5212_v41 = vld [vmem:[#allocation7 + $0x3dc] sm:$0xf0]  ;;  %v5913_v17 = vld [vmem:[#allocation7 + $0x5fc] sm:$0xf] }
 0x1c2   : > { %v5151_v28 = vor.u32 %v5830_v20, %v5150_v19  ;;  %v5808_v19 = vld [vmem:[#allocation7 + $0x2b4] sm:$0xf]  ;;  %v5072_v20 = vld [vmem:[#allocation7 + $0x2c4] sm:$0xf0]  ;;  %v5492_v26 = vld [vmem:[#allocation7 + $0x60c] sm:$0xf0] }
 0x1c3   : > { %v5075_v31 = vor.u32 %v5808_v19, %v5072_v20  ;;  %v4972_v19 = vld [vmem:[#allocation7 + $0x1fc] sm:$0xf0]  ;;  %v4978_v20 = vld [vmem:[#allocation7 + $0x1f0] sm:$0xf] }
 0x1c4   : > { %3587 = vmatpush.bf16.msrb.mxu1 %v4891_v43  ;;  %v4772_v43 = vld [vmem:[#allocation7 + $0x6c] sm:$0xf0] }
 0x1c5   : > { %3671 = vmatpush.bf16.msra.mxu0 %v5355_v21  ;;  %v5828_v21 = vld [vmem:[#allocation7 + $0x354] sm:$0xf] }
 0x1c7   : > { %3588 = vmatmul.bf16.vlgmr.msrb.gmra.mxu1 %v6326_v5 }
 0x1c8   : > { %3632 = vmatpush.bf16.msra.mxu1 %v4875_v44  ;;  %v2120_v62 = vpop.f32.mrf.mxu0  ;;  %v5841_v44 = vld [vmem:[#allocation7 + $0x3b8] sm:$0xf0] }
 0x1c9   : > { %3672 = vmatpush.bf16.msra.mxu0 %v5335_v32  ;;  %v2131_v50 = vpop.f32.mrf.mxu1  ;;  %v5155_v32 = vor.u32 %v5828_v21, %v5152_v23  ;;  %v5090_v62 = vld [vmem:[#allocation7 + $0x2d8] sm:$0xf]  ;;  %v2387_v21 = vperm.slane %v6358_v54, 0  ;;  %v5138_v23 = vld [vmem:[#allocation7 + $0x330] sm:$0xf] }
 0x1ca   : > { %v2132_v48 = vadd.f32 %v2131_v50, %v2119_v47  ;;  %v5215_v47 = vor.u32 %v5843_v40, %v5212_v41  ;;  %v4775_v50 = vor.u32 %v5733_v30, %v4772_v43  ;;  %v5091_v10 = vor.u32 %v5815_v63, %v5090_v62  ;;  %v5038_v30 = vld [vmem:[#allocation7 + $0x268] sm:$0xf]  ;;  %v5801_v41 = vld [vmem:[#allocation7 + $0x278] sm:$0xf0]  ;;  %v5452_v62 = vld [vmem:[#allocation7 + $0x5bc] sm:$0xf0] }
 0x1cb   : > { %v5139_v27 = vor.u32 %v5826_v24, %v5138_v23  ;;  %v5495_v40 = vor.u32 %v5913_v17, %v5492_v26  ;;  %v5118_v43 = vld [vmem:[#allocation7 + $0x308] sm:$0xf]  ;;  %v5058_v23 = vld [vmem:[#allocation7 + $0x290] sm:$0xf]  ;;  %v5806_v24 = vld [vmem:[#allocation7 + $0x2a0] sm:$0xf0] }
 0x1cc   : > { %v2139_v61 = vmax.f32 %v2132_v48, 0.0  ;;  %3633 = vmatpush.bf16.msra.mxu1 %v4855_v57  ;;  %v5178_v57 = vld [vmem:[#allocation7 + $0x380] sm:$0xf]  ;;  %v5412_v17 = vld [vmem:[#allocation7 + $0x56c] sm:$0xf0] }
 0x1cd   : > { %3673 = vmatpush.bf16.msra.mxu0 %v5315_v42  ;;  %v5198_v42 = vld [vmem:[#allocation7 + $0x3a8] sm:$0xf] }
 0x1ce   : > { %v6349_v2 = vpack.c.bf16 %v2139_v61, %v2139_v61  ;;  %v5199_v48 = vor.u32 %v5841_v44, %v5198_v42  ;;  %v5821_v42 = vld [vmem:[#allocation7 + $0x318] sm:$0xf0] }
 0x1d0   : > { %3497 = vmatmul.bf16.vlgmr.msra.gmra.mxu2 %v6349_v2  ;;  %3562 = vmatmul.bf16.vlgmr.msra.gmra.mxu3 %v6349_v2 }
 0x1d1   : > { %3674 = vmatpush.bf16.msra.mxu0 %v5295_v53  ;;  %3593 = vmatpush.bf16.msra.mxu2 %v5191_v1  ;;  %v2133_v13 = vpop.f32.mrf.mxu1  ;;  %v5818_v53 = vld [vmem:[#allocation7 + $0x304] sm:$0xf]  ;;  %v5179_v1 = vor.u32 %v5836_v58, %v5178_v57 }
 0x1d2   : > { %3627 = vmatmul.bf16.vlgmr.msrb.gmra.mxu0 %v6349_v2  ;;  %3658 = vmatpush.bf16.msra.mxu3 %v5195_v3  ;;  %v5115_v61 = vor.u32 %v5818_v53, %v5112_v55  ;;  %v5813_v3 = vld [vmem:[#allocation7 + $0x2dc] sm:$0xf]  ;;  %v5070_v13 = vld [vmem:[#allocation7 + $0x2b0] sm:$0xf]  ;;  %v5119_v53 = vor.u32 %v5821_v42, %v5118_v43 }
 0x1d3   : > { %3634 = vmatpush.bf16.msra.mxu1 %v4835_v9  ;;  %v5831_v9 = vld [vmem:[#allocation7 + $0x368] sm:$0xf0]  ;;  %v5793_v55 = vld [vmem:[#allocation7 + $0x23c] sm:$0xf] }
 0x1d4   : > { %v5015_v63 = vor.u32 %v5793_v55, %v5012_v52  ;;  %v5773_v42 = vld [vmem:[#allocation7 + $0x19c] sm:$0xf]  ;;  %v5768_v52 = vld [vmem:[#allocation7 + $0x174] sm:$0xf] }
 0x1d5   : > { %3675 = vmatpush.bf16.msra.mxu0 %v5275_v51  ;;  %3594 = vmatpush.bf16.msra.mxu2 %v5171_v14  ;;  %v6354_v29 = vpop.f32.mrf.mxu2  ;;  %v5092_v51 = vld [vmem:[#allocation7 + $0x2ec] sm:$0xf0]  ;;  %v5810_v14 = vld [vmem:[#allocation7 + $0x2c0] sm:$0xf0] }
 0x1d6   : > { %3659 = vmatpush.bf16.msra.mxu3 %v5175_v15  ;;  %v5095_v12 = vor.u32 %v5813_v3, %v5092_v51  ;;  %v4735_v15 = vor.u32 %v5723_v4, %v4732_v6  ;;  %v5071_v25 = vor.u32 %v5810_v14, %v5070_v13  ;;  %v5788_v3 = vld [vmem:[#allocation7 + $0x214] sm:$0xf]  ;;  %v4992_v51 = vld [vmem:[#allocation7 + $0x224] sm:$0xf0]  ;;  %v4998_v4 = vld [vmem:[#allocation7 + $0x218] sm:$0xf] }
 0x1d7   : > { %3635 = vmatpush.bf16.msra.mxu1 %v4815_v22  ;;  %v5515_v22 = vor.u32 %v5918_v8, %v5512_v11  ;;  %v5898_v8 = vld [vmem:[#allocation7 + $0x584] sm:$0xf]  ;;  %v5432_v11 = vld [vmem:[#allocation7 + $0x594] sm:$0xf0] }
 0x1d9   : > { %3676 = vmatpush.bf16.msra.mxu0 %v5255_v16  ;;  %3595 = vmatpush.bf16.msra.mxu2 %v5151_v28  ;;  %v5159_v16 = vor.u32 %v5831_v9, %v5158_v7  ;;  %v5050_v28 = vld [vmem:[#allocation7 + $0x288] sm:$0xf]  ;;  %v5791_v7 = vld [vmem:[#allocation7 + $0x228] sm:$0xf0]  ;;  %v5078_v9 = vld [vmem:[#allocation7 + $0x2b8] sm:$0xf] }
 0x1da   : > { %3660 = vmatpush.bf16.msra.mxu3 %v5155_v32  ;;  %v5805_v32 = vld [vmem:[#allocation7 + $0x298] sm:$0xf0]  ;;  %v4999_v14 = vor.u32 %v5791_v7, %v4998_v4  ;;  %v4878_v7 = vld [vmem:[#allocation7 + $0x128] sm:$0xf] }
 0x1db   : > { %3636 = vmatpush.bf16.msra.mxu1 %v4795_v39  ;;  %v5032_v39 = vld [vmem:[#allocation7 + $0x274] sm:$0xf0]  ;;  %v5051_v44 = vor.u32 %v5805_v32, %v5050_v28  ;;  %v5778_v32 = vld [vmem:[#allocation7 + $0x1c4] sm:$0xf] }
 0x1dc   : > { %v5035_v38 = vor.u32 %v5798_v37, %v5032_v39  ;;  %v5781_v37 = vld [vmem:[#allocation7 + $0x1d8] sm:$0xf0]  ;;  %v5888_v39 = vld [vmem:[#allocation7 + $0x534] sm:$0xf] }
 0x1dd   : > { %3677 = vmatpush.bf16.msra.mxu0 %v5235_v33  ;;  %3596 = vmatpush.bf16.msra.mxu2 %v5131_v45  ;;  %v3448_v60 = vpop.f32.mrf.mxu2  ;;  %v5803_v33 = vld [vmem:[#allocation7 + $0x28c] sm:$0xf]  ;;  %v5908_v45 = vld [vmem:[#allocation7 + $0x5d4] sm:$0xf] }
 0x1de   : > { %3661 = vmatpush.bf16.msra.mxu3 %v5135_v46  ;;  %v5472_v46 = vld [vmem:[#allocation7 + $0x5e4] sm:$0xf0]  ;;  %v5055_v49 = vor.u32 %v5803_v33, %v5052_v34  ;;  %v5098_v60 = vld [vmem:[#allocation7 + $0x2e0] sm:$0xf]  ;;  %v4952_v33 = vld [vmem:[#allocation7 + $0x1d4] sm:$0xf0] }
 0x1df   : > { %3637 = vmatpush.bf16.msra.mxu1 %v4775_v50  ;;  %v5475_v58 = vor.u32 %v5908_v45, %v5472_v46  ;;  %v4938_v46 = vld [vmem:[#allocation7 + $0x1a0] sm:$0xf] }
 0x1e0   : > { %3549 = vmatmul.bf16.vlgmr.msrb.gmra.mxu2 %v6344_v35  ;;  %3614 = vmatmul.bf16.vlgmr.msrb.gmra.mxu3 %v6344_v35 }
 0x1e1   : > { %3678 = vmatpush.bf16.msra.mxu0 %v5215_v47  ;;  %3597 = vmatpush.bf16.msra.mxu2 %v5111_v59  ;;  %v3447_v47 = vadd.f32 %v6354_v29, %v2387_v21  ;;  %v3459_v50 = vpop.f32.mrf.mxu3  ;;  %v5796_v59 = vld [vmem:[#allocation7 + $0x250] sm:$0xf0]  ;;  %v5903_v29 = vld [vmem:[#allocation7 + $0x5ac] sm:$0xf]  ;;  %v5435_v21 = vor.u32 %v5898_v8, %v5432_v11 }
 0x1e2   : > { %3662 = vmatpush.bf16.msra.mxu3 %v5115_v61  ;;  %v5816_v61 = vld [vmem:[#allocation7 + $0x2f0] sm:$0xf0]  ;;  %v5455_v6 = vor.u32 %v5903_v29, %v5452_v62  ;;  %v5338_v62 = vld [vmem:[#allocation7 + $0x4c0] sm:$0xf] }
 0x1e3   : > { %3638 = vmatpush.bf16.msra.mxu1 %v4755_v18  ;;  %v6364_v57 = vadd.f32 %v3459_v50, %v3447_v47  ;;  %v5019_v18 = vor.u32 %v5796_v59, %v5018_v56  ;;  %v5776_v47 = vld [vmem:[#allocation7 + $0x1b0] sm:$0xf0]  ;;  %v4912_v56 = vld [vmem:[#allocation7 + $0x184] sm:$0xf0]  ;;  %v4918_v59 = vld [vmem:[#allocation7 + $0x178] sm:$0xf] }
 0x1e4   : > { %3679 = vmatmul.bf16.vlgmr.msra.gmra.mxu0 %v6344_v35  ;;  %v4939_v55 = vor.u32 %v5776_v47, %v4938_v46  ;;  %v4915_v29 = vor.u32 %v5768_v52, %v4912_v56  ;;  %v5238_v46 = vld [vmem:[#allocation7 + $0x3f8] sm:$0xf]  ;;  %v5851_v47 = vld [vmem:[#allocation7 + $0x408] sm:$0xf0] }
 0x1e5   : > { %3723 = vmatpush.bf16.msrb.mxu0 %v5199_v48  ;;  %3598 = vmatpush.bf16.msra.mxu2 %v5091_v10  ;;  %v5039_v48 = vor.u32 %v5801_v41, %v5038_v30  ;;  %v5811_v10 = vld [vmem:[#allocation7 + $0x2c8] sm:$0xf0]  ;;  %v5392_v30 = vld [vmem:[#allocation7 + $0x544] sm:$0xf0]  ;;  %v4758_v56 = vld [vmem:[#allocation7 + $0x38] sm:$0xf] }
 0x1e6   : > { %3663 = vmatpush.bf16.msra.mxu3 %v5095_v12  ;;  %v4995_v12 = vor.u32 %v5788_v3, %v4992_v51  ;;  %v5395_v45 = vor.u32 %v5888_v39, %v5392_v30  ;;  %v4892_v3 = vld [vmem:[#allocation7 + $0x15c] sm:$0xf0]  ;;  %v4898_v51 = vld [vmem:[#allocation7 + $0x150] sm:$0xf]  ;;  %v5856_v39 = vld [vmem:[#allocation7 + $0x430] sm:$0xf0] }
 0x1e7   : > { %3639 = vmatpush.bf16.msra.mxu1 %v4735_v15  ;;  %v5079_v15 = vor.u32 %v5811_v10, %v5078_v9  ;;  %v5761_v9 = vld [vmem:[#allocation7 + $0x138] sm:$0xf0] }
 0x1e9   : > { %3724 = vmatpush.bf16.msrb.mxu0 %v5179_v1  ;;  %3599 = vmatpush.bf16.msra.mxu2 %v5071_v25  ;;  %v5099_v1 = vor.u32 %v5816_v61, %v5098_v60  ;;  %v3461_v13 = vpop.f32.mrf.mxu3  ;;  %v5893_v25 = vld [vmem:[#allocation7 + $0x55c] sm:$0xf]  ;;  %v5771_v60 = vld [vmem:[#allocation7 + $0x188] sm:$0xf0] }
 0x1ea   : > { %3640 = vmatmul.bf16.vlgmr.msra.gmra.mxu1 %v6320_v0  ;;  %3664 = vmatpush.bf16.msra.mxu3 %v5075_v31  ;;  %v5059_v31 = vor.u32 %v5806_v24, %v5058_v23  ;;  %v5415_v34 = vor.u32 %v5893_v25, %v5412_v17  ;;  %v5871_v13 = vld [vmem:[#allocation7 + $0x4a8] sm:$0xf0]  ;;  %v4838_v24 = vld [vmem:[#allocation7 + $0xd8] sm:$0xf] }
 0x1eb   : > { %3684 = vmatpush.bf16.msrb.mxu1 %v5515_v22  ;;  %v5786_v22 = vld [vmem:[#allocation7 + $0x200] sm:$0xf0]  ;;  %v5751_v25 = vld [vmem:[#allocation7 + $0xe8] sm:$0xf0] }
 0x1ec   : > { %v4979_v28 = vor.u32 %v5786_v22, %v4978_v20  ;;  %v5866_v22 = vld [vmem:[#allocation7 + $0x480] sm:$0xf0] }
 0x1ed   : > { %3725 = vmatpush.bf16.msrb.mxu0 %v5159_v16  ;;  %3600 = vmatpush.bf16.msra.mxu2 %v5051_v44  ;;  %v5783_v16 = vld [vmem:[#allocation7 + $0x1ec] sm:$0xf]  ;;  %v4932_v44 = vld [vmem:[#allocation7 + $0x1ac] sm:$0xf0] }
 0x1ee   : > { %3665 = vmatpush.bf16.msra.mxu3 %v5055_v49  ;;  %v4975_v26 = vor.u32 %v5783_v16, %v4972_v19  ;;  %v5883_v49 = vld [vmem:[#allocation7 + $0x50c] sm:$0xf]  ;;  %v4935_v50 = vor.u32 %v5773_v42, %v4932_v44  ;;  %v4858_v16 = vld [vmem:[#allocation7 + $0x100] sm:$0xf]  ;;  %v5756_v19 = vld [vmem:[#allocation7 + $0x110] sm:$0xf0] }
 0x1ef   : > { %3685 = vmatpush.bf16.msrb.mxu1 %v5495_v40  ;;  %v4955_v40 = vor.u32 %v5778_v32, %v4952_v33  ;;  %v4839_v32 = vor.u32 %v5751_v25, %v4838_v24  ;;  %v4818_v33 = vld [vmem:[#allocation7 + $0xb0] sm:$0xf]  ;;  %v4798_v42 = vld [vmem:[#allocation7 + $0x88] sm:$0xf]  ;;  %v5741_v44 = vld [vmem:[#allocation7 + $0x98] sm:$0xf0] }
 0x1f0   : > { %3601 = vmatmul.bf16.vlgmr.msra.gmra.mxu2 %v6332_v36 }
 0x1f1   : > { %3726 = vmatpush.bf16.msrb.mxu0 %v5139_v27  ;;  %3645 = vmatpush.bf16.msrb.mxu2 %v5035_v38  ;;  %v4958_v27 = vld [vmem:[#allocation7 + $0x1c8] sm:$0xf]  ;;  %v5372_v38 = vld [vmem:[#allocation7 + $0x51c] sm:$0xf0] }
 0x1f2   : > { %3710 = vmatpush.bf16.msrb.mxu3 %v5039_v48  ;;  %v4959_v43 = vor.u32 %v5781_v37, %v4958_v27  ;;  %v5358_v48 = vld [vmem:[#allocation7 + $0x4e8] sm:$0xf]  ;;  %v5258_v37 = vld [vmem:[#allocation7 + $0x420] sm:$0xf] }
 0x1f3   : > { %3686 = vmatpush.bf16.msrb.mxu1 %v5475_v58  ;;  %3666 = vmatmul.bf16.vlgmr.msra.gmra.mxu3 %v6332_v36  ;;  %v5375_v58 = vor.u32 %v5883_v49, %v5372_v38  ;;  %v4799_v49 = vor.u32 %v5741_v44, %v4798_v42  ;;  %v4778_v38 = vld [vmem:[#allocation7 + $0x60] sm:$0xf] }
 0x1f5   : > { %3727 = vmatpush.bf16.msrb.mxu0 %v5119_v53  ;;  %3646 = vmatpush.bf16.msrb.mxu2 %v5015_v63  ;;  %v5881_v53 = vld [vmem:[#allocation7 + $0x4f8] sm:$0xf0]  ;;  %v5876_v63 = vld [vmem:[#allocation7 + $0x4d0] sm:$0xf0] }
 0x1f6   : > { %3711 = vmatpush.bf16.msrb.mxu3 %v5019_v18  ;;  %v6368_v41 = vpop.f32.mrf.mxu3  ;;  %v5359_v61 = vor.u32 %v5881_v53, %v5358_v48  ;;  %v5339_v8 = vor.u32 %v5876_v63, %v5338_v62  ;;  %v5239_v48 = vor.u32 %v5851_v47, %v5238_v46  ;;  %v5218_v53 = vld [vmem:[#allocation7 + $0x3d0] sm:$0xf]  ;;  %v5518_v62 = vld [vmem:[#allocation7 + $0x628] sm:$0xf]  ;;  %v5921_v63 = vld [vmem:[#allocation7 + $0x638] sm:$0xf0] }
 0x1f7   : > { %3687 = vmatpush.bf16.msrb.mxu1 %v5455_v6  ;;  %v5766_v6 = vld [vmem:[#allocation7 + $0x160] sm:$0xf0]  ;;  %v3767_v46 = vld [vmem:[%s6403_s7] sm:$0x1f] }
 0x1f9   : > { %3728 = vmatpush.bf16.msrb.mxu0 %v5099_v1  ;;  %3647 = vmatpush.bf16.msrb.mxu2 %v4995_v12  ;;  %v4919_v1 = vor.u32 %v5771_v60, %v4918_v59  ;;  %v5318_v12 = vld [vmem:[#allocation7 + $0x498] sm:$0xf] }
 0x1fa   : > { %3712 = vmatpush.bf16.msrb.mxu3 %v4999_v14  ;;  %v4899_v14 = vor.u32 %v5766_v6, %v4898_v51  ;;  %v5319_v20 = vor.u32 %v5871_v13, %v5318_v12  ;;  %v5916_v51 = vld [vmem:[#allocation7 + $0x610] sm:$0xf0]  ;;  %v5478_v6 = vld [vmem:[#allocation7 + $0x5d8] sm:$0xf]  ;;  %v5458_v13 = vld [vmem:[#allocation7 + $0x5b0] sm:$0xf] }
 0x1fb   : > { %3688 = vmatpush.bf16.msrb.mxu1 %v5435_v21  ;;  %v3472_v4 = vpop.f32.mrf.mxu0  ;;  %v5298_v21 = vld [vmem:[#allocation7 + $0x470] sm:$0xf] }
 0x1fc   : > { %v6372_v10 = vadd.f32 %v3472_v4, %v6364_v57  ;;  %v4859_v57 = vor.u32 %v5756_v19, %v4858_v16  ;;  %v5299_v17 = vor.u32 %v5866_v22, %v5298_v21  ;;  %v5901_v16 = vld [vmem:[#allocation7 + $0x598] sm:$0xf0]  ;;  %v5418_v21 = vld [vmem:[#allocation7 + $0x560] sm:$0xf]  ;;  %v5896_v22 = vld [vmem:[#allocation7 + $0x570] sm:$0xf0] }
 0x1fd   : > { %3729 = vmatpush.bf16.msrb.mxu0 %v5079_v15  ;;  %3648 = vmatpush.bf16.msrb.mxu2 %v4975_v26  ;;  %v4879_v15 = vor.u32 %v5761_v9, %v4878_v7  ;;  %v5278_v26 = vld [vmem:[#allocation7 + $0x448] sm:$0xf]  ;;  %v5911_v7 = vld [vmem:[#allocation7 + $0x5e8] sm:$0xf0] }
 0x1fe   : > { %3713 = vmatpush.bf16.msrb.mxu3 %v4979_v28  ;;  %v3513_v18 = vpop.f32.mrf.mxu3  ;;  %v5861_v28 = vld [vmem:[#allocation7 + $0x458] sm:$0xf0]  ;;  %v5479_v12 = vor.u32 %v5911_v7, %v5478_v6 }
 0x1ff   : > { %3689 = vmatpush.bf16.msrb.mxu1 %v5415_v34  ;;  %v5746_v34 = vld [vmem:[#allocation7 + $0xc0] sm:$0xf0]  ;;  %v5279_v27 = vor.u32 %v5861_v28, %v5278_v26 }
 0x200   : > { %v5886_v26 = vld [vmem:[#allocation7 + $0x520] sm:$0xf0] }
 0x201   : > { %3730 = vmatpush.bf16.msrb.mxu0 %v5059_v31  ;;  %3649 = vmatpush.bf16.msrb.mxu2 %v4955_v40  ;;  %v2388_v31 = vperm.slane %v6358_v54, 1  ;;  %v4819_v40 = vor.u32 %v5746_v34, %v4818_v33 }
 0x202   : > { %3714 = vmatpush.bf16.msrb.mxu3 %v4959_v43 }
 0x203   : > { %3690 = vmatpush.bf16.msrb.mxu1 %v5395_v45  ;;  %v3474_v23 = vpop.f32.mrf.mxu0  ;;  %v3512_v30 = vadd.f32 %v6368_v41, %v2388_v31  ;;  %v5259_v45 = vor.u32 %v5856_v39, %v5258_v37 }
 0x204   : > { %3731 = vmatmul.bf16.vlgmr.msrb.gmra.mxu0 %v6332_v36  ;;  %v5763_v36 = vld [vmem:[#allocation7 + $0x14c] sm:$0xf]  ;;  %v5398_v23 = vld [vmem:[#allocation7 + $0x538] sm:$0xf] }
 0x205   : > { %3650 = vmatpush.bf16.msrb.mxu2 %v4935_v50  ;;  %v4895_v11 = vor.u32 %v5763_v36, %v4892_v3  ;;  %v5736_v50 = vld [vmem:[#allocation7 + $0x70] sm:$0xf0]  ;;  %v5519_v36 = vor.u32 %v5921_v63, %v5518_v62  ;;  %v5498_v3 = vld [vmem:[#allocation7 + $0x600] sm:$0xf] }
 0x206   : > { %3715 = vmatpush.bf16.msrb.mxu3 %v4939_v55  ;;  %v5846_v55 = vld [vmem:[#allocation7 + $0x3e0] sm:$0xf0]  ;;  %v4779_v41 = vor.u32 %v5736_v50, %v4778_v38  ;;  %v5499_v4 = vor.u32 %v5916_v51, %v5498_v3  ;;  %v3769_v50 = vperm.slane %v3767_v46, 0  ;;  %v3771_v3 = vperm.slane %v3767_v46, 2 }
 0x207   : > { %3691 = vmatpush.bf16.msrb.mxu1 %v5375_v58  ;;  %v5731_v58 = vld [vmem:[#allocation7 + $0x48] sm:$0xf0]  ;;  %v5219_v59 = vor.u32 %v5846_v55, %v5218_v53  ;;  %v3770_v53 = vperm.slane %v3767_v46, 1 }
 0x208   : > { %v4759_v60 = vor.u32 %v5731_v58, %v4758_v56 }
 0x209   : > { %3651 = vmatpush.bf16.msrb.mxu2 %v4915_v29  ;;  %v5726_v29 = vld [vmem:[#allocation7 + $0x20] sm:$0xf0] }
 0x20a   : > { %3692 = vmatmul.bf16.vlgmr.msrb.gmra.mxu1 %v6349_v2  ;;  %3716 = vmatpush.bf16.msrb.mxu3 %v4919_v1 }
 0x20b   : > { %3736 = vmatpush.bf16.msra.mxu1 %v5359_v61  ;;  %v3524_v43 = vpop.f32.mrf.mxu0  ;;  %v4738_v61 = vld [vmem:[#allocation7 + $0x10] sm:$0xf] }
 0x20c   : > { %v4739_v18 = vor.u32 %v5726_v29, %v4738_v61 }
 0x20d   : > { %3652 = vmatpush.bf16.msrb.mxu2 %v4895_v11 }
 0x20e   : > { %3717 = vmatpush.bf16.msrb.mxu3 %v4899_v14  ;;  %v5906_v14 = vld [vmem:[#allocation7 + $0x5c0] sm:$0xf0] }
 0x20f   : > { %3737 = vmatpush.bf16.msra.mxu1 %v5339_v8 }
 0x210   : > { %3653 = vmatmul.bf16.vlgmr.msrb.gmra.mxu2 %v6326_v5 }
 0x211   : > { %3697 = vmatpush.bf16.msra.mxu2 %v4879_v15  ;;  %3718 = vmatmul.bf16.vlgmr.msrb.gmra.mxu3 %v6326_v5  ;;  %v3525_v5 = vadd.f32 %v3524_v43, %v3512_v30  ;;  %v5438_v15 = vld [vmem:[#allocation7 + $0x588] sm:$0xf] }
 0x213   : > { %3738 = vmatpush.bf16.msra.mxu1 %v5319_v20  ;;  %v3526_v52 = vpop.f32.mrf.mxu0  ;;  %v5439_v20 = vor.u32 %v5901_v16, %v5438_v15 }
 0x215   : > { %3698 = vmatpush.bf16.msra.mxu2 %v4859_v57  ;;  %v5419_v57 = vor.u32 %v5896_v22, %v5418_v21 }
 0x217   : > { %3739 = vmatpush.bf16.msra.mxu1 %v5299_v17  ;;  %v5378_v17 = vld [vmem:[#allocation7 + $0x510] sm:$0xf] }
 0x218   : > { %v5379_v28 = vor.u32 %v5886_v26, %v5378_v17 }
 0x219   : > { %3699 = vmatpush.bf16.msra.mxu2 %v4839_v32  ;;  %v2389_v32 = vperm.slane %v6358_v54, 2 }
 0x21b   : > { %3740 = vmatpush.bf16.msra.mxu1 %v5279_v27 }
 0x21d   : > { %3700 = vmatpush.bf16.msra.mxu2 %v4819_v40 }
 0x21f   : > { %3741 = vmatpush.bf16.msra.mxu1 %v5259_v45 }
 0x221   : > { %3701 = vmatpush.bf16.msra.mxu2 %v4799_v49  ;;  %v3576_v1 = vpop.f32.mrf.mxu0 }
 0x222   : > { %v3577_v33 = vadd.f32 %v3576_v1, %v2389_v32  ;;  %v2391_v32 = vperm.slane %v6358_v54, 4 }
 0x223   : > { %3742 = vmatpush.bf16.msra.mxu1 %v5239_v48 }
 0x224   : > { %v3485_v9 = vpop.f32.mrf.mxu1 }
 0x225   : > { %3702 = vmatpush.bf16.msra.mxu2 %v4779_v41  ;;  %v3486_v8 = vadd.f32 %v3485_v9, %v6372_v10 }
 0x227   : > { %3743 = vmatpush.bf16.msra.mxu1 %v5219_v59 }
 0x229   : > { %3703 = vmatpush.bf16.msra.mxu2 %v4759_v60  ;;  %v3578_v11 = vpop.f32.mrf.mxu0 }
 0x22a   : > { %3744 = vmatmul.bf16.vlgmr.msra.gmra.mxu1 %v6344_v35  ;;  %v5459_v35 = vor.u32 %v5906_v14, %v5458_v13  ;;  %v2390_v13 = vperm.slane %v6358_v54, 3 }
 0x22c   : > { %v3487_v19 = vpop.f32.mrf.mxu1 }
 0x22d   : > { %3704 = vmatpush.bf16.msra.mxu2 %v4739_v18 }
 0x230   : > { %3705 = vmatmul.bf16.vlgmr.msra.gmra.mxu2 %v6320_v0  ;;  %v5891_v0 = vld [vmem:[#allocation7 + $0x548] sm:$0xf0] }
 0x231   : > { %3749 = vmatpush.bf16.msrb.mxu2 %v5519_v36  ;;  %v5399_v25 = vor.u32 %v5891_v0, %v5398_v23 }
 0x234   : > { %v3537_v24 = vpop.f32.mrf.mxu1 }
 0x235   : > { %3750 = vmatpush.bf16.msrb.mxu2 %v5499_v4  ;;  %v3538_v10 = vadd.f32 %v3537_v24, %v3525_v5 }
 0x239   : > { %3751 = vmatpush.bf16.msrb.mxu2 %v5479_v12 }
 0x23c   : > { %v3539_v31 = vpop.f32.mrf.mxu1 }
 0x23d   : > { %3752 = vmatpush.bf16.msrb.mxu2 %v5459_v35 }
 0x241   : > { %3753 = vmatpush.bf16.msrb.mxu2 %v5439_v20 }
 0x244   : > { %v3589_v34 = vpop.f32.mrf.mxu1 }
 0x245   : > { %3754 = vmatpush.bf16.msrb.mxu2 %v5419_v57  ;;  %v3590_v27 = vadd.f32 %v3589_v34, %v3577_v33  ;;  %v3772_v57 = vperm.slane %v3767_v46, 3 }
 0x249   : > { %3755 = vmatpush.bf16.msrb.mxu2 %v5399_v25 }
 0x24c   : > { %v3591_v39 = vpop.f32.mrf.mxu1 }
 0x24d   : > { %3756 = vmatpush.bf16.msrb.mxu2 %v5379_v28 }
 0x24f   : > { %v3628_v37 = vpop.f32.mrf.mxu0 }
 0x250   : > { %3757 = vmatmul.bf16.vlgmr.msrb.gmra.mxu2 %v6349_v2 }
 0x253   : > { %v3498_v30 = vpop.f32.mrf.mxu2  ;;  %v3563_v40 = vpop.f32.mrf.mxu3 }
 0x254   : > { %v3499_v43 = vadd.f32 %v3498_v30, %v3486_v8 }
 0x256   : > { %v3762_v2 = vmax.f32 %v3499_v43, 0.0 }
 0x257   : > { %v3630_v42 = vpop.f32.mrf.mxu0 }
 0x258   : > { %v3779_v56 = vmul.f32 %v3769_v50, %v3762_v2 }
 0x25b   : > { %v3500_v44 = vpop.f32.mrf.mxu2  ;;  %v3565_v5 = vpop.f32.mrf.mxu3 }
 0x261   : > { %v3680_v45 = vpop.f32.mrf.mxu0 }
 0x263   : > { %v3550_v47 = vpop.f32.mrf.mxu2  ;;  %v3615_v49 = vpop.f32.mrf.mxu3 }
 0x264   : > { %v3551_v38 = vadd.f32 %v3550_v47, %v3538_v10 }
 0x266   : > { %v3564_v48 = vadd.f32 %v3563_v40, %v3551_v38  ;;  %v3773_v40 = vperm.slane %v3767_v46, 4 }
 0x267   : > { %v3641_v41 = vpop.f32.mrf.mxu1 }
 0x268   : > { %v3763_v52 = vmax.f32 %v3564_v48, 0.0  ;;  %v3642_v35 = vadd.f32 %v3641_v41, %v2390_v13 }
 0x269   : > { %v3682_v55 = vpop.f32.mrf.mxu0 }
 0x26a   : > { %v3780_v58 = vmul.f32 %v3770_v53, %v3763_v52 }
 0x26b   : > { %v3552_v59 = vpop.f32.mrf.mxu2  ;;  %v3617_v60 = vpop.f32.mrf.mxu3 }
 0x26c   : > { %v3784_v61 = vadd.f32 %v3780_v58, %v3779_v56 }
 0x26f   : > { %v3643_v29 = vpop.f32.mrf.mxu1 }
 0x273   : > { %v3602_v62 = vpop.f32.mrf.mxu2 }
 0x274   : > { %v3603_v63 = vadd.f32 %v3602_v62, %v3590_v27 }
 0x276   : > { %v3667_v18 = vpop.f32.mrf.mxu3  ;;  %v3616_v1 = vadd.f32 %v3615_v49, %v3603_v63 }
 0x278   : > { %v3629_v36 = vadd.f32 %v3628_v37, %v3616_v1 }
 0x27a   : > { %v3764_v51 = vmax.f32 %v3629_v36, 0.0 }
 0x27b   : > { %v3604_v6 = vpop.f32.mrf.mxu2 }
 0x27c   : > { %v3781_v9 = vmul.f32 %v3771_v3, %v3764_v51 }
 0x27e   : > { %v3669_v7 = vpop.f32.mrf.mxu3  ;;  %v3785_v8 = vadd.f32 %v3784_v61, %v3781_v9 }
 0x281   : > { %v3732_v4 = vpop.f32.mrf.mxu0 }
 0x287   : > { %v3693_v12 = vpop.f32.mrf.mxu1 }
 0x289   : > { %v3734_v11 = vpop.f32.mrf.mxu0 }
 0x28f   : > { %v3695_v14 = vpop.f32.mrf.mxu1 }
 0x293   : > { %v3654_v15 = vpop.f32.mrf.mxu2 }
 0x294   : > { %v3655_v16 = vadd.f32 %v3654_v15, %v3642_v35  ;;  %v3719_v19 = vpop.f32.mrf.mxu3 }
 0x296   : > { %v3668_v20 = vadd.f32 %v3667_v18, %v3655_v16 }
 0x298   : > { %v3681_v21 = vadd.f32 %v3680_v45, %v3668_v20  ;;  %v5973_v45 = vld [vmem:[#allocation2] ss:$0 sm:$0xff] }
 0x29a   : > { %v3694_v22 = vadd.f32 %v3693_v12, %v3681_v21 }
 0x29b   : > { %v3656_v23 = vpop.f32.mrf.mxu2 }
 0x29c   : > { %v3721_v0 = vpop.f32.mrf.mxu3  ;;  %v3765_v24 = vmax.f32 %v3694_v22, 0.0 }
 0x29e   : > { %v3782_v10 = vmul.f32 %v3772_v57, %v3765_v24 }
 0x2a0   : > { %v3786_v25 = vadd.f32 %v3785_v8, %v3782_v10 }
 0x2a7   : > { %v3745_v17 = vpop.f32.mrf.mxu1 }
 0x2af   : > { %v3747_v26 = vpop.f32.mrf.mxu1 }
 0x2b3   : > { %v3706_v28 = vpop.f32.mrf.mxu2 }
 0x2b4   : > { %v3707_v33 = vadd.f32 %v3706_v28, %v2391_v32 }
 0x2b6   : > { %v3720_v34 = vadd.f32 %v3719_v19, %v3707_v33 }
 0x2b8   : > { %v3733_v27 = vadd.f32 %v3732_v4, %v3720_v34 }
 0x2ba   : > { %v3746_v37 = vadd.f32 %v3745_v17, %v3733_v27 }
 0x2bb   : > { %v3708_v31 = vpop.f32.mrf.mxu2 }
 0x2d3   : > { %v3758_v39 = vpop.f32.mrf.mxu2 }
 0x2d4   : > { %v3759_v30 = vadd.f32 %v3758_v39, %v3746_v37 }
 0x2d6   : > { %v3766_v43 = vmax.f32 %v3759_v30, 0.0 }
 0x2d8   : > { %v3783_v42 = vmul.f32 %v3773_v40, %v3766_v43 }
 0x2da   : > { %v3787_v44 = vadd.f32 %v3786_v25, %v3783_v42 }
 0x2db   : > { %v3760_v5 = vpop.f32.mrf.mxu2 }
 0x2dc   : > { %3788 = vadd.xlane.f32.xlu0 %v3787_v44 }
 0x34f   : > { %v3789_v47 = vpop.xlane.xlu0 %3788 }
 0x350   : > { %v3794_v49 = vadd.f32 %v5973_v45, %v3789_v47 }
 0x352   : > { %v3795_v38 = vand.u32 2147483647, %v3794_v49  ;;  %vm3801_vm3 = vcmp.ge.f32.partialorder %v3794_v49, 0.0 }
 0x354   : > { %v3796_v2 = vsub.f32 0.0, %v3795_v38 }
 0x356   : > { %v3797_v50 = vmul.f32 1.442695, %v3796_v2 }
 0x358   : > { %5974 = vpow2.f32 %v3797_v50 }
 0x35e   : > { %v5975_v54 = vpop.eup %5974 }
 0x35f   : > { %v3799_v48 = vadd.f32 1.0, %v5975_v54 }
 0x361   : > { %5976 = vrcp.f32 %v3799_v48 }
 0x367   : > { %v5977_v53 = vpop.eup %5976 }
 0x368   : > { %v3802_v46 = vmul.f32 %v5977_v53, %v5975_v54 }
 0x36a   : > { %v3803_v55 = vsel %vm3801_vm3, %v5977_v53, %v3802_v46 }
 0x36b   : > { %3805 = vst.msk [vmem:[%s392_s13] sm:$0xff] %vm3804_vm2, %v3803_v55 }
 0x36c PF: > { %s24_s11 = sadd.s32 1, %s6117_s11  }
 0x36d   : > { %p21_p7 = scmp.ge.s32.totalorder %s24_s11, 4  }
 0x36f   :  { %23 = sbr.rel (!%p21_p7) target bundleno = 6 (0x6), region = 103 }
 0x374   :  { %3825 = vsyncpa [#allocation4], 1 }
 0x375   :  { %3827 = vsyncpa [#allocation4 + $0x1], 1 }
 0x376   :  { %3828 = vsyncpa [#allocation6], 1 }
 0x377   :  { %3829 = vsyncpa [#allocation9], 1 }

</bundles_post_ra>
